<compile_context>
chip_gen: v6e
topology: v6e:2x2x1
jax: 0.10.0
libtpu: 0.0.40
codegen_flags: <defaults>
</compile_context>

<pallas_src>
import math

import jax
import jax.numpy as jnp
from jax import lax
from jax.experimental import pallas as pl
from jax.experimental.pallas import tpu as pltpu

SHIFT = math.log(2.0)
LANE = 128
SUBLANE = 8


def _ssp(v):
    # shifted softplus: softplus(v) - log(2), numerically stable
    return jnp.logaddexp(v, 0.0) - SHIFT


def _round_up(n, m):
    return ((n + m - 1) // m) * m


def _pad2(a, rows, cols, dtype):
    a = jnp.asarray(a)
    return jnp.pad(a, ((0, rows - a.shape[0]), (0, cols - a.shape[1]))).astype(dtype)


def make_interaction_kernel(cutoff: float):
    cos_scale = math.pi / cutoff

    def kernel(x_ref, src_ref, dst_ref, ew_ref, ea_ref,
               w_mlp1_ref, b_mlp1_ref, w_mlp2_ref, b_mlp2_ref,
               w_lin1_ref, w_lin2_ref, b_lin2_ref,
               w_lin_ref, b_lin_ref,
               out_ref,
               x1_vmem, agg_vmem):
        pid = pl.program_id(0)
        n_tiles = pl.num_programs(0)
        n_pad = x1_vmem.shape[0]

        # ---- first edge tile: project node features once, zero accumulator --
        @pl.when(pid == 0)
        def _():
            x1 = jnp.dot(x_ref[...], w_lin1_ref[...],
                         preferred_element_type=jnp.float32)
            x1_vmem[...] = x1.astype(jnp.bfloat16)       # bf16 MXU operand later
            agg_vmem[...] = jnp.zeros_like(agg_vmem)

        # ---- edge filter MLP for this tile: Linear -> ssp -> Linear ---------
        h = jnp.dot(ea_ref[...], w_mlp1_ref[...],
                    preferred_element_type=jnp.float32) + b_mlp1_ref[...]
        h = _ssp(h)                                                     # f32
        W = jnp.dot(h.astype(jnp.bfloat16), w_mlp2_ref[...],
                    preferred_element_type=jnp.float32) + b_mlp2_ref[...]  # [tE, Fp]

        # ---- cosine cutoff envelope (f32 elementwise) ------------------------
        C = 0.5 * (jnp.cos(ew_ref[...] * cos_scale) + 1.0)              # [tE, 1]
        W = W * C

        # ---- gather x1[src]: one-hot matmul on the MXU (no serial loop) ------
        iota_lane = lax.broadcasted_iota(jnp.int32, (1, n_pad), 1)      # [1, Np]
        onehot_src = (src_ref[...] == iota_lane).astype(jnp.bfloat16)   # [tE, Np]
        xj = jnp.dot(onehot_src, x1_vmem[...],
                     preferred_element_type=jnp.float32)                # [tE, Fp]

        msg = (xj * W).astype(jnp.bfloat16)                             # [tE, Fp]

        # ---- scatter-add: native [Np, tE] @ [tE, Fp] orientation (no lhsT) --
        iota_sub = lax.broadcasted_iota(jnp.int32, (n_pad, 1), 0)       # [Np, 1]
        onehot_dst = (iota_sub == dst_ref[...]).astype(jnp.bfloat16)    # [Np, tE]
        agg_vmem[...] += jnp.dot(onehot_dst, msg,
                                 preferred_element_type=jnp.float32)    # [Np, Fp]

        # ---- last edge tile: lin2 -> ssp -> lin, lane-dense output store ----
        @pl.when(pid == n_tiles - 1)
        def _():
            x2 = jnp.dot(agg_vmem[...].astype(jnp.bfloat16), w_lin2_ref[...],
                         preferred_element_type=jnp.float32) + b_lin2_ref[...]
            x3 = _ssp(x2)
            out_ref[...] = (jnp.dot(x3.astype(jnp.bfloat16), w_lin_ref[...],
                                    preferred_element_type=jnp.float32)
                            + b_lin_ref[...])

    return kernel


def interaction_block(x, edge_index, edge_weight, edge_attr, params, cutoff,
                      *, edge_tile=512):
    """x: [N, H] f32, edge_index: [2, E] i32, edge_weight: [E] f32,
    edge_attr: [E, G] f32. Returns [N, H] f32."""
    N, H = x.shape
    E, G = edge_attr.shape
    F = params["w_mlp2"].shape[1]

    # ---- lane / sublane padding of static dims -------------------------------
    Hp = _round_up(H, LANE)
    Fp = _round_up(F, LANE)
    Gp = _round_up(G, LANE)
    Np = _round_up(N, LANE)          # node axis mult. of 128: MXU-friendly one-hots
    tE = _round_up(min(edge_tile, max(E, 1)), LANE)
    Ep = _round_up(max(E, 1), tE)    # >= 1 tile even when E == 0
    n_tiles = Ep // tE

    # ---- pad inputs (padded edges: dst = -1 -> never matches the node iota) --
    x_p = _pad2(x, Np, Hp, jnp.bfloat16)
    src = jnp.pad(edge_index[0].astype(jnp.int32), (0, Ep - E),
                  constant_values=0).reshape(Ep, 1)                # [Ep, 1]
    dst = jnp.pad(edge_index[1].astype(jnp.int32), (0, Ep - E),
                  constant_values=-1).reshape(1, Ep)               # [1, Ep] lane-dense
    ew = jnp.pad(edge_weight.astype(jnp.float32), (0, Ep - E)).reshape(Ep, 1)
    ea = _pad2(edge_attr, Ep, Gp, jnp.bfloat16)

    # ---- zero-pad parameters (exact: padded channels stay zero) --------------
    w_mlp1 = _pad2(params["w_mlp1"], Gp, Fp, jnp.bfloat16)
    b_mlp1 = _pad2(params["b_mlp1"], 1, Fp, jnp.float32)
    w_mlp2 = _pad2(params["w_mlp2"], Fp, Fp, jnp.bfloat16)
    b_mlp2 = _pad2(params["b_mlp2"], 1, Fp, jnp.float32)
    w_lin1 = _pad2(params["w_lin1"], Hp, Fp, jnp.bfloat16)
    w_lin2 = _pad2(params["w_lin2"], Fp, Hp, jnp.bfloat16)
    b_lin2 = _pad2(params["b_lin2"], 1, Hp, jnp.float32)
    w_lin = _pad2(params["w_lin"], Hp, Hp, jnp.bfloat16)
    b_lin = _pad2(params["b_lin"], 1, Hp, jnp.float32)

    const_spec = lambda shape: pl.BlockSpec(shape, lambda i: (0, 0))

    grid_spec = pltpu.PrefetchScalarGridSpec(
        num_scalar_prefetch=0,
        grid=(n_tiles,),
        in_specs=[
            const_spec((Np, Hp)),                        # x (resident)
            pl.BlockSpec((tE, 1), lambda i: (i, 0)),     # src (column for gather one-hot)
            pl.BlockSpec((1, tE), lambda i: (0, i)),     # dst (lane-dense row)
            pl.BlockSpec((tE, 1), lambda i: (i, 0)),     # edge_weight
            pl.BlockSpec((tE, Gp), lambda i: (i, 0)),    # edge_attr
            const_spec((Gp, Fp)),                        # w_mlp1
            const_spec((1, Fp)),                         # b_mlp1
            const_spec((Fp, Fp)),                        # w_mlp2
            const_spec((1, Fp)),                         # b_mlp2
            const_spec((Hp, Fp)),                        # w_lin1
            const_spec((Fp, Hp)),                        # w_lin2
            const_spec((1, Hp)),                         # b_lin2
            const_spec((Hp, Hp)),                        # w_lin
            const_spec((1, Hp)),                         # b_lin
        ],
        out_specs=pl.BlockSpec((Np, Hp), lambda i: (0, 0)),
        scratch_shapes=[
            pltpu.VMEM((Np, Fp), jnp.bfloat16),          # x1 = x @ w_lin1 (persistent)
            pltpu.VMEM((Np, Fp), jnp.float32),           # scatter-add accumulator
        ],
    )

    # ---- VMEM budget (clamped to 64 MiB so it is also valid on v7x) ----------
    est = (Np * Fp * (2 + 4)                                 # x1 + agg scratch
           + 2 * (tE * Gp * 2 + 2 * tE * 4 + tE * 4)         # double-buffered edge tiles
           + 2 * Np * Hp * (2 + 4)                           # x (bf16) + out (f32)
           + 2 * 2 * (Gp * Fp + Fp * Fp + 2 * Hp * Fp + Hp * Hp)  # weights (bf16)
           + 2 * tE * Np * 2)                                # one-hot temporaries
    vmem_limit = int(min(64 * 1024 * 1024, max(32 * 1024 * 1024, 2 * est)))

    out_p = pl.pallas_call(
        make_interaction_kernel(float(cutoff)),
        out_shape=jax.ShapeDtypeStruct((Np, Hp), jnp.float32),
        grid_spec=grid_spec,
        compiler_params=pltpu.CompilerParams(
            dimension_semantics=("arbitrary",),     # edge axis carries the accumulator
            vmem_limit_bytes=vmem_limit,
        ),
    )(x_p, src, dst, ew, ea,
      w_mlp1, b_mlp1, w_mlp2, b_mlp2,
      w_lin1, w_lin2, b_lin2, w_lin, b_lin)

    return out_p[:N, :H]


def init_params(key, hidden_channels, num_gaussians, num_filters):
    ks = jax.random.split(key, 9)

    def u(k, shape, fan_in):
        bound = 1.0 / math.sqrt(fan_in)
        return jax.random.uniform(k, shape, jnp.float32, -bound, bound)

    return {
        # mlp: Linear(G, F) -> ssp -> Linear(F, F)
        "w_mlp1": u(ks[0], (num_gaussians, num_filters), num_gaussians),
        "b_mlp1": u(ks[1], (1, num_filters), num_gaussians),
        "w_mlp2": u(ks[2], (num_filters, num_filters), num_filters),
        "b_mlp2": u(ks[3], (1, num_filters), num_filters),
        # CFConv.lin1 (H -> F, no bias), CFConv.lin2 (F -> H, bias)
        "w_lin1": u(ks[4], (hidden_channels, num_filters), hidden_channels),
        "w_lin2": u(ks[5], (num_filters, hidden_channels), num_filters),
        "b_lin2": u(ks[6], (1, hidden_channels), num_filters),
        # final InteractionBlock.lin (H -> H, bias)
        "w_lin": u(ks[7], (hidden_channels, hidden_channels), hidden_channels),
        "b_lin": u(ks[8], (1, hidden_channels), hidden_channels),
    }


def reference_forward(x, edge_index, edge_weight, edge_attr, params, cutoff):
    # pure-JAX f32 reference mirroring the PyTorch module
    h = edge_attr @ params["w_mlp1"] + params["b_mlp1"]
    h = jnp.logaddexp(h, 0.0) - SHIFT
    W = h @ params["w_mlp2"] + params["b_mlp2"]
    C = 0.5 * (jnp.cos(edge_weight * jnp.pi / cutoff) + 1.0)
    W = W * C[:, None]
    x1 = x @ params["w_lin1"]
    src, dst = edge_index[0], edge_index[1]
    msg = x1[src] * W
    agg = jax.ops.segment_sum(msg, dst, num_segments=x.shape[0])
    x2 = agg @ params["w_lin2"] + params["b_lin2"]
    x3 = jnp.logaddexp(x2, 0.0) - SHIFT
    return x3 @ params["w_lin"] + params["b_lin"]


if __name__ == "__main__":
    hidden_channels = 32
    num_gaussians = 16
    num_filters = 32
    cutoff = 10.0
    N = 16    # nodes
    E = 200   # edges (> one 128-edge tile -> 2 grid steps, exercises accumulator)

    key = jax.random.PRNGKey(0)
    k_par, k_x, k_ei, k_ew, k_ea = jax.random.split(key, 5)

    params = init_params(k_par, hidden_channels, num_gaussians, num_filters)
    x = jax.random.normal(k_x, (N, hidden_channels), jnp.float32)
    edge_index = jax.random.randint(k_ei, (2, E), 0, N, jnp.int32)
    edge_weight = jax.random.uniform(k_ew, (E,), jnp.float32, 0.0, cutoff)
    edge_attr = jax.random.normal(k_ea, (E, num_gaussians), jnp.float32)

    out = interaction_block(x, edge_index, edge_weight, edge_attr, params,
                            cutoff, edge_tile=128)
    out = jax.block_until_ready(out)

    ref = reference_forward(x, edge_index, edge_weight, edge_attr, params, cutoff)
    assert out.shape == (N, hidden_channels)
    # bf16 MXU operands (per perf review) vs an f32 reference -> looser tolerance
    assert jnp.allclose(out, ref, atol=3e-2, rtol=3e-2), "mismatch vs reference"

    print("KERNEL_OK")
</pallas_src>

<mosaic_0001>
module attributes {stable_mosaic.version = 11 : i64} {
  func.func @kernel(%arg0: i32, %arg1: memref<128x128xbf16, #tpu.memory_space<vmem>>, %arg2: memref<128x1xi32, #tpu.memory_space<vmem>>, %arg3: memref<1x128xi32, #tpu.memory_space<vmem>>, %arg4: memref<128x1xf32, #tpu.memory_space<vmem>>, %arg5: memref<128x128xbf16, #tpu.memory_space<vmem>>, %arg6: memref<128x128xbf16, #tpu.memory_space<vmem>>, %arg7: memref<1x128xf32, #tpu.memory_space<vmem>>, %arg8: memref<128x128xbf16, #tpu.memory_space<vmem>>, %arg9: memref<1x128xf32, #tpu.memory_space<vmem>>, %arg10: memref<128x128xbf16, #tpu.memory_space<vmem>>, %arg11: memref<128x128xbf16, #tpu.memory_space<vmem>>, %arg12: memref<1x128xf32, #tpu.memory_space<vmem>>, %arg13: memref<128x128xbf16, #tpu.memory_space<vmem>>, %arg14: memref<1x128xf32, #tpu.memory_space<vmem>>, %arg15: memref<128x128xf32, #tpu.memory_space<vmem>>, %arg16: memref<128x128xbf16, #tpu.memory_space<vmem>>, %arg17: memref<128x128xf32, #tpu.memory_space<vmem>>) attributes {dimension_semantics = [#tpu.dimension_semantics<arbitrary>], iteration_bounds = array<i64: 2>, scalar_prefetch = 0 : i64, scratch_operands = 2 : i64, tpu.core_type = #tpu.core_type<tc>, window_params = [{pipeline_mode = #tpu.pipeline_mode<synchronous>, transform_indices = @transform_0, window_bounds = array<i64: 128, 128>}, {transform_indices = @transform_1, window_bounds = array<i64: 128, 1>}, {transform_indices = @transform_2, window_bounds = array<i64: 1, 128>}, {transform_indices = @transform_3, window_bounds = array<i64: 128, 1>}, {transform_indices = @transform_4, window_bounds = array<i64: 128, 128>}, {pipeline_mode = #tpu.pipeline_mode<synchronous>, transform_indices = @transform_5, window_bounds = array<i64: 128, 128>}, {pipeline_mode = #tpu.pipeline_mode<synchronous>, transform_indices = @transform_6, window_bounds = array<i64: 1, 128>}, {pipeline_mode = #tpu.pipeline_mode<synchronous>, transform_indices = @transform_7, window_bounds = array<i64: 128, 128>}, {pipeline_mode = #tpu.pipeline_mode<synchronous>, transform_indices = @transform_8, window_bounds = array<i64: 1, 128>}, {pipeline_mode = #tpu.pipeline_mode<synchronous>, transform_indices = @transform_9, window_bounds = array<i64: 128, 128>}, {pipeline_mode = #tpu.pipeline_mode<synchronous>, transform_indices = @transform_10, window_bounds = array<i64: 128, 128>}, {pipeline_mode = #tpu.pipeline_mode<synchronous>, transform_indices = @transform_11, window_bounds = array<i64: 1, 128>}, {pipeline_mode = #tpu.pipeline_mode<synchronous>, transform_indices = @transform_12, window_bounds = array<i64: 128, 128>}, {pipeline_mode = #tpu.pipeline_mode<synchronous>, transform_indices = @transform_13, window_bounds = array<i64: 1, 128>}, {pipeline_mode = #tpu.pipeline_mode<synchronous>, transform_indices = @transform_14, window_bounds = array<i64: 128, 128>}]} {
    %c0_i32 = arith.constant 0 : i32
    %0 = arith.cmpi eq, %arg0, %c0_i32 : i32
    %1 = arith.extui %0 : i1 to i32
    %c0_i32_0 = arith.constant 0 : i32
    %2 = arith.cmpi ne, %1, %c0_i32_0 : i32
    scf.if %2 {
      %c0_32 = arith.constant 0 : index
      %c0_33 = arith.constant 0 : index
      %68 = vector.load %arg1[%c0_32, %c0_33] : memref<128x128xbf16, #tpu.memory_space<vmem>>, vector<128x128xbf16>
      %c0_34 = arith.constant 0 : index
      %c0_35 = arith.constant 0 : index
      %69 = vector.load %arg10[%c0_34, %c0_35] : memref<128x128xbf16, #tpu.memory_space<vmem>>, vector<128x128xbf16>
      %cst_36 = arith.constant dense<0.000000e+00> : vector<128x128xf32>
      %70 = tpu.matmul %68, %69, %cst_36 {dimension_numbers = #tpu.dot_dimension_numbers<[1], [0], [0], [1], [0, 0, 1, 1], [], []>} : vector<128x128xbf16>, vector<128x128xbf16>, vector<128x128xf32> -> vector<128x128xf32>
      %71 = arith.truncf %70 : vector<128x128xf32> to vector<128x128xbf16>
      %c0_37 = arith.constant 0 : index
      %c0_38 = arith.constant 0 : index
      %72 = vector.load %arg16[%c0_37, %c0_38] : memref<128x128xbf16, #tpu.memory_space<vmem>>, vector<128x128xbf16>
      tpu.vector_store %arg16[%c0_37, %c0_38], %71 {strides = array<i32>} : memref<128x128xbf16, #tpu.memory_space<vmem>>, vector<128x128xbf16>,
      %cst_39 = arith.constant 0.000000e+00 : f32
      %73 = vector.broadcast %cst_39 : f32 to vector<128x128xf32>
      %c0_40 = arith.constant 0 : index
      %c0_41 = arith.constant 0 : index
      %74 = vector.load %arg17[%c0_40, %c0_41] : memref<128x128xf32, #tpu.memory_space<vmem>>, vector<128x128xf32>
      tpu.vector_store %arg17[%c0_40, %c0_41], %73 {strides = array<i32>} : memref<128x128xf32, #tpu.memory_space<vmem>>, vector<128x128xf32>,
    } else {
    }
    %c0 = arith.constant 0 : index
    %c0_1 = arith.constant 0 : index
    %3 = vector.load %arg5[%c0, %c0_1] : memref<128x128xbf16, #tpu.memory_space<vmem>>, vector<128x128xbf16>
    %c0_2 = arith.constant 0 : index
    %c0_3 = arith.constant 0 : index
    %4 = vector.load %arg6[%c0_2, %c0_3] : memref<128x128xbf16, #tpu.memory_space<vmem>>, vector<128x128xbf16>
    %cst = arith.constant dense<0.000000e+00> : vector<128x128xf32>
    %5 = tpu.matmul %3, %4, %cst {dimension_numbers = #tpu.dot_dimension_numbers<[1], [0], [0], [1], [0, 0, 1, 1], [], []>} : vector<128x128xbf16>, vector<128x128xbf16>, vector<128x128xf32> -> vector<128x128xf32>
    %c0_4 = arith.constant 0 : index
    %c0_5 = arith.constant 0 : index
    %6 = vector.load %arg7[%c0_4, %c0_5] : memref<1x128xf32, #tpu.memory_space<vmem>>, vector<1x128xf32>
    %7 = vector.broadcast %6 : vector<1x128xf32> to vector<128x128xf32>
    %8 = arith.addf %5, %7 : vector<128x128xf32>
    %cst_6 = arith.constant 0.000000e+00 : f32
    %9 = vector.broadcast %cst_6 : f32 to vector<128x128xf32>
    %10 = arith.maximumf %8, %9 : vector<128x128xf32>
    %11 = vector.broadcast %cst_6 : f32 to vector<128x128xf32>
    %12 = arith.subf %8, %11 : vector<128x128xf32>
    %13 = arith.cmpf one, %12, %12 : vector<128x128xf32>
    %14 = vector.broadcast %cst_6 : f32 to vector<128x128xf32>
    %15 = arith.addf %8, %14 : vector<128x128xf32>
    %16 = math.absf %12 : vector<128x128xf32>
    %cst_7 = arith.constant 0.000000e+00 : f32
    %17 = vector.broadcast %cst_7 : f32 to vector<128x128xf32>
    %18 = arith.subf %17, %16 : vector<128x128xf32>
    %19 = math.exp %18 : vector<128x128xf32>
    %20 = math.log1p %19 : vector<128x128xf32>
    %21 = arith.addf %10, %20 : vector<128x128xf32>
    %22 = arith.select %13, %15, %21 : vector<128x128xi1>, vector<128x128xf32>
    %cst_8 = arith.constant 0.693147182 : f32
    %23 = vector.broadcast %cst_8 : f32 to vector<128x128xf32>
    %24 = arith.subf %22, %23 : vector<128x128xf32>
    %25 = arith.truncf %24 : vector<128x128xf32> to vector<128x128xbf16>
    %c0_9 = arith.constant 0 : index
    %c0_10 = arith.constant 0 : index
    %26 = vector.load %arg8[%c0_9, %c0_10] : memref<128x128xbf16, #tpu.memory_space<vmem>>, vector<128x128xbf16>
    %cst_11 = arith.constant dense<0.000000e+00> : vector<128x128xf32>
    %27 = tpu.matmul %25, %26, %cst_11 {dimension_numbers = #tpu.dot_dimension_numbers<[1], [0], [0], [1], [0, 0, 1, 1], [], []>} : vector<128x128xbf16>, vector<128x128xbf16>, vector<128x128xf32> -> vector<128x128xf32>
    %c0_12 = arith.constant 0 : index
    %c0_13 = arith.constant 0 : index
    %28 = vector.load %arg9[%c0_12, %c0_13] : memref<1x128xf32, #tpu.memory_space<vmem>>, vector<1x128xf32>
    %29 = vector.broadcast %28 : vector<1x128xf32> to vector<128x128xf32>
    %30 = arith.addf %27, %29 : vector<128x128xf32>
    %c0_14 = arith.constant 0 : index
    %c0_15 = arith.constant 0 : index
    %31 = vector.load %arg4[%c0_14, %c0_15] : memref<128x1xf32, #tpu.memory_space<vmem>>, vector<128x1xf32>
    %cst_16 = arith.constant 0.314159274 : f32
    %32 = vector.broadcast %cst_16 : f32 to vector<128x1xf32>
    %33 = arith.mulf %31, %32 : vector<128x1xf32>
    %34 = math.cos %33 : vector<128x1xf32>
    %cst_17 = arith.constant 1.000000e+00 : f32
    %35 = vector.broadcast %cst_17 : f32 to vector<128x1xf32>
    %36 = arith.addf %34, %35 : vector<128x1xf32>
    %cst_18 = arith.constant 5.000000e-01 : f32
    %37 = vector.broadcast %cst_18 : f32 to vector<128x1xf32>
    %38 = arith.mulf %37, %36 : vector<128x1xf32>
    %39 = vector.broadcast %38 : vector<128x1xf32> to vector<128x128xf32>
    %40 = arith.mulf %30, %39 : vector<128x128xf32>
    %41 = tpu.iota {dimensions = array<i32: 1>} : vector<1x128xi32>
    %c0_19 = arith.constant 0 : index
    %c0_20 = arith.constant 0 : index
    %42 = vector.load %arg2[%c0_19, %c0_20] : memref<128x1xi32, #tpu.memory_space<vmem>>, vector<128x1xi32>
    %43 = vector.broadcast %42 : vector<128x1xi32> to vector<128x128xi32>
    %44 = vector.broadcast %41 : vector<1x128xi32> to vector<128x128xi32>
    %45 = arith.cmpi eq, %43, %44 : vector<128x128xi32>
    %46 = arith.extui %45 : vector<128x128xi1> to vector<128x128xi32>
    %47 = arith.sitofp %46 : vector<128x128xi32> to vector<128x128xf32>
    %48 = arith.truncf %47 : vector<128x128xf32> to vector<128x128xbf16>
    %c0_21 = arith.constant 0 : index
    %c0_22 = arith.constant 0 : index
    %49 = vector.load %arg16[%c0_21, %c0_22] : memref<128x128xbf16, #tpu.memory_space<vmem>>, vector<128x128xbf16>
    %cst_23 = arith.constant dense<0.000000e+00> : vector<128x128xf32>
    %50 = tpu.matmul %48, %49, %cst_23 {dimension_numbers = #tpu.dot_dimension_numbers<[1], [0], [0], [1], [0, 0, 1, 1], [], []>} : vector<128x128xbf16>, vector<128x128xbf16>, vector<128x128xf32> -> vector<128x128xf32>
    %51 = arith.mulf %50, %40 : vector<128x128xf32>
    %52 = arith.truncf %51 : vector<128x128xf32> to vector<128x128xbf16>
    %53 = tpu.iota {dimensions = array<i32: 0>} : vector<128x1xi32>
    %c0_24 = arith.constant 0 : index
    %c0_25 = arith.constant 0 : index
    %54 = vector.load %arg3[%c0_24, %c0_25] : memref<1x128xi32, #tpu.memory_space<vmem>>, vector<1x128xi32>
    %55 = vector.broadcast %53 : vector<128x1xi32> to vector<128x128xi32>
    %56 = vector.broadcast %54 : vector<1x128xi32> to vector<128x128xi32>
    %57 = arith.cmpi eq, %55, %56 : vector<128x128xi32>
    %58 = arith.extui %57 : vector<128x128xi1> to vector<128x128xi32>
    %59 = arith.sitofp %58 : vector<128x128xi32> to vector<128x128xf32>
    %60 = arith.truncf %59 : vector<128x128xf32> to vector<128x128xbf16>
    %c0_26 = arith.constant 0 : index
    %c0_27 = arith.constant 0 : index
    %61 = vector.load %arg17[%c0_26, %c0_27] : memref<128x128xf32, #tpu.memory_space<vmem>>, vector<128x128xf32>
    %cst_28 = arith.constant dense<0.000000e+00> : vector<128x128xf32>
    %62 = tpu.matmul %60, %52, %cst_28 {dimension_numbers = #tpu.dot_dimension_numbers<[1], [0], [0], [1], [0, 0, 1, 1], [], []>} : vector<128x128xbf16>, vector<128x128xbf16>, vector<128x128xf32> -> vector<128x128xf32>
    %63 = arith.addf %61, %62 : vector<128x128xf32>
    %c0_29 = arith.constant 0 : index
    %c0_30 = arith.constant 0 : index
    %64 = vector.load %arg17[%c0_29, %c0_30] : memref<128x128xf32, #tpu.memory_space<vmem>>, vector<128x128xf32>
    tpu.vector_store %arg17[%c0_29, %c0_30], %63 {strides = array<i32>} : memref<128x128xf32, #tpu.memory_space<vmem>>, vector<128x128xf32>,
    %c1_i32 = arith.constant 1 : i32
    %65 = arith.cmpi eq, %arg0, %c1_i32 : i32
    %66 = arith.extui %65 : i1 to i32
    %c0_i32_31 = arith.constant 0 : i32
    %67 = arith.cmpi ne, %66, %c0_i32_31 : i32
    scf.if %67 {
      %c0_32 = arith.constant 0 : index
      %c0_33 = arith.constant 0 : index
      %68 = vector.load %arg17[%c0_32, %c0_33] : memref<128x128xf32, #tpu.memory_space<vmem>>, vector<128x128xf32>
      %69 = arith.truncf %68 : vector<128x128xf32> to vector<128x128xbf16>
      %c0_34 = arith.constant 0 : index
      %c0_35 = arith.constant 0 : index
      %70 = vector.load %arg11[%c0_34, %c0_35] : memref<128x128xbf16, #tpu.memory_space<vmem>>, vector<128x128xbf16>
      %cst_36 = arith.constant dense<0.000000e+00> : vector<128x128xf32>
      %71 = tpu.matmul %69, %70, %cst_36 {dimension_numbers = #tpu.dot_dimension_numbers<[1], [0], [0], [1], [0, 0, 1, 1], [], []>} : vector<128x128xbf16>, vector<128x128xbf16>, vector<128x128xf32> -> vector<128x128xf32>
      %c0_37 = arith.constant 0 : index
      %c0_38 = arith.constant 0 : index
      %72 = vector.load %arg12[%c0_37, %c0_38] : memref<1x128xf32, #tpu.memory_space<vmem>>, vector<1x128xf32>
      %73 = vector.broadcast %72 : vector<1x128xf32> to vector<128x128xf32>
      %74 = arith.addf %71, %73 : vector<128x128xf32>
      %cst_39 = arith.constant 0.000000e+00 : f32
      %75 = vector.broadcast %cst_39 : f32 to vector<128x128xf32>
      %76 = arith.maximumf %74, %75 : vector<128x128xf32>
      %77 = vector.broadcast %cst_39 : f32 to vector<128x128xf32>
      %78 = arith.subf %74, %77 : vector<128x128xf32>
      %79 = arith.cmpf one, %78, %78 : vector<128x128xf32>
      %80 = vector.broadcast %cst_39 : f32 to vector<128x128xf32>
      %81 = arith.addf %74, %80 : vector<128x128xf32>
      %82 = math.absf %78 : vector<128x128xf32>
      %cst_40 = arith.constant 0.000000e+00 : f32
      %83 = vector.broadcast %cst_40 : f32 to vector<128x128xf32>
      %84 = arith.subf %83, %82 : vector<128x128xf32>
      %85 = math.exp %84 : vector<128x128xf32>
      %86 = math.log1p %85 : vector<128x128xf32>
      %87 = arith.addf %76, %86 : vector<128x128xf32>
      %88 = arith.select %79, %81, %87 : vector<128x128xi1>, vector<128x128xf32>
      %cst_41 = arith.constant 0.693147182 : f32
      %89 = vector.broadcast %cst_41 : f32 to vector<128x128xf32>
      %90 = arith.subf %88, %89 : vector<128x128xf32>
      %91 = arith.truncf %90 : vector<128x128xf32> to vector<128x128xbf16>
      %c0_42 = arith.constant 0 : index
      %c0_43 = arith.constant 0 : index
      %92 = vector.load %arg13[%c0_42, %c0_43] : memref<128x128xbf16, #tpu.memory_space<vmem>>, vector<128x128xbf16>
      %cst_44 = arith.constant dense<0.000000e+00> : vector<128x128xf32>
      %93 = tpu.matmul %91, %92, %cst_44 {dimension_numbers = #tpu.dot_dimension_numbers<[1], [0], [0], [1], [0, 0, 1, 1], [], []>} : vector<128x128xbf16>, vector<128x128xbf16>, vector<128x128xf32> -> vector<128x128xf32>
      %c0_45 = arith.constant 0 : index
      %c0_46 = arith.constant 0 : index
      %94 = vector.load %arg14[%c0_45, %c0_46] : memref<1x128xf32, #tpu.memory_space<vmem>>, vector<1x128xf32>
      %95 = vector.broadcast %94 : vector<1x128xf32> to vector<128x128xf32>
      %96 = arith.addf %93, %95 : vector<128x128xf32>
      %c0_47 = arith.constant 0 : index
      %c0_48 = arith.constant 0 : index
      %97 = vector.load %arg15[%c0_47, %c0_48] : memref<128x128xf32, #tpu.memory_space<vmem>>, vector<128x128xf32>
      tpu.vector_store %arg15[%c0_47, %c0_48], %96 {strides = array<i32>} : memref<128x128xf32, #tpu.memory_space<vmem>>, vector<128x128xf32>,
    } else {
    }
    return
  }
  func.func @transform_0(%arg0: i32) -> (i32, i32) {
    %c0_i32 = arith.constant 0 : i32
    %c0_i32_0 = arith.constant 0 : i32
    %c0_i32_1 = arith.constant 0 : i32
    return %c0_i32, %c0_i32_0 : i32, i32
  }
  func.func @transform_1(%arg0: i32) -> (i32, i32) {
    %c0_i32 = arith.constant 0 : i32
    %c0_i32_0 = arith.constant 0 : i32
    return %arg0, %c0_i32 : i32, i32
  }
  func.func @transform_2(%arg0: i32) -> (i32, i32) {
    %c0_i32 = arith.constant 0 : i32
    %c0_i32_0 = arith.constant 0 : i32
    return %c0_i32, %arg0 : i32, i32
  }
  func.func @transform_3(%arg0: i32) -> (i32, i32) {
    %c0_i32 = arith.constant 0 : i32
    %c0_i32_0 = arith.constant 0 : i32
    return %arg0, %c0_i32 : i32, i32
  }
  func.func @transform_4(%arg0: i32) -> (i32, i32) {
    %c0_i32 = arith.constant 0 : i32
    %c0_i32_0 = arith.constant 0 : i32
    return %arg0, %c0_i32 : i32, i32
  }
  func.func @transform_5(%arg0: i32) -> (i32, i32) {
    %c0_i32 = arith.constant 0 : i32
    %c0_i32_0 = arith.constant 0 : i32
    %c0_i32_1 = arith.constant 0 : i32
    return %c0_i32, %c0_i32_0 : i32, i32
  }
  func.func @transform_6(%arg0: i32) -> (i32, i32) {
    %c0_i32 = arith.constant 0 : i32
    %c0_i32_0 = arith.constant 0 : i32
    %c0_i32_1 = arith.constant 0 : i32
    return %c0_i32, %c0_i32_0 : i32, i32
  }
  func.func @transform_7(%arg0: i32) -> (i32, i32) {
    %c0_i32 = arith.constant 0 : i32
    %c0_i32_0 = arith.constant 0 : i32
    %c0_i32_1 = arith.constant 0 : i32
    return %c0_i32, %c0_i32_0 : i32, i32
  }
  func.func @transform_8(%arg0: i32) -> (i32, i32) {
    %c0_i32 = arith.constant 0 : i32
    %c0_i32_0 = arith.constant 0 : i32
    %c0_i32_1 = arith.constant 0 : i32
    return %c0_i32, %c0_i32_0 : i32, i32
  }
  func.func @transform_9(%arg0: i32) -> (i32, i32) {
    %c0_i32 = arith.constant 0 : i32
    %c0_i32_0 = arith.constant 0 : i32
    %c0_i32_1 = arith.constant 0 : i32
    return %c0_i32, %c0_i32_0 : i32, i32
  }
  func.func @transform_10(%arg0: i32) -> (i32, i32) {
    %c0_i32 = arith.constant 0 : i32
    %c0_i32_0 = arith.constant 0 : i32
    %c0_i32_1 = arith.constant 0 : i32
    return %c0_i32, %c0_i32_0 : i32, i32
  }
  func.func @transform_11(%arg0: i32) -> (i32, i32) {
    %c0_i32 = arith.constant 0 : i32
    %c0_i32_0 = arith.constant 0 : i32
    %c0_i32_1 = arith.constant 0 : i32
    return %c0_i32, %c0_i32_0 : i32, i32
  }
  func.func @transform_12(%arg0: i32) -> (i32, i32) {
    %c0_i32 = arith.constant 0 : i32
    %c0_i32_0 = arith.constant 0 : i32
    %c0_i32_1 = arith.constant 0 : i32
    return %c0_i32, %c0_i32_0 : i32, i32
  }
  func.func @transform_13(%arg0: i32) -> (i32, i32) {
    %c0_i32 = arith.constant 0 : i32
    %c0_i32_0 = arith.constant 0 : i32
    %c0_i32_1 = arith.constant 0 : i32
    return %c0_i32, %c0_i32_0 : i32, i32
  }
  func.func @transform_14(%arg0: i32) -> (i32, i32) {
    %c0_i32 = arith.constant 0 : i32
    %c0_i32_0 = arith.constant 0 : i32
    %c0_i32_1 = arith.constant 0 : i32
    return %c0_i32, %c0_i32_0 : i32, i32
  }
}

</mosaic_0001>

<bundles_post_ra>
// kernel: tpu_custom_call.1
= control target key start
LH: loop header
LB: loop body
LE: loop exit
PB: predicated region body
PF: predicated region fallthrough
CT: control target
= control target key end

     0   :  { %s8530_s0 = inlined_call_operand.vmem [shape: bf16[128,128], index: 0, kind: input, shape index: {}]   ;;  %s8531_s1 = inlined_call_operand.vmem [shape: s32[256,1], index: 1, kind: input, shape index: {}]   ;;  %s8532_s2 = inlined_call_operand.vmem [shape: s32[1,256], index: 2, kind: input, shape index: {}]   ;;  %s8533_s3 = inlined_call_operand.vmem [shape: f32[256,1], index: 3, kind: input, shape index: {}]   ;;  %s8534_s4 = inlined_call_operand.vmem [shape: bf16[256,128], index: 4, kind: input, shape index: {}]   ;;  %s8535_s5 = inlined_call_operand.vmem [shape: bf16[128,128], index: 5, kind: input, shape index: {}]   ;;  %s8536_s6 = inlined_call_operand.vmem [shape: f32[1,128], index: 6, kind: input, shape index: {}]   ;;  %s8537_s7 = inlined_call_operand.vmem [shape: bf16[128,128], index: 7, kind: input, shape index: {}]   ;;  %s8538_s8 = inlined_call_operand.vmem [shape: f32[1,128], index: 8, kind: input, shape index: {}]   ;;  %s8539_s9 = inlined_call_operand.vmem [shape: bf16[128,128], index: 9, kind: input, shape index: {}]   ;;  %s8540_s10 = inlined_call_operand.vmem [shape: bf16[128,128], index: 10, kind: input, shape index: {}]   ;;  %s8541_s11 = inlined_call_operand.vmem [shape: f32[1,128], index: 11, kind: input, shape index: {}]   ;;  %s8542_s12 = inlined_call_operand.vmem [shape: bf16[128,128], index: 12, kind: input, shape index: {}]   ;;  %s8543_s13 = inlined_call_operand.vmem [shape: f32[1,128], index: 13, kind: input, shape index: {}]   ;;  %s8544_s14 = inlined_call_operand.hbm [shape: f32[128,128], index: 14, kind: output, shape index: {}]  }
   0x1   :  { %8547 = sst [smem:[#allocation8_spill]] %s8544_s14 }
   0x2   :  { %19 = vsyncpa [#allocation5], 0  ;;  %s5810_s29 = smov 0  }
   0x3 LB: > { %8548 = sst [smem:[#allocation7_spill]] %s5721_s29  ;;  %s5816_s30 = sadd.s32 4294967295, %s5721_s29   ;;  %s5721_s29 = sphi %s5810_s29, %s25_s29  }
   0x4   : > { %p4666_p0 = scmp.ge.s32.totalorder %s5721_s29, 1  ;;  %p439_p1 = scmp.lt.s32.totalorder %s5721_s29, 3 }
   0x6   : > { %p440_p2 = pnand %p4666_p0, %p439_p1 }
   0x7   : > { %s4667_s15 = sshll.u32 (!%p440_p2), %s5816_s30, 4  ;;  %p499_p3 = scmp.lt.s32.totalorder (!%p440_p2), %s5816_s30, 1 }
   0x8   : > { %443 = sbr.rel (%p440_p2) target bundleno = 1785 (0x6f9), region = 76  ;;  %p494_p4 = scmp.lt.s32.totalorder (!%p440_p2), %s4667_s15, 31 }
   0x9   : > { %p4673_p5 = scmp.ne.s32.totalorder (!%p440_p2), %s5816_s30, 0 }
   0xd   : > { %s5823_s16 = scalar_select %p499_p3, %s5816_s30, 1 }
   0xe   : > { %s8674_s15 = smov (!%p494_p4, %s4667_s15), 31  ;;  %518 = sbr.rel (%p4673_p5) target bundleno = 262 (0x106), region = 80 }
   0xf   : > { %s501_s19 = scalar_lea.vmem %s8532_s2, %s5823_s16  ;;  %s4668_s20 = sshll.u32 %s8674_s15, 3 }
  0x10   : > { %s4672_s21 = sshll.u32 %s8674_s15, 2  ;;  %s5832_s24 = scalar_lea.vmem %s8531_s1, %s4668_s20 }
  0x11   : > { %s5837_s27 = scalar_lea.vmem %s8533_s3, %s4668_s20  ;;  %s5842_s14 = scalar_lea.vmem %s8534_s4, %s4672_s21 }
  0x13   : > { %v5429_v0 = vld [vmem:[%s8539_s9 + $0x38] sm:$0xff]   ;;  %v5430_v1 = vld [vmem:[%s8539_s9 + $0x30] sm:$0xff]   ;;  %v5431_v2 = vld [vmem:[%s8539_s9 + $0x28] sm:$0xff]   ;;  %v5723_v16 = vmov 0.0  }
  0x14   : > { %5099 = vmatprep.subr.bf16.mxu0 %v5429_v0  ;;  %5323 = vmatprep.subr.bf16.mxu1 %v5429_v0  ;;  %v5432_v3 = vld [vmem:[%s8539_s9 + $0x20] sm:$0xff]   ;;  %v5433_v6 = vld [vmem:[%s8539_s9 + $0x18] sm:$0xff]   ;;  %v5434_v7 = vld [vmem:[%s8539_s9 + $0x10] sm:$0xff]   ;;  %824 = vst [vmem:[#allocation3 + $0x30] sm:$0xff] %v5723_v16 }
  0x15   : > { %5100 = vmatpush3.bf16.msra.mxu0 %v5429_v0  ;;  %5331 = vmatpush3.bf16.msra.mxu1 %v5429_v0  ;;  %v5437_v4 = vld [vmem:[%s8530_s0] sm:$0xff]   ;;  %v5435_v8 = vld [vmem:[%s8539_s9 + $0x8] sm:$0xff]   ;;  %v5441_v12 = vld [vmem:[%s8530_s0 + $0x10] sm:$0xff]   ;;  %825 = vst [vmem:[#allocation3] sm:$0xff] %v5723_v16 }
  0x16   : > { %5101 = vmatprep.subr.bf16.mxu0 %v5430_v1  ;;  %5324 = vmatprep.subr.bf16.mxu1 %v5430_v1  ;;  %v5438_v5 = vld [vmem:[%s8530_s0 + $0x20] sm:$0xff]   ;;  %v5439_v10 = vld [vmem:[%s8530_s0 + $0x8] sm:$0xff]   ;;  %v5442_v13 = vld [vmem:[%s8530_s0 + $0x30] sm:$0xff]   ;;  %826 = vst [vmem:[#allocation3 + $0x58] sm:$0xff] %v5723_v16 }
  0x17   : > { %5115 = vmatprep.mubr.bf16.mxu0 %v5437_v4  ;;  %5123 = vmatprep.mubr.bf16.mxu1 %v5438_v5  ;;  %v5436_v9 = vld [vmem:[%s8539_s9] sm:$0xff]   ;;  %v5440_v11 = vld [vmem:[%s8530_s0 + $0x28] sm:$0xff]   ;;  %v5443_v14 = vld [vmem:[%s8530_s0 + $0x18] sm:$0xff]   ;;  %827 = vst [vmem:[#allocation3 + $0x18] sm:$0xff] %v5723_v16 }
  0x18   : > { %v5444_v15 = vld [vmem:[%s8530_s0 + $0x38] sm:$0xff]   ;;  %828 = vst [vmem:[#allocation3 + $0x50] sm:$0xff] %v5723_v16  ;;  %829 = vst [vmem:[#allocation3 + $0x68] sm:$0xff] %v5723_v16 }
  0x19   : > { %5102 = vmatpush3.bf16.msra.mxu0 %v5430_v1  ;;  %5332 = vmatpush3.bf16.msra.mxu1 %v5430_v1  ;;  %830 = vst [vmem:[#allocation3 + $0x8] sm:$0xff] %v5723_v16  ;;  %831 = vst [vmem:[#allocation3 + $0x48] sm:$0xff] %v5723_v16 }
  0x1a   : > { %5103 = vmatprep.subr.bf16.mxu0 %v5431_v2  ;;  %5325 = vmatprep.subr.bf16.mxu1 %v5431_v2  ;;  %832 = vst [vmem:[#allocation3 + $0x40] sm:$0xff] %v5723_v16  ;;  %833 = vst [vmem:[#allocation3 + $0x20] sm:$0xff] %v5723_v16 }
  0x1b   : > { %834 = vst [vmem:[#allocation3 + $0x10] sm:$0xff] %v5723_v16  ;;  %835 = vst [vmem:[#allocation3 + $0x38] sm:$0xff] %v5723_v16 }
  0x1c   : > { %836 = vst [vmem:[#allocation3 + $0x60] sm:$0xff] %v5723_v16  ;;  %837 = vst [vmem:[#allocation3 + $0x70] sm:$0xff] %v5723_v16 }
  0x1d   : > { %5104 = vmatpush3.bf16.msra.mxu0 %v5431_v2  ;;  %5333 = vmatpush3.bf16.msra.mxu1 %v5431_v2  ;;  %838 = vst [vmem:[#allocation3 + $0x78] sm:$0xff] %v5723_v16  ;;  %839 = vst [vmem:[#allocation3 + $0x28] sm:$0xff] %v5723_v16 }
  0x1e   : > { %5105 = vmatprep.subr.bf16.mxu0 %v5432_v3  ;;  %5326 = vmatprep.subr.bf16.mxu1 %v5432_v3 }
  0x21   : > { %5106 = vmatpush3.bf16.msra.mxu0 %v5432_v3  ;;  %5334 = vmatpush3.bf16.msra.mxu1 %v5432_v3 }
  0x22   : > { %5107 = vmatprep.subr.bf16.mxu0 %v5433_v6  ;;  %5327 = vmatprep.subr.bf16.mxu1 %v5433_v6 }
  0x25   : > { %5108 = vmatpush3.bf16.msra.mxu0 %v5433_v6  ;;  %5335 = vmatpush3.bf16.msra.mxu1 %v5433_v6 }
  0x26   : > { %5109 = vmatprep.subr.bf16.mxu0 %v5434_v7  ;;  %5328 = vmatprep.subr.bf16.mxu1 %v5434_v7 }
  0x29   : > { %5110 = vmatpush3.bf16.msra.mxu0 %v5434_v7  ;;  %5336 = vmatpush3.bf16.msra.mxu1 %v5434_v7 }
  0x2a   : > { %5111 = vmatprep.subr.bf16.mxu0 %v5435_v8  ;;  %5329 = vmatprep.subr.bf16.mxu1 %v5435_v8 }
  0x2d   : > { %5112 = vmatpush3.bf16.msra.mxu0 %v5435_v8  ;;  %5337 = vmatpush3.bf16.msra.mxu1 %v5435_v8 }
  0x2e   : > { %5113 = vmatprep.subr.bf16.mxu0 %v5436_v9  ;;  %5330 = vmatprep.subr.bf16.mxu1 %v5436_v9 }
  0x31   : > { %5114 = vmatpush3.bf16.msra.mxu0 %v5436_v9  ;;  %5338 = vmatpush3.bf16.msra.mxu1 %v5436_v9 }
  0x34   : > { %5116 = vmatmul.mubr.bf16.vlgmr.msra.gmra.mxu0 %v5439_v10  ;;  %5124 = vmatmul.mubr.bf16.vlgmr.msra.gmra.mxu1 %v5440_v11 }
  0x35   : > { %5119 = vmatprep.mubr.bf16.mxu0 %v5441_v12  ;;  %5127 = vmatprep.mubr.bf16.mxu1 %v5442_v13 }
  0x3c   : > { %5120 = vmatmul.mubr.bf16.gmra.mxu0 %v5443_v14  ;;  %5128 = vmatmul.mubr.bf16.gmra.mxu1 %v5444_v15 }
  0xf4   : > { %v5117_v17 = vpop.f32.mrf.mxu0  ;;  %v5125_v18 = vpop.f32.mrf.mxu1 }
  0xf6   : > { %v681_v19 = vpop.f32.mrf.mxu0  ;;  %v713_v20 = vpop.f32.mrf.mxu1 }
  0xf8   : > { %v5118_v21 = vpop.f32.mrf.mxu0  ;;  %v5126_v22 = vpop.f32.mrf.mxu1 }
  0xf9   : > { %v4948_v23 = vpack.c.bf16 %v5118_v21, %v5117_v17  ;;  %v4968_v24 = vpack.c.bf16 %v5126_v22, %v5125_v18 }
  0xfa   : > { %v684_v25 = vpop.f32.mrf.mxu0  ;;  %v716_v26 = vpop.f32.mrf.mxu1 }
  0xfb   : > { %4980 = vst [vmem:[#allocation2 + $0x8] sm:$0xff] %v4948_v23   ;;  %4984 = vst [vmem:[#allocation2 + $0x28] sm:$0xff] %v4968_v24   ;;  %v4943_v27 = vpack.c.bf16 %v684_v25, %v681_v19  ;;  %v4963_v28 = vpack.c.bf16 %v716_v26, %v713_v20 }
  0xfc   : > { %v5121_v29 = vpop.f32.mrf.mxu0  ;;  %v5129_v30 = vpop.f32.mrf.mxu1 }
  0xfd   : > { %4944 = vst [vmem:[#allocation2] sm:$0xff] %v4943_v27   ;;  %4983 = vst [vmem:[#allocation2 + $0x20] sm:$0xff] %v4963_v28  }
  0xfe   : > { %v697_v31 = vpop.f32.mrf.mxu0  ;;  %v729_v32 = vpop.f32.mrf.mxu1 }
 0x100   : > { %v5122_v33 = vpop.f32.mrf.mxu0  ;;  %v5130_v34 = vpop.f32.mrf.mxu1 }
 0x101   : > { %v4958_v35 = vpack.c.bf16 %v5122_v33, %v5121_v29  ;;  %v4978_v36 = vpack.c.bf16 %v5130_v34, %v5129_v30 }
 0x102   : > { %v700_v37 = vpop.f32.mrf.mxu0  ;;  %v732_v38 = vpop.f32.mrf.mxu1 }
 0x103   : > { %4982 = vst [vmem:[#allocation2 + $0x18] sm:$0xff] %v4958_v35   ;;  %4986 = vst [vmem:[#allocation2 + $0x38] sm:$0xff] %v4978_v36   ;;  %v4953_v39 = vpack.c.bf16 %v700_v37, %v697_v31  ;;  %v4973_v40 = vpack.c.bf16 %v732_v38, %v729_v32 }
 0x105   : > { %4981 = vst [vmem:[#allocation2 + $0x10] sm:$0xff] %v4953_v39   ;;  %4985 = vst [vmem:[#allocation2 + $0x30] sm:$0xff] %v4973_v40  }
 0x106 PF: > { %v5447_v41 = vld [vmem:[%s8535_s5 + $0x38] sm:$0xff]   ;;  %v5448_v42 = vld [vmem:[%s8535_s5 + $0x30] sm:$0xff]   ;;  %v5724_v43 = vmov 0   ;;  %v5449_v44 = vld [vmem:[%s8535_s5 + $0x28] sm:$0xff]   ;;  %v5725_v39 = vmov 683565275  }
 0x107   : > { %5445 = vset.pattern.permute.xlu0 %v5724_v43  ;;  %5446 = vset.pattern.permute.xlu1 %v5724_v43  ;;  %v5450_v45 = vld [vmem:[%s8535_s5 + $0x20] sm:$0xff]   ;;  %v5451_v47 = vld [vmem:[%s8535_s5 + $0x18] sm:$0xff]   ;;  %v5452_v48 = vld [vmem:[%s8535_s5 + $0x10] sm:$0xff]   ;;  %v5727_v43 = vmov 2131351028   ;;  %p4885_p6 = scmp.ne.s32.totalorder %s5816_s30, 1 }
 0x108   : > { %5131 = vmatprep.subr.bf16.mxu0 %v5447_v41  ;;  %v5455_v46 = vld [vmem:[%s5842_s14] sm:$0xff]   ;;  %v3364_v50 = vld [vmem:[%s5832_s24 + $0x10] sm:$0xff]  ;;  %v3363_v51 = vld [vmem:[%s5832_s24 + $0x8] sm:$0xff] }
 0x109   : > { %5132 = vmatpush3.bf16.msra.mxu0 %v5447_v41  ;;  %5147 = vmatprep.mubr.bf16.mxu0 %v5455_v46  ;;  %v3362_v49 = vld [vmem:[%s5832_s24] sm:$0xff]  ;;  %v3365_v52 = vld [vmem:[%s5832_s24 + $0x18] sm:$0xff]  ;;  %v5453_v53 = vld [vmem:[%s8535_s5 + $0x8] sm:$0xff]   ;;  %v5726_v41 = vmov 2475754826  }
 0x10a   : > { %5133 = vmatprep.subr.bf16.mxu0 %v5448_v42  ;;  %3379 = vperm.xlu0 %5445, %v3362_v49   ;;  %v3366_v54 = vld [vmem:[%s5832_s24 + $0x20] sm:$0xff]  ;;  %v1566_v55 = vld [vmem:[%s5837_s27 + $0x70] sm:$0xff]  ;;  %v1567_v56 = vld [vmem:[%s5837_s27 + $0x78] sm:$0xff]  ;;  %v5728_v46 = vmov 2102212464  }
 0x10b   : > { %3385 = vperm.xlu1 %5446, %v3364_v50   ;;  %v3367_v57 = vld [vmem:[%s5832_s24 + $0x28] sm:$0xff]  ;;  %v5923_v58 = vmul.f32 0.31415927, %v1566_v55  ;;  %v5925_v59 = vmul.f32 0.31415927, %v1567_v56  ;;  %v1564_v60 = vld [vmem:[%s5837_s27 + $0x60] sm:$0xff] }
 0x10c   : > { %v5928_v61 = vmul.f32 0.31415927, %v1564_v60  ;;  %v5454_v62 = vld [vmem:[%s8535_s5] sm:$0xff]   ;;  %v3368_v3 = vld [vmem:[%s5832_s24 + $0x30] sm:$0xff]  ;;  %v3369_v4 = vld [vmem:[%s5832_s24 + $0x38] sm:$0xff] }
 0x10d   : > { %5134 = vmatpush3.bf16.msra.mxu0 %v5448_v42  ;;  %v3026_v63 = vand.u32 2147483647, %v5923_v58  ;;  %v3029_v0 = vand.u32 2139095040, %v5923_v58  ;;  %v3129_v1 = vand.u32 2147483647, %v5925_v59  ;;  %v3132_v2 = vand.u32 2139095040, %v5925_v59 }
 0x10e   : > { %5135 = vmatprep.subr.bf16.mxu0 %v5449_v44  ;;  %3382 = vperm.xlu0 %5445, %v3363_v51   ;;  %v2823_v9 = vand.u32 2139095040, %v5928_v61  ;;  %v5456_v10 = vld [vmem:[%s5842_s14 + $0x8] sm:$0xff]   ;;  %v3370_v12 = vld [vmem:[%s5832_s24 + $0x40] sm:$0xff]  ;;  %v2820_v17 = vand.u32 2147483647, %v5928_v61  ;;  %v5457_v19 = vld [vmem:[%s5842_s14 + $0x10] sm:$0xff]  }
 0x10f   : > { %3388 = vperm.xlu1 %5446, %v3365_v52   ;;  %v3030_v5 = vshrl.u32 %v3029_v0, 23  ;;  %v3033_v6 = vand.u32 8388607, %v3026_v63  ;;  %v3133_v7 = vshrl.u32 %v3132_v2, 23  ;;  %v3136_v8 = vand.u32 8388607, %v3129_v1 }
 0x110   : > { %v3371_v13 = vld [vmem:[%s5832_s24 + $0x48] sm:$0xff]  ;;  %v2824_v15 = vshrl.u32 %v2823_v9, 23  ;;  %v3372_v23 = vld [vmem:[%s5832_s24 + $0x50] sm:$0xff]  ;;  %v3373_v24 = vld [vmem:[%s5832_s24 + $0x58] sm:$0xff]  ;;  %v5956_v30 = vand.u32 8388607, %v2820_v17 }
 0x111   : > { %5136 = vmatpush3.bf16.msra.mxu0 %v5449_v44  ;;  %v4804_v11 = vadd.s32 4294967169, %v3030_v5  ;;  %v4808_v14 = vadd.s32 4294967169, %v3133_v7  ;;  %v1565_v18 = vld [vmem:[%s5837_s27 + $0x68] sm:$0xff]  ;;  %v3034_v20 = vor.u32 8388608, %v3033_v6  ;;  %v3137_v21 = vor.u32 8388608, %v3136_v8  ;;  %v5458_v35 = vld [vmem:[%s5842_s14 + $0x18] sm:$0xff]  }
 0x112   : > { %5137 = vmatprep.subr.bf16.mxu0 %v5450_v45  ;;  %3391 = vperm.xlu0 %5445, %v3366_v54   ;;  %v4796_v26 = vadd.s32 4294967169, %v2824_v15  ;;  %v5952_v27 = vmul.f32 0.31415927, %v1565_v18  ;;  %v3374_v36 = vld [vmem:[%s5832_s24 + $0x60] sm:$0xff]  ;;  %v3375_v37 = vld [vmem:[%s5832_s24 + $0x68] sm:$0xff]  ;;  %v3377_v0 = vld [vmem:[%s5832_s24 + $0x78] sm:$0xff] }
 0x113   : > { %3394 = vperm.xlu1 %5446, %v3367_v57   ;;  %v3036_v16 = vadd.s32 1, %v4804_v11  ;;  %v3139_v22 = vadd.s32 1, %v4808_v14  ;;  %v5960_v32 = vshll.u32 %v3034_v20, 8  ;;  %v5964_v34 = vshll.u32 %v3137_v21, 8 }
 0x114   : > { %v5977_v51 = vadd.s32 1, %v4796_v26  ;;  %v5730_v57 = vmov 1326507024  }
 0x115   : > { %5138 = vmatpush3.bf16.msra.mxu0 %v5450_v45  ;;  %vm3037_vm0 = vcmp.gt.s32.totalorder %v3036_v16, 0  ;;  %vm3140_vm1 = vcmp.gt.s32.totalorder %v3139_v22, 0  ;;  %v5459_v45 = vld [vmem:[%s5842_s14 + $0x20] sm:$0xff]  }
 0x116   : > { %5139 = vmatprep.subr.bf16.mxu0 %v5451_v47  ;;  %3397 = vperm.xlu0 %5445, %v3368_v3   ;;  %v3038_v25 = vsel %vm3037_vm0, %v3036_v16, 0  ;;  %v3141_v29 = vsel %vm3140_vm1, %v3139_v22, 0  ;;  %vm2831_vm6 = vcmp.gt.s32.totalorder %v5977_v51, 0  ;;  %v5460_v16 = vld [vmem:[%s5842_s14 + $0x28] sm:$0xff]   ;;  %v5461_v22 = vld [vmem:[%s5842_s14 + $0x30] sm:$0xff]  }
 0x117   : > { %3400 = vperm.xlu1 %5446, %v3369_v4   ;;  %v3040_v28 = vand.u32 31, %v3038_v25  ;;  %v5958_v31 = vshrl.u32 %v3038_v25, 5  ;;  %v5962_v33 = vand.u32 31, %v3141_v29  ;;  %v5975_v50 = vshrl.u32 %v3141_v29, 5 }
 0x119   : > { %5140 = vmatpush3.bf16.msra.mxu0 %v5451_v47  ;;  %v3041_v38 = vsub.s32 32, %v3040_v28  ;;  %v3043_v40 = vshll.u32 %v5725_v39, %v3040_v28  ;;  %v3046_v42 = vshll.u32 %v5726_v41, %v3040_v28  ;;  %v3049_v44 = vshll.u32 %v5727_v43, %v3040_v28 }
 0x11a   : > { %5141 = vmatprep.subr.bf16.mxu0 %v5452_v48  ;;  %3403 = vperm.xlu0 %5445, %v3370_v12   ;;  %v3052_v47 = vshll.u32 %v5728_v46, %v3040_v28  ;;  %vm3058_vm2 = vcmp.lt.s32.totalorder %v5958_v31, 1  ;;  %vm3061_vm3 = vcmp.lt.s32.totalorder %v5958_v31, 4  ;;  %v3144_v5 = vsub.s32 32, %v5962_v33 }
 0x11b   : > { %3406 = vperm.xlu1 %5446, %v3371_v13   ;;  %v3042_v52 = vshrl.u32 %v5725_v39, %v3041_v38  ;;  %v3047_v54 = vshrl.u32 %v5727_v43, %v3041_v38  ;;  %v3050_v55 = vshrl.u32 %v5728_v46, %v3041_v38  ;;  %v3056_v60 = vshrl.u32 %v5730_v57, %v3041_v38 }
 0x11c   : > { %vm3059_vm4 = vcmp.lt.s32.totalorder %v5958_v31, 2  ;;  %vm3060_vm5 = vcmp.lt.s32.totalorder %v5958_v31, 3  ;;  %v3146_v15 = vshll.u32 %v5725_v39, %v5962_v33  ;;  %v3145_v20 = vshrl.u32 %v5725_v39, %v3144_v5 }
 0x11d   : > { %5142 = vmatpush3.bf16.msra.mxu0 %v5452_v48  ;;  %v5729_v48 = vmov 920167782   ;;  %v3048_v3 = vor.u32 %v3047_v54, %v3046_v42  ;;  %v3051_v4 = vor.u32 %v3050_v55, %v3049_v44  ;;  %v3147_v21 = vshrl.u32 %v5726_v41, %v3144_v5 }
 0x11e   : > { %5143 = vmatprep.subr.bf16.mxu0 %v5453_v53  ;;  %3409 = vperm.xlu0 %5445, %v3372_v23   ;;  %v3055_v49 = vshll.u32 %v5729_v48, %v3040_v28  ;;  %v3053_v56 = vshrl.u32 %v5729_v48, %v3041_v38  ;;  %vm3161_vm7 = vcmp.lt.s32.totalorder %v5975_v50, 1  ;;  %v3152_v31 = vshll.u32 %v5727_v43, %v5962_v33 }
 0x11f   : > { %3412 = vperm.xlu1 %5446, %v3373_v24   ;;  %v3063_v9 = vsel %vm3061_vm3, %v3051_v4, 2102212464  ;;  %v3070_v11 = vsel %vm3058_vm2, %v3048_v3, %v3051_v4  ;;  %v3155_v42 = vshll.u32 %v5728_v46, %v5962_v33  ;;  %v3156_v44 = vshrl.u32 %v5729_v48, %v3144_v5 }
 0x120   : > { %v3054_v6 = vor.u32 %v3053_v56, %v3052_v47  ;;  %v3057_v7 = vor.u32 %v3056_v60, %v3055_v49  ;;  %v3064_v12 = vsel %vm3060_vm5, %v3048_v3, %v3063_v9  ;;  %vm3162_vm8 = vcmp.lt.s32.totalorder %v5975_v50, 2 }
 0x121   : > { %5144 = vmatpush3.bf16.msra.mxu0 %v5453_v53  ;;  %v3044_v53 = vshrl.u32 %v5726_v41, %v3041_v38  ;;  %v3150_v38 = vshrl.u32 %v5727_v43, %v3144_v5  ;;  %vm3164_vm10 = vcmp.lt.s32.totalorder %v5975_v50, 4  ;;  %v3157_v55 = vor.u32 %v3156_v44, %v3155_v42 }
 0x122   : > { %5145 = vmatprep.subr.bf16.mxu0 %v5454_v62  ;;  %3415 = vperm.xlu0 %5445, %v3374_v36   ;;  %v3067_v13 = vsel %vm3061_vm3, %v3054_v6, 920167782  ;;  %v3071_v14 = vsel %vm3061_vm3, %v3057_v7, 1326507024  ;;  %v3148_v36 = vor.u32 %v3147_v21, %v3146_v15  ;;  %vm3163_vm11 = vcmp.lt.s32.totalorder %v5975_v50, 3 }
 0x123   : > { %v3045_v2 = vor.u32 %v3044_v53, %v3043_v40  ;;  %3418 = vperm.xlu1 %5446, %v3375_v37   ;;  %v3068_v18 = vsel %vm3060_vm5, %v3051_v4, %v3067_v13  ;;  %v3149_v37 = vshll.u32 %v5726_v41, %v5962_v33  ;;  %v3153_v40 = vshrl.u32 %v5728_v46, %v3144_v5 }
 0x124   : > { %v3170_v4 = vsel %vm3164_vm10, %v3157_v55, 920167782  ;;  %v2832_v9 = vsel %vm2831_vm6, %v5977_v51, 0  ;;  %v2926_v21 = vand.u32 2139095040, %v5952_v27  ;;  %vm6151_vm3 = vcmp.le.f32.partialorder %v3026_v63, 0.7853982 }
 0x125   : > { %5146 = vmatpush3.bf16.msra.mxu0 %v5454_v62  ;;  %v3376_v62 = vld [vmem:[%s5832_s24 + $0x70] sm:$0xff]  ;;  %v3062_v8 = vsel %vm3058_vm2, %v3042_v52, %v3045_v2  ;;  %v3151_v49 = vor.u32 %v3150_v38, %v3149_v37  ;;  %v3159_v52 = vshrl.u32 %v5730_v57, %v3144_v5  ;;  %v3154_v54 = vor.u32 %v3153_v40, %v3152_v31 }
 0x126   : > { %3421 = vperm.xlu0 %5445, %v3376_v62   ;;  %v3065_v23 = vsel %vm3059_vm4, %v3062_v8, %v3064_v12  ;;  %v2927_v38 = vshrl.u32 %v2926_v21, 23 }
 0x127   : > { %3424 = vperm.xlu1 %5446, %v3377_v0   ;;  %v3081_v47 = vmul.u32 %v5960_v32, %v3065_v23  ;;  %v3166_v60 = vsel %vm3164_vm10, %v3154_v54, 2102212464  ;;  %v3169_v62 = vsel %vm3161_vm7, %v3148_v36, %v3151_v49  ;;  %v3173_v0 = vsel %vm3161_vm7, %v3151_v49, %v3154_v54 }
 0x128   : > { %5148 = vmatmul.mubr.bf16.vlgmr.msra.gmra.mxu0 %v5456_v10  ;;  %v3066_v10 = vsel %vm3058_vm2, %v3045_v2, %v3048_v3  ;;  %v3167_v3 = vsel %vm3163_vm11, %v3151_v49, %v3166_v60  ;;  %v3171_v7 = vsel %vm3163_vm11, %v3154_v54, %v3170_v4  ;;  %vm3028_vm2 = vcmp.lt.s32.totalorder %v5923_v58, 0 }
 0x129   : > { %5151 = vmatprep.mubr.bf16.mxu0 %v5457_v19  ;;  %v3072_v19 = vsel %vm3060_vm5, %v3054_v6, %v3071_v14  ;;  %v3069_v24 = vsel %vm3059_vm4, %v3066_v10, %v3068_v18  ;;  %v5462_v6 = vld [vmem:[%s5842_s14 + $0x38] sm:$0xff]   ;;  %v3172_v12 = vsel %vm3162_vm8, %v3169_v62, %v3171_v7  ;;  %vm6160_vm5 = vcmp.le.f32.partialorder %v3129_v1, 0.7853982 }
 0x12a   : > { %v3073_v25 = vsel %vm3059_vm4, %v3070_v11, %v3072_v19  ;;  %v2828_v19 = vor.u32 8388608, %v5956_v30  ;;  %vm3131_vm4 = vcmp.lt.s32.totalorder %v5925_v59, 0 }
 0x12b   : > { %v6019_v26 = vmul.u32.u64.low %v5960_v32, %v3073_v25  ;;  %v6020_v28 = vmul.u32.u64.high %v5960_v32, %v3073_v25, %v6019_v26 }
 0x12c   : > { %v6086_v37 = vshll.u32 %v2828_v19, 8 }
 0x130   : > { %5152 = vmatmul.mubr.bf16.gmra.mxu0 %v5458_v35  ;;  %v6023_v29 = vmul.u32.u64.low %v5960_v32, %v3069_v24  ;;  %v6024_v35 = vmul.u32.u64.high %v5960_v32, %v3069_v24, %v6023_v29  ;;  %v3165_v32 = vsel %vm3161_vm7, %v3145_v20, %v3148_v36  ;;  %v2834_v20 = vand.u32 31, %v2832_v9 }
 0x131   : > { %5155 = vmatprep.mubr.bf16.mxu0 %v5459_v45  ;;  %v3158_v45 = vshll.u32 %v5729_v48, %v5962_v33  ;;  %v3168_v11 = vsel %vm3162_vm8, %v3165_v32, %v3167_v3 }
 0x132   : > { %vm3083_vm9 = vc.u32 %v6020_v28, %v6023_v29  ;;  %v3084_v53 = vadd.s32 1, %v6024_v35  ;;  %v3184_v23 = vmul.u32 %v5964_v34, %v3168_v11  ;;  %v2835_v24 = vsub.s32 32, %v2834_v20 }
 0x133   : > { %v3160_v56 = vor.u32 %v3159_v52, %v3158_v45  ;;  %v2837_v25 = vshll.u32 %v5725_v39, %v2834_v20  ;;  %v2840_v30 = vshll.u32 %v5726_v41, %v2834_v20  ;;  %v3082_v31 = vadd.s32 %v6023_v29, %v6020_v28 }
 0x134   : > { %v3085_v33 = vsel %vm3083_vm9, %v3084_v53, %v6024_v35  ;;  %v2838_v36 = vshrl.u32 %v5726_v41, %v2835_v24  ;;  %v2841_v40 = vshrl.u32 %v5727_v43, %v2835_v24  ;;  %v2843_v42 = vshll.u32 %v5727_v43, %v2834_v20 }
 0x135   : > { %v3086_v2 = vadd.s32 %v3085_v33, %v3081_v47  ;;  %v3174_v5 = vsel %vm3164_vm10, %v3160_v56, 1326507024  ;;  %v2844_v52 = vshrl.u32 %v5728_v46, %v2835_v24  ;;  %v2846_v53 = vshll.u32 %v5728_v46, %v2834_v20 }
 0x136   : > { %v3175_v8 = vsel %vm3163_vm11, %v3157_v55, %v3174_v5  ;;  %v2839_v47 = vor.u32 %v2838_v36, %v2837_v25  ;;  %v2842_v49 = vor.u32 %v2841_v40, %v2840_v30  ;;  %v2847_v54 = vshrl.u32 %v5729_v48, %v2835_v24 }
 0x137   : > { %v3087_v10 = vadd.s32 536870912, %v3086_v2  ;;  %v3176_v13 = vsel %vm3162_vm8, %v3173_v0, %v3175_v8  ;;  %v2836_v29 = vshrl.u32 %v5725_v39, %v2835_v24  ;;  %v2845_v56 = vor.u32 %v2844_v52, %v2843_v42 }
 0x138   : > { %5156 = vmatmul.mubr.bf16.gmra.mxu0 %v5460_v16  ;;  %v6062_v14 = vmul.u32.u64.low %v5964_v34, %v3176_v13  ;;  %v6063_v15 = vmul.u32.u64.high %v5964_v34, %v3176_v13, %v6062_v14  ;;  %v6066_v16 = vmul.u32.u64.low %v5964_v34, %v3172_v12  ;;  %v6067_v18 = vmul.u32.u64.high %v5964_v34, %v3172_v12, %v6066_v16 }
 0x139   : > { %5159 = vmatprep.mubr.bf16.mxu0 %v5461_v22  ;;  %v6070_v51 = vshrl.u32 %v3087_v10, 30  ;;  %v6074_v22 = vshrl.u32 %v2832_v9, 5  ;;  %v2848_v32 = vor.u32 %v2847_v54, %v2846_v53  ;;  %v2849_v33 = vshll.u32 %v5729_v48, %v2834_v20 }
 0x13a   : > { %vm3186_vm12 = vc.u32 %v6063_v15, %v6066_v16  ;;  %v3187_v26 = vadd.s32 1, %v6067_v18  ;;  %v2850_v62 = vshrl.u32 %v5730_v57, %v2835_v24  ;;  %v4800_v5 = vadd.s32 4294967169, %v2927_v38 }
 0x13b   : > { %v3089_v50 = vshll.u32 %v6070_v51, 30  ;;  %vm2852_vm13 = vcmp.lt.s32.totalorder %v6074_v22, 1  ;;  %vm2854_vm14 = vcmp.lt.s32.totalorder %v6074_v22, 3  ;;  %vm2855_vm15 = vcmp.lt.s32.totalorder %v6074_v22, 4 }
 0x13c   : > { %v3188_v34 = vsel %vm3186_vm12, %v3187_v26, %v6067_v18  ;;  %vm2853_vm0 = vcmp.lt.s32.totalorder %v6074_v22, 2  ;;  %v2860_v0 = vsel %vm2852_vm13, %v2839_v47, %v2842_v49  ;;  %v2857_v3 = vsel %vm2855_vm15, %v2845_v56, 2102212464 }
 0x13d   : > { %v6083_v35 = vsub.s32 %v3086_v2, %v3089_v50  ;;  %v3189_v45 = vadd.s32 %v3188_v34, %v3184_v23  ;;  %v2861_v4 = vsel %vm2855_vm15, %v2848_v32, 920167782  ;;  %v2851_v7 = vor.u32 %v2850_v62, %v2849_v33 }
 0x13e   : > { %v2856_v8 = vsel %vm2852_vm13, %v2836_v29, %v2839_v47  ;;  %v2862_v9 = vsel %vm2854_vm14, %v2845_v56, %v2861_v4  ;;  %v2858_v11 = vsel %vm2854_vm14, %v2842_v49, %v2857_v3  ;;  %v2864_v13 = vsel %vm2852_vm13, %v2842_v49, %v2845_v56 }
 0x13f   : > { %v3092_v44 = vsub.s32 0, %v6083_v35  ;;  %v3190_v55 = vadd.s32 536870912, %v3189_v45  ;;  %v2863_v12 = vsel %vm2853_vm0, %v2860_v0, %v2862_v9  ;;  %v2865_v14 = vsel %vm2855_vm15, %v2851_v7, 1326507024 }
 0x140   : > { %5160 = vmatmul.mubr.bf16.gmra.mxu0 %v5462_v6  ;;  %v6123_v18 = vmul.u32.u64.low %v6086_v37, %v2863_v12  ;;  %v6124_v19 = vmul.u32.u64.high %v6086_v37, %v2863_v12, %v6123_v18  ;;  %v3112_v21 = vsub.s32 4, %v6070_v51  ;;  %v2866_v23 = vsel %vm2854_vm14, %v2848_v32, %v2865_v14 }
 0x141   : > { %v4805_v28 = vmin.u32 %v3092_v44, %v6083_v35  ;;  %v3191_v2 = vshrl.u32 %v3190_v55, 30  ;;  %v2859_v30 = vsel %vm2853_vm0, %v2856_v8, %v2858_v11  ;;  %v2867_v38 = vsel %vm2853_vm0, %v2864_v13, %v2866_v23 }
 0x142   : > { %v2923_v34 = vand.u32 2147483647, %v5952_v27  ;;  %v2875_v52 = vmul.u32 %v6086_v37, %v2859_v30  ;;  %v2878_v54 = vadd.s32 1, %v6124_v19  ;;  %v3185_v1 = vadd.s32 %v6066_v16, %v6063_v15 }
 0x143   : > { %v3094_v60 = vclz %v4805_v28  ;;  %v3192_v10 = vshll.u32 %v3191_v2, 30  ;;  %v3215_v49 = vsub.s32 4, %v3191_v2  ;;  %v2933_v28 = vadd.s32 1, %v4800_v5 }
 0x144   : > { %vm3118_vm0 = vweird.f32 %v5923_v58 }
 0x145   : > { %v4806_v6 = vadd.s32 4294967294, %v3094_v60  ;;  %v6127_v50 = vsub.s32 %v3189_v45, %v3192_v10  ;;  %v6140_v44 = vmul.u32.u64.low %v6086_v37, %v2867_v38  ;;  %v6141_v45 = vmul.u32.u64.high %v6086_v37, %v2867_v38, %v6140_v44 }
 0x146   : > { %vm2934_vm7 = vcmp.gt.s32.totalorder %v2933_v28, 0  ;;  %v6170_v62 = vsel %vm3131_vm4, %v3215_v49, %v3191_v2 }
 0x147   : > { %vm4807_vm1 = vcmp.lt.s32.totalorder %v4806_v6, 0  ;;  %v3195_v36 = vsub.s32 0, %v6127_v50  ;;  %vm2877_vm6 = vc.u32 %v6141_v45, %v6123_v18  ;;  %v2935_v3 = vsel %vm2934_vm7, %v2933_v28, 0 }
 0x148   : > { %v3097_v20 = vsel %vm4807_vm1, 0, %v4806_v6  ;;  %v2879_v33 = vsel %vm2877_vm6, %v2878_v54, %v6124_v19  ;;  %v2937_v5 = vand.u32 31, %v2935_v3  ;;  %v1562_v6 = vld [vmem:[%s5837_s27 + $0x50] sm:$0xff]  ;;  %v3218_v2 = vsel %vm6160_vm5, 0, %v6170_v62 }
 0x149   : > { %v3098_v24 = vsub.s32 32, %v3097_v20  ;;  %v3099_v25 = vshll.u32 %v6083_v35, %v3097_v20  ;;  %v3102_v26 = vsub.s32 4294967266, %v3097_v20  ;;  %v3113_v35 = vsel %vm3028_vm2, %v3112_v21, %v6070_v51 }
 0x14a   : > { %v4809_v47 = vmin.u32 %v3195_v36, %v6127_v50  ;;  %v2930_v51 = vand.u32 8388607, %v2923_v34  ;;  %v3115_v63 = vsel %vm6151_vm3, 0, %v3113_v35  ;;  %v2880_v0 = vadd.s32 %v2879_v33, %v2875_v52 }
 0x14b   : > { %v3100_v40 = vshrl.u32 %v3082_v31, %v3098_v24  ;;  %v3103_v42 = vadd.s32 127, %v3102_v26  ;;  %v6175_v8 = vand.u32 3, %v3115_v63  ;;  %v2938_v15 = vsub.s32 32, %v2937_v5 }
 0x14c   : > { %v3197_v29 = vclz %v4809_v47  ;;  %v2931_v4 = vor.u32 8388608, %v2930_v51  ;;  %v2881_v10 = vadd.s32 536870912, %v2880_v0  ;;  %v6183_v16 = vmul.f32 0.31415927, %v1562_v6 }
 0x14d   : > { %v3101_v53 = vor.u32 %v3100_v40, %v3099_v25  ;;  %v3104_v22 = vshll.u32 %v3103_v42, 23  ;;  %v6186_v23 = vadd.s32 %v6123_v18, %v6141_v45  ;;  %v2940_v26 = vshll.u32 %v5725_v39, %v2937_v5 }
 0x14e   : > { %v4810_v32 = vadd.s32 4294967294, %v3197_v29  ;;  %v6181_v19 = vshrl.u32 %v2881_v10, 30  ;;  %v6188_v24 = vshll.u32 %v2931_v4, 8  ;;  %v2614_v30 = vand.u32 2147483647, %v6183_v16 }
 0x14f   : > { %v3105_v55 = vor.u32 4788187, %v3104_v22  ;;  %v3108_v37 = vcvt.s32.f32 %v3101_v53  ;;  %v2943_v18 = vshll.u32 %v5726_v41, %v2937_v5  ;;  %v2941_v44 = vshrl.u32 %v5726_v41, %v2938_v15 }
 0x150   : > { %vm4811_vm8 = vcmp.lt.s32.totalorder %v4810_v32, 0  ;;  %v2883_v25 = vshll.u32 %v6181_v19, 30  ;;  %v2944_v45 = vshrl.u32 %v5727_v43, %v2938_v15  ;;  %v2936_v49 = vshrl.u32 %v2935_v3, 5 }
 0x151   : > { %v3106_v60 = vand.u32 2147483647, %v3105_v55  ;;  %v3200_v9 = vsel %vm4811_vm8, 0, %v4810_v32  ;;  %v2939_v53 = vshrl.u32 %v5725_v39, %v2938_v15  ;;  %v2946_v22 = vshll.u32 %v5727_v43, %v2937_v5 }
 0x152   : > { %v3201_v11 = vsub.s32 32, %v3200_v9  ;;  %v3202_v12 = vshll.u32 %v6127_v50, %v3200_v9  ;;  %v3205_v13 = vsub.s32 4294967266, %v3200_v9  ;;  %v6199_v42 = vsub.s32 %v2880_v0, %v2883_v25 }
 0x153   : > { %v3109_v7 = vmul.f32 %v3108_v37, %v3106_v60  ;;  %v2947_v54 = vshrl.u32 %v5728_v46, %v2938_v15  ;;  %v2949_v31 = vshll.u32 %v5728_v46, %v2937_v5  ;;  %v2950_v29 = vshrl.u32 %v5729_v48, %v2938_v15 }
 0x154   : > { %v3203_v20 = vshrl.u32 %v3185_v1, %v3201_v11  ;;  %v3206_v21 = vadd.s32 127, %v3205_v13  ;;  %v2886_v52 = vsub.s32 0, %v6199_v42  ;;  %v2952_v51 = vshll.u32 %v5729_v48, %v2937_v5 }
 0x155   : > { %v3110_v14 = vxor.u32 2147483648, %v3109_v7  ;;  %v2942_v37 = vor.u32 %v2941_v44, %v2940_v26  ;;  %v2945_v63 = vor.u32 %v2944_v45, %v2943_v18  ;;  %v2617_v32 = vand.u32 2139095040, %v6183_v16 }
 0x156   : > { %v3204_v38 = vor.u32 %v3203_v20, %v3202_v12  ;;  %v3207_v40 = vshll.u32 %v3206_v21, 23  ;;  %v4797_v55 = vmin.u32 %v2886_v52, %v6199_v42  ;;  %vm3124_vm9 = vcmp.eq.s32.totalorder %v6175_v8, 2 }
 0x157   : > { %v3111_v50 = vsel %vm3028_vm2, %v3110_v14, %v3109_v7  ;;  %v2948_v60 = vor.u32 %v2947_v54, %v2946_v22  ;;  %v2951_v0 = vor.u32 %v2950_v29, %v2949_v31  ;;  %v2953_v3 = vshrl.u32 %v5730_v57, %v2938_v15 }
 0x158   : > { %v3114_v36 = vsel %vm6151_vm3, %v5923_v58, %v3111_v50  ;;  %v3208_v35 = vor.u32 4788187, %v3207_v40  ;;  %v3211_v47 = vcvt.s32.f32 %v3204_v38  ;;  %vm3121_vm10 = vcmp.eq.s32.totalorder %v6175_v8, 0 }
 0x159   : > { %5479 = vcosq.f32 %v3114_v36  ;;  %v2888_v1 = vclz %v4797_v55  ;;  %vm2955_vm11 = vcmp.lt.s32.totalorder %v2936_v49, 1  ;;  %vm2956_vm12 = vcmp.lt.s32.totalorder %v2936_v49, 2 }
 0x15a   : > { %5481 = vsinq.f32 %v3114_v36  ;;  %v3209_v28 = vand.u32 2147483647, %v3208_v35  ;;  %vm2957_vm13 = vcmp.lt.s32.totalorder %v2936_v49, 3  ;;  %vm3120_vm14 = vcmp.lt.s32.totalorder %v6175_v8, 2 }
 0x15b   : > { %v2954_v5 = vor.u32 %v2953_v3, %v2952_v51  ;;  %vm2958_vm15 = vcmp.lt.s32.totalorder %v2936_v49, 4  ;;  %v2959_v6 = vsel %vm2955_vm11, %v2939_v53, %v2942_v37  ;;  %v4798_v7 = vadd.s32 4294967294, %v2888_v1 }
 0x15c   : > { %v3212_v33 = vmul.f32 %v3211_v47, %v3209_v28  ;;  %v2960_v9 = vsel %vm2958_vm15, %v2948_v60, 2102212464  ;;  %v2963_v10 = vsel %vm2955_vm11, %v2942_v37, %v2945_v63  ;;  %v2964_v11 = vsel %vm2958_vm15, %v2951_v0, 920167782 }
 0x15d   : > { %vm2822_vm1 = vcmp.lt.s32.totalorder %v5928_v61, 0  ;;  %v2906_v13 = vsub.s32 4, %v6181_v19  ;;  %v2961_v14 = vsel %vm2957_vm13, %v2945_v63, %v2960_v9  ;;  %v2965_v15 = vsel %vm2957_vm13, %v2948_v60, %v2964_v11 }
 0x15e   : > { %v3213_v4 = vxor.u32 2147483648, %v3212_v33  ;;  %vm4799_vm2 = vcmp.lt.s32.totalorder %v4798_v7, 0  ;;  %v2966_v21 = vsel %vm2956_vm12, %v2963_v10, %v2965_v15  ;;  %v2967_v50 = vsel %vm2955_vm11, %v2945_v63, %v2948_v60 }
 0x15f   : > { %v2891_v25 = vsel %vm4799_vm2, 0, %v4798_v7  ;;  %v2962_v26 = vsel %vm2956_vm12, %v2959_v6, %v2961_v14  ;;  %v2968_v36 = vsel %vm2958_vm15, %v2954_v5, 1326507024  ;;  %vm6236_vm3 = vcmp.le.f32.partialorder %v2820_v17, 0.7853982 }
 0x160   : > { %v3214_v12 = vsel %vm3131_vm4, %v3213_v4, %v3212_v33  ;;  %v2892_v40 = vsub.s32 32, %v2891_v25  ;;  %v2893_v18 = vshll.u32 %v6199_v42, %v2891_v25  ;;  %v2896_v44 = vsub.s32 4294967266, %v2891_v25 }
 0x161   : > { %v3217_v20 = vsel %vm6160_vm5, %v5925_v59, %v3214_v12  ;;  %v2969_v35 = vsel %vm2957_vm13, %v2951_v0, %v2968_v36  ;;  %v6243_v47 = vmul.u32.u64.low %v6188_v24, %v2966_v21  ;;  %v6244_v52 = vmul.u32.u64.high %v6188_v24, %v2966_v21, %v6243_v47 }
 0x162   : > { %5483 = vcosq.f32 %v3217_v20  ;;  %v2618_v53 = vshrl.u32 %v2617_v32, 23  ;;  %v2894_v17 = vshrl.u32 %v6186_v23, %v2892_v40  ;;  %v2897_v28 = vadd.s32 127, %v2896_v44 }
 0x163   : > { %5485 = vsinq.f32 %v3217_v20  ;;  %v2970_v31 = vsel %vm2956_vm12, %v2967_v50, %v2969_v35  ;;  %v3222_v63 = vand.u32 3, %v3218_v2  ;;  %v2978_v49 = vmul.u32 %v6188_v24, %v2962_v26 }
 0x164   : > { %v6250_v42 = vmul.u32.u64.low %v6188_v24, %v2970_v31  ;;  %v6251_v51 = vmul.u32.u64.high %v6188_v24, %v2970_v31, %v6250_v42  ;;  %v4788_v55 = vadd.s32 4294967169, %v2618_v53  ;;  %v2895_v32 = vor.u32 %v2894_v17, %v2893_v18 }
 0x165   : > { %v2898_v33 = vshll.u32 %v2897_v28, 23  ;;  %v2981_v60 = vadd.s32 1, %v6244_v52  ;;  %v2907_v56 = vsel %vm2822_vm1, %v2906_v13, %v6181_v19  ;;  %v2621_v2 = vand.u32 8388607, %v2614_v30 }
 0x166   : > { %v5480_v45 = vpop.eup %5479  ;;  %v2624_v0 = vadd.s32 1, %v4788_v55  ;;  %v2902_v4 = vcvt.s32.f32 %v2895_v32  ;;  %vm2980_vm4 = vc.u32 %v6251_v51, %v6243_v47  ;;  %v2909_v7 = vsel %vm6236_vm3, 0, %v2907_v56 }
 0x167   : > { %v5482_v22 = vpop.eup %5481  ;;  %v3125_v54 = vxor.u32 2147483648, %v5480_v45  ;;  %v2899_v1 = vor.u32 4788187, %v2898_v33  ;;  %v2982_v8 = vsel %vm2980_vm4, %v2981_v60, %v6244_v52  ;;  %vm3221_vm6 = vweird.f32 %v5925_v59 }
 0x168   : > { %v3122_v29 = vxor.u32 2147483648, %v5482_v22  ;;  %vm2625_vm5 = vcmp.gt.s32.totalorder %v2624_v0, 0  ;;  %v2983_v9 = vadd.s32 %v2982_v8, %v2978_v49  ;;  %vm3223_vm7 = vcmp.lt.s32.totalorder %v3222_v63, 2 }
 0x169   : > { %v3126_v37 = vsel %vm3124_vm9, %v3125_v54, %v5482_v22  ;;  %v2900_v5 = vand.u32 2147483647, %v2899_v1  ;;  %v2626_v6 = vsel %vm2625_vm5, %v2624_v0, 0  ;;  %vm3224_vm8 = vcmp.eq.s32.totalorder %v3222_v63, 0 }
 0x16a   : > { %v3123_v23 = vsel %vm3121_vm10, %v5480_v45, %v3122_v29  ;;  %v2628_v19 = vand.u32 31, %v2626_v6  ;;  %vm3227_vm9 = vcmp.eq.s32.totalorder %v3222_v63, 2  ;;  %v2984_v11 = vadd.s32 536870912, %v2983_v9 }
 0x16b   : > { %v3127_v3 = vsel %vm3120_vm14, %v3123_v23, %v3126_v37  ;;  %v2903_v58 = vmul.f32 %v2902_v4, %v2900_v5  ;;  %v6278_v15 = vand.u32 3, %v2909_v7  ;;  %v2622_v20 = vor.u32 8388608, %v2621_v2  ;;  %v1563_v23 = vld [vmem:[%s5837_s27 + $0x58] sm:$0xff] }
 0x16c   : > { %v3128_v62 = vsel %vm3118_vm0, nan, %v3127_v3  ;;  %v2629_v12 = vsub.s32 32, %v2628_v19  ;;  %v6280_v21 = vshrl.u32 %v2626_v6, 5  ;;  %v6282_v26 = vshrl.u32 %v2984_v11, 30 }
 0x16d   : > { %v3246_v24 = vadd.f32 1.0, %v3128_v62  ;;  %v2904_v14 = vxor.u32 2147483648, %v2903_v58  ;;  %v2631_v36 = vshll.u32 %v5725_v39, %v2628_v19  ;;  %v2634_v40 = vshll.u32 %v5726_v41, %v2628_v19 }
 0x16e   : > { %v2632_v45 = vshrl.u32 %v5726_v41, %v2629_v12  ;;  %v2637_v35 = vshll.u32 %v5727_v43, %v2628_v19  ;;  %v2986_v22 = vshll.u32 %v6282_v26, 30  ;;  %v2635_v54 = vshrl.u32 %v5727_v43, %v2629_v12 }
 0x16f   : > { %v3262_v10 = vmul.f32 0.5, %v3246_v24  ;;  %v5484_v13 = vpop.eup %5483  ;;  %v2905_v44 = vsel %vm2822_vm1, %v2904_v14, %v2903_v58  ;;  %v2638_v28 = vshrl.u32 %v5728_v46, %v2629_v12  ;;  %v2640_v31 = vshll.u32 %v5728_v46, %v2628_v19 }
 0x170   : > { %v5486_v50 = vpop.eup %5485  ;;  %v3228_v25 = vxor.u32 2147483648, %v5484_v13  ;;  %v2908_v53 = vsel %vm6236_vm3, %v5928_v61, %v2905_v44  ;;  %v6300_v42 = vsub.s32 %v2983_v9, %v2986_v22  ;;  %v2643_v38 = vshll.u32 %v5729_v48, %v2628_v19 }
 0x171   : > { %3336 = vperm.xlu0 %5445, %v3262_v10   ;;  %v3225_v18 = vxor.u32 2147483648, %v5486_v50  ;;  %5487 = vcosq.f32 %v2908_v53  ;;  %v2630_v37 = vshrl.u32 %v5725_v39, %v2629_v12  ;;  %v2633_v32 = vor.u32 %v2632_v45, %v2631_v36 }
 0x172   : > { %v3229_v52 = vsel %vm3227_vm9, %v3228_v25, %v5486_v50  ;;  %5489 = vsinq.f32 %v2908_v53  ;;  %v2641_v33 = vshrl.u32 %v5729_v48, %v2629_v12  ;;  %v2989_v60 = vsub.s32 0, %v6300_v42 }
 0x173   : > { %v3226_v17 = vsel %vm3224_vm8, %v5484_v13, %v3225_v18  ;;  %v2636_v0 = vor.u32 %v2635_v54, %v2634_v40  ;;  %v2644_v63 = vshrl.u32 %v5730_v57, %v2629_v12  ;;  %v2639_v3 = vor.u32 %v2638_v28, %v2637_v35 }
 0x174   : > { %v3230_v29 = vsel %vm3223_vm7, %v3226_v17, %v3229_v52  ;;  %v2642_v1 = vor.u32 %v2641_v33, %v2640_v31  ;;  %vm2646_vm10 = vcmp.lt.s32.totalorder %v6280_v21, 1  ;;  %v2662_v4 = vshll.u32 %v2622_v20, 8 }
 0x175   : > { %v3231_v55 = vsel %vm3221_vm6, nan, %v3230_v29  ;;  %v4801_v59 = vmin.u32 %v2989_v60, %v6300_v42  ;;  %vm2648_vm11 = vcmp.lt.s32.totalorder %v6280_v21, 3  ;;  %v6313_v62 = vmul.f32 0.31415927, %v1563_v23 }
 0x176   : > { %v3247_v49 = vadd.f32 1.0, %v3231_v55  ;;  %v2645_v2 = vor.u32 %v2644_v63, %v2643_v38  ;;  %vm2647_vm12 = vcmp.lt.s32.totalorder %v6280_v21, 2  ;;  %vm2649_vm13 = vcmp.lt.s32.totalorder %v6280_v21, 4 }
 0x177   : > { %v2650_v24 = vsel %vm2646_vm10, %v2630_v37, %v2633_v32  ;;  %v2991_v5 = vclz %v4801_v59  ;;  %v2651_v8 = vsel %vm2649_vm13, %v2639_v3, 2102212464  ;;  %v2654_v6 = vsel %vm2646_vm10, %v2633_v32, %v2636_v0  ;;  %v1560_v59 = vld [vmem:[%s5837_s27 + $0x40] sm:$0xff] }
 0x178   : > { %v3263_v56 = vmul.f32 0.5, %v3247_v49  ;;  %v2655_v7 = vsel %vm2649_vm13, %v2642_v1, 920167782  ;;  %vm2912_vm14 = vweird.f32 %v5928_v61  ;;  %v2652_v9 = vsel %vm2648_vm11, %v2636_v0, %v2651_v8 }
 0x179   : > { %v2656_v19 = vsel %vm2648_vm11, %v2639_v3, %v2655_v7  ;;  %v2658_v10 = vsel %vm2646_vm10, %v2636_v0, %v2639_v3  ;;  %v2659_v58 = vsel %vm2649_vm13, %v2645_v2, 1326507024  ;;  %vm2925_vm15 = vcmp.lt.s32.totalorder %v5952_v27, 0 }
 0x17a   : > { %3341 = vperm.xlu1 %5446, %v3263_v56   ;;  %v4802_v11 = vadd.s32 4294967294, %v2991_v5  ;;  %v2657_v12 = vsel %vm2647_vm12, %v2654_v6, %v2656_v19  ;;  %v2660_v13 = vsel %vm2648_vm11, %v2642_v1, %v2659_v58  ;;  %v2979_v14 = vadd.s32 %v6243_v47, %v6251_v51 }
 0x17b   : > { %v2661_v20 = vsel %vm2647_vm12, %v2658_v10, %v2660_v13  ;;  %v6337_v50 = vmul.u32.u64.low %v2662_v4, %v2657_v12  ;;  %v6338_v25 = vmul.u32.u64.high %v2662_v4, %v2657_v12, %v6337_v50  ;;  %v2653_v36 = vsel %vm2647_vm12, %v2650_v24, %v2652_v9 }
 0x17c   : > { %vm4803_vm0 = vcmp.lt.s32.totalorder %v4802_v11, 0  ;;  %v6343_v40 = vmul.u32.u64.low %v2662_v4, %v2661_v20  ;;  %v6344_v18 = vmul.u32.u64.high %v2662_v4, %v2661_v20, %v6343_v40  ;;  %vm2915_vm1 = vcmp.eq.s32.totalorder %v6278_v15, 0 }
 0x17d   : > { %vm2918_vm2 = vcmp.eq.s32.totalorder %v6278_v15, 2  ;;  %v2994_v44 = vsel %vm4803_vm0, 0, %v4802_v11  ;;  %v2720_v47 = vand.u32 2139095040, %v6313_v62  ;;  %v3009_v53 = vsub.s32 4, %v6282_v26 }
 0x17e   : > { %v5488_v51 = vpop.eup %5487  ;;  %v2995_v45 = vsub.s32 32, %v2994_v44  ;;  %v2996_v35 = vshll.u32 %v6300_v42, %v2994_v44  ;;  %v2999_v52 = vsub.s32 4294967266, %v2994_v44  ;;  %v2669_v54 = vmul.u32 %v2662_v4, %v2653_v36 }
 0x17f   : > { %v5490_v22 = vpop.eup %5489  ;;  %v2919_v21 = vxor.u32 2147483648, %v5488_v51  ;;  %v2672_v17 = vadd.s32 1, %v6338_v25  ;;  %v2721_v28 = vshrl.u32 %v2720_v47, 23  ;;  %vm2914_vm3 = vcmp.lt.s32.totalorder %v6278_v15, 2 }
 0x180   : > { %v2916_v31 = vxor.u32 2147483648, %v5490_v22  ;;  %v2997_v29 = vshrl.u32 %v2979_v14, %v2995_v45  ;;  %v3000_v38 = vadd.s32 127, %v2999_v52  ;;  %vm2671_vm4 = vc.u32 %v6344_v18, %v6337_v50 }
 0x181   : > { %v2920_v55 = vsel %vm2918_vm2, %v2919_v21, %v5490_v22  ;;  %v2717_v42 = vand.u32 2147483647, %v6313_v62  ;;  %v4792_v37 = vadd.s32 4294967169, %v2721_v28  ;;  %v2673_v49 = vsel %vm2671_vm4, %v2672_v17, %v6338_v25 }
 0x182   : > { %v2917_v32 = vsel %vm2915_vm1, %v5488_v51, %v2916_v31  ;;  %v2998_v33 = vor.u32 %v2997_v29, %v2996_v35  ;;  %v3001_v23 = vshll.u32 %v3000_v38, 23  ;;  %v3010_v0 = vsel %vm2925_vm15, %v3009_v53, %v6282_v26 }
 0x183   : > { %v2921_v60 = vsel %vm2914_vm3, %v2917_v32, %v2920_v55  ;;  %v2674_v63 = vadd.s32 %v2673_v49, %v2669_v54  ;;  %v2727_v3 = vadd.s32 1, %v4792_v37  ;;  %vm6369_vm5 = vcmp.le.f32.partialorder %v2923_v34, 0.7853982 }
 0x184   : > { %v2922_v1 = vsel %vm2912_vm14, nan, %v2921_v60  ;;  %v3002_v4 = vor.u32 4788187, %v3001_v23  ;;  %v3005_v56 = vcvt.s32.f32 %v2998_v33  ;;  %v3012_v26 = vsel %vm6369_vm5, 0, %v3010_v0 }
 0x185   : > { %v3244_v2 = vadd.f32 1.0, %v2922_v1  ;;  %v2675_v24 = vadd.s32 536870912, %v2674_v63  ;;  %vm2728_vm6 = vcmp.gt.s32.totalorder %v2727_v3, 0  ;;  %v2724_v61 = vand.u32 8388607, %v2717_v42 }
 0x186   : > { %v3003_v5 = vand.u32 2147483647, %v3002_v4  ;;  %v2729_v8 = vsel %vm2728_vm6, %v2727_v3, 0  ;;  %v6379_v19 = vmul.f32 0.31415927, %v1560_v59  ;;  %v6381_v10 = vand.u32 3, %v3012_v26 }
 0x187   : > { %v3260_v6 = vmul.f32 0.5, %v3244_v2  ;;  %v6377_v7 = vshrl.u32 %v2675_v24, 30  ;;  %v2731_v9 = vand.u32 31, %v2729_v8  ;;  %v2725_v13 = vor.u32 8388608, %v2724_v61 }
 0x188   : > { %v3006_v34 = vmul.f32 %v3005_v56, %v3003_v5  ;;  %v2411_v44 = vand.u32 2139095040, %v6379_v19  ;;  %v2730_v22 = vshrl.u32 %v2729_v8, 5  ;;  %v2670_v24 = vadd.s32 %v6337_v50, %v6344_v18 }
 0x189   : > { %3326 = vperm.xlu0 %5445, %v3260_v6   ;;  %v2677_v58 = vshll.u32 %v6377_v7, 30  ;;  %v2732_v11 = vsub.s32 32, %v2731_v9  ;;  %v2734_v14 = vshll.u32 %v5725_v39, %v2731_v9  ;;  %v2737_v20 = vshll.u32 %v5726_v41, %v2731_v9 }
 0x18a   : > { %v3007_v12 = vxor.u32 2147483648, %v3006_v34  ;;  %v2740_v40 = vshll.u32 %v5727_v43, %v2731_v9  ;;  %v2743_v35 = vshll.u32 %v5728_v46, %v2731_v9  ;;  %v6403_v38 = vshll.u32 %v2725_v13, 8 }
 0x18b   : > { %v6386_v25 = vsub.s32 %v2674_v63, %v2677_v58  ;;  %v2735_v36 = vshrl.u32 %v5726_v41, %v2732_v11  ;;  %v2738_v51 = vshrl.u32 %v5727_v43, %v2732_v11  ;;  %v2741_v45 = vshrl.u32 %v5728_v46, %v2732_v11 }
 0x18c   : > { %v3008_v47 = vsel %vm2925_vm15, %v3007_v12, %v3006_v34  ;;  %v2733_v21 = vshrl.u32 %v5725_v39, %v2732_v11  ;;  %v2744_v28 = vshrl.u32 %v5729_v48, %v2732_v11  ;;  %v2746_v37 = vshll.u32 %v5729_v48, %v2731_v9 }
 0x18d   : > { %v3011_v52 = vsel %vm6369_vm5, %v5952_v27, %v3008_v47  ;;  %v2680_v53 = vsub.s32 0, %v6386_v25  ;;  %v2736_v54 = vor.u32 %v2735_v36, %v2734_v14  ;;  %v2739_v17 = vor.u32 %v2738_v51, %v2737_v20 }
 0x18e   : > { %5491 = vcosq.f32 %v3011_v52  ;;  %v2742_v29 = vor.u32 %v2741_v45, %v2740_v40  ;;  %v2745_v55 = vor.u32 %v2744_v28, %v2743_v35  ;;  %v2747_v32 = vshrl.u32 %v5730_v57, %v2732_v11 }
 0x18f   : > { %5493 = vsinq.f32 %v3011_v52  ;;  %v4789_v31 = vmin.u32 %v2680_v53, %v6386_v25  ;;  %v2412_v33 = vshrl.u32 %v2411_v44, 23  ;;  %vm2749_vm7 = vcmp.lt.s32.totalorder %v2730_v22, 1 }
 0x190   : > { %vm2750_vm8 = vcmp.lt.s32.totalorder %v2730_v22, 2  ;;  %vm2751_vm9 = vcmp.lt.s32.totalorder %v2730_v22, 3  ;;  %v2748_v49 = vor.u32 %v2747_v32, %v2746_v37  ;;  %vm2752_vm10 = vcmp.lt.s32.totalorder %v2730_v22, 4 }
 0x191   : > { %v2682_v23 = vclz %v4789_v31  ;;  %v2753_v60 = vsel %vm2749_vm7, %v2733_v21, %v2736_v54  ;;  %v2757_v0 = vsel %vm2749_vm7, %v2736_v54, %v2739_v17  ;;  %v2754_v3 = vsel %vm2752_vm10, %v2742_v29, 2102212464 }
 0x192   : > { %v2758_v1 = vsel %vm2752_vm10, %v2745_v55, 920167782  ;;  %v2761_v4 = vsel %vm2749_vm7, %v2739_v17, %v2742_v29  ;;  %v2755_v56 = vsel %vm2751_vm9, %v2739_v17, %v2754_v3  ;;  %v2762_v2 = vsel %vm2752_vm10, %v2748_v49, 1326507024 }
 0x193   : > { %v4790_v63 = vadd.s32 4294967294, %v2682_v23  ;;  %v2759_v59 = vsel %vm2751_vm9, %v2742_v29, %v2758_v1  ;;  %v4780_v15 = vadd.s32 4294967169, %v2412_v33  ;;  %v2763_v26 = vsel %vm2751_vm9, %v2745_v55, %v2762_v2 }
 0x194   : > { %v2760_v5 = vsel %vm2750_vm8, %v2757_v0, %v2759_v59  ;;  %vm3015_vm12 = vweird.f32 %v5952_v27  ;;  %v2764_v8 = vsel %vm2750_vm8, %v2761_v4, %v2763_v26  ;;  %v2756_v50 = vsel %vm2750_vm8, %v2753_v60, %v2755_v56 }
 0x195   : > { %vm4791_vm11 = vcmp.lt.s32.totalorder %v4790_v63, 0  ;;  %v6416_v6 = vmul.u32.u64.low %v6403_v38, %v2760_v5  ;;  %v6417_v9 = vmul.u32.u64.high %v6403_v38, %v2760_v5, %v6416_v6  ;;  %v2700_v18 = vsub.s32 4, %v6377_v7 }
 0x196   : > { %v2685_v61 = vsel %vm4791_vm11, 0, %v4790_v63  ;;  %v6424_v12 = vmul.u32.u64.low %v6403_v38, %v2764_v8  ;;  %v6425_v13 = vmul.u32.u64.high %v6403_v38, %v2764_v8, %v6424_v12  ;;  %v2418_v14 = vadd.s32 1, %v4780_v15 }
 0x197   : > { %v2686_v34 = vsub.s32 32, %v2685_v61  ;;  %v2687_v58 = vshll.u32 %v6386_v25, %v2685_v61  ;;  %v2690_v11 = vsub.s32 4294967266, %v2685_v61  ;;  %vm3017_vm13 = vcmp.lt.s32.totalorder %v6381_v10, 2 }
 0x198   : > { %vm2616_vm14 = vcmp.lt.s32.totalorder %v6183_v16, 0  ;;  %vm3021_vm15 = vcmp.eq.s32.totalorder %v6381_v10, 2  ;;  %v2772_v25 = vmul.u32 %v6403_v38, %v2756_v50  ;;  %v2775_v40 = vadd.s32 1, %v6417_v9 }
 0x199   : > { %v2688_v20 = vshrl.u32 %v2670_v24, %v2686_v34  ;;  %v2691_v36 = vadd.s32 127, %v2690_v11  ;;  %vm2419_vm0 = vcmp.gt.s32.totalorder %v2418_v14, 0  ;;  %v2408_v45 = vand.u32 2147483647, %v6379_v19 }
 0x19a   : > { %v2420_v35 = vsel %vm2419_vm0, %v2418_v14, 0  ;;  %vm3018_vm1 = vcmp.eq.s32.totalorder %v6381_v10, 0  ;;  %v2701_v22 = vsel %vm2616_vm14, %v2700_v18, %v6377_v7  ;;  %vm2774_vm2 = vc.u32 %v6425_v13, %v6416_v6  ;;  %v1561_v14 = vld [vmem:[%s5837_s27 + $0x48] sm:$0xff] }
 0x19b   : > { %v5492_v44 = vpop.eup %5491  ;;  %v2689_v47 = vor.u32 %v2688_v20, %v2687_v58  ;;  %v2692_v51 = vshll.u32 %v2691_v36, 23  ;;  %v2776_v28 = vsel %vm2774_vm2, %v2775_v40, %v6417_v9  ;;  %vm6444_vm3 = vcmp.le.f32.partialorder %v2614_v30, 0.7853982 }
 0x19c   : > { %v5494_v52 = vpop.eup %5493  ;;  %v3022_v53 = vxor.u32 2147483648, %v5492_v44  ;;  %v2777_v38 = vadd.s32 %v2776_v28, %v2772_v25  ;;  %v2422_v55 = vand.u32 31, %v2420_v35  ;;  %v2703_v32 = vsel %vm6444_vm3, 0, %v2701_v22 }
 0x19d   : > { %v3019_v21 = vxor.u32 2147483648, %v5494_v52  ;;  %v2693_v54 = vor.u32 4788187, %v2692_v51  ;;  %v2696_v17 = vcvt.s32.f32 %v2689_v47  ;;  %v2415_v33 = vand.u32 8388607, %v2408_v45 }
 0x19e   : > { %v3023_v31 = vsel %vm3021_vm15, %v3022_v53, %v5494_v52  ;;  %v2778_v49 = vadd.s32 536870912, %v2777_v38  ;;  %v6454_v60 = vshrl.u32 %v2420_v35, 5  ;;  %v2423_v30 = vsub.s32 32, %v2422_v55 }
 0x19f   : > { %v3020_v7 = vsel %vm3018_vm1, %v5492_v44, %v3019_v21  ;;  %v2694_v37 = vand.u32 2147483647, %v2693_v54  ;;  %v2425_v3 = vshll.u32 %v5725_v39, %v2422_v55  ;;  %v2428_v1 = vshll.u32 %v5726_v41, %v2422_v55  ;;  %v1558_v21 = vld [vmem:[%s5837_s27 + $0x30] sm:$0xff] }
 0x1a0   : > { %v3024_v23 = vsel %vm3017_vm13, %v3020_v7, %v3023_v31  ;;  %v6460_v56 = vshrl.u32 %v2778_v49, 30  ;;  %v2426_v59 = vshrl.u32 %v5726_v41, %v2423_v30  ;;  %v2431_v10 = vshll.u32 %v5727_v43, %v2422_v55 }
 0x1a1   : > { %v3025_v0 = vsel %vm3015_vm12, nan, %v3024_v23  ;;  %v2697_v63 = vmul.f32 %v2696_v17, %v2694_v37  ;;  %v2429_v15 = vshrl.u32 %v5727_v43, %v2423_v30  ;;  %v2432_v24 = vshrl.u32 %v5728_v46, %v2423_v30 }
 0x1a2   : > { %v3245_v4 = vadd.f32 1.0, %v3025_v0  ;;  %v2434_v27 = vshll.u32 %v5728_v46, %v2422_v55  ;;  %v2780_v26 = vshll.u32 %v6460_v56, 30  ;;  %v2416_v61 = vor.u32 8388608, %v2415_v33 }
 0x1a3   : > { %v2698_v2 = vxor.u32 2147483648, %v2697_v63  ;;  %vm2440_vm4 = vcmp.lt.s32.totalorder %v6454_v60, 1  ;;  %v2424_v9 = vshrl.u32 %v5725_v39, %v2423_v30  ;;  %v2427_v34 = vor.u32 %v2426_v59, %v2425_v3 }
 0x1a4   : > { %v3261_v5 = vmul.f32 0.5, %v3245_v4  ;;  %v2435_v58 = vshrl.u32 %v5729_v48, %v2423_v30  ;;  %v6476_v50 = vsub.s32 %v2777_v38, %v2780_v26  ;;  %v2430_v18 = vor.u32 %v2429_v15, %v2428_v1 }
 0x1a5   : > { %v2699_v8 = vsel %vm2616_vm14, %v2698_v2, %v2697_v63  ;;  %v2437_v12 = vshll.u32 %v5729_v48, %v2422_v55  ;;  %v2433_v20 = vor.u32 %v2432_v24, %v2431_v10  ;;  %v2438_v25 = vshrl.u32 %v5730_v57, %v2423_v30 }
 0x1a6   : > { %3331 = vperm.xlu1 %5446, %v3261_v5   ;;  %v2702_v11 = vsel %vm6444_vm3, %v6183_v16, %v2699_v8  ;;  %v2436_v36 = vor.u32 %v2435_v58, %v2434_v27  ;;  %v6481_v40 = vand.u32 3, %v2703_v32  ;;  %v2783_v44 = vsub.s32 0, %v6476_v50 }
 0x1a7   : > { %5495 = vcosq.f32 %v2702_v11  ;;  %vm2443_vm5 = vcmp.lt.s32.totalorder %v6454_v60, 4  ;;  %v2439_v47 = vor.u32 %v2438_v25, %v2437_v12  ;;  %vm2442_vm6 = vcmp.lt.s32.totalorder %v6454_v60, 3 }
 0x1a8   : > { %5497 = vsinq.f32 %v2702_v11  ;;  %v2445_v51 = vsel %vm2443_vm5, %v2433_v20, 2102212464  ;;  %v6486_v35 = vmul.f32 0.31415927, %v1561_v14  ;;  %v4793_v52 = vmin.u32 %v2783_v44, %v6476_v50 }
 0x1a9   : > { %vm2441_vm7 = vcmp.lt.s32.totalorder %v6454_v60, 2  ;;  %v2448_v53 = vsel %vm2440_vm4, %v2427_v34, %v2430_v18  ;;  %v2456_v22 = vshll.u32 %v2416_v61, 8  ;;  %v2444_v54 = vsel %vm2440_vm4, %v2424_v9, %v2427_v34 }
 0x1aa   : > { %v2449_v17 = vsel %vm2443_vm5, %v2436_v36, 920167782  ;;  %v2452_v28 = vsel %vm2440_vm4, %v2430_v18, %v2433_v20  ;;  %v2453_v31 = vsel %vm2443_vm5, %v2439_v47, 1326507024  ;;  %v2785_v29 = vclz %v4793_v52 }
 0x1ab   : > { %v2446_v38 = vsel %vm2442_vm6, %v2430_v18, %v2445_v51  ;;  %v2450_v55 = vsel %vm2442_vm6, %v2433_v20, %v2449_v17  ;;  %v2454_v7 = vsel %vm2442_vm6, %v2436_v36, %v2453_v31  ;;  %vm2719_vm8 = vcmp.lt.s32.totalorder %v6313_v62, 0 }
 0x1ac   : > { %v2451_v37 = vsel %vm2441_vm7, %v2448_v53, %v2450_v55  ;;  %v2455_v32 = vsel %vm2441_vm7, %v2452_v28, %v2454_v7  ;;  %v6502_v33 = vmul.f32 0.31415927, %v1558_v21  ;;  %vm2708_vm9 = vcmp.lt.s32.totalorder %v6481_v40, 2 }
 0x1ad   : > { %vm6507_vm10 = vcmp.le.f32.partialorder %v2717_v42, 0.7853982  ;;  %v4794_v49 = vadd.s32 4294967294, %v2785_v29  ;;  %v6511_v30 = vmul.u32.u64.low %v2456_v22, %v2455_v32  ;;  %v6512_v0 = vmul.u32.u64.high %v2456_v22, %v2455_v32, %v6511_v30 }
 0x1ae   : > { %vm2706_vm11 = vweird.f32 %v6183_v16  ;;  %v2447_v63 = vsel %vm2441_vm7, %v2444_v54, %v2446_v38  ;;  %v6517_v3 = vmul.u32.u64.low %v2456_v22, %v2451_v37  ;;  %v6518_v1 = vmul.u32.u64.high %v2456_v22, %v2451_v37, %v6517_v3 }
 0x1af   : > { %v2514_v4 = vand.u32 2139095040, %v6486_v35  ;;  %v2773_v42 = vadd.s32 %v6416_v6, %v6425_v13  ;;  %vm4795_vm12 = vcmp.lt.s32.totalorder %v4794_v49, 0  ;;  %v2803_v59 = vsub.s32 4, %v6460_v56 }
 0x1b0   : > { %v2511_v10 = vand.u32 2147483647, %v6486_v35  ;;  %vm2709_vm13 = vcmp.eq.s32.totalorder %v6481_v40, 0  ;;  %v2788_v2 = vsel %vm4795_vm12, 0, %v4794_v49  ;;  %v2205_v60 = vand.u32 2139095040, %v6502_v33 }
 0x1b1   : > { %v2515_v15 = vshrl.u32 %v2514_v4, 23  ;;  %v2789_v24 = vsub.s32 32, %v2788_v2  ;;  %v2790_v27 = vshll.u32 %v6476_v50, %v2788_v2  ;;  %v2793_v5 = vsub.s32 4294967266, %v2788_v2 }
 0x1b2   : > { %v2463_v26 = vmul.u32 %v2456_v22, %v2447_v63  ;;  %vm2712_vm14 = vcmp.eq.s32.totalorder %v6481_v40, 2  ;;  %vm2465_vm15 = vc.u32 %v6512_v0, %v6517_v3  ;;  %v2466_v6 = vadd.s32 1, %v6518_v1 }
 0x1b3   : > { %v4784_v13 = vadd.s32 4294967169, %v2515_v15  ;;  %v2791_v8 = vshrl.u32 %v2773_v42, %v2789_v24  ;;  %v2794_v9 = vadd.s32 127, %v2793_v5  ;;  %v2804_v34 = vsel %vm2719_vm8, %v2803_v59, %v6460_v56 }
 0x1b4   : > { %v5496_v61 = vpop.eup %5495  ;;  %v2518_v58 = vand.u32 8388607, %v2511_v10  ;;  %v2467_v18 = vsel %vm2465_vm15, %v2466_v6, %v6518_v1  ;;  %v2206_v14 = vshrl.u32 %v2205_v60, 23  ;;  %v2806_v51 = vsel %vm6507_vm10, 0, %v2804_v34 }
 0x1b5   : > { %v5498_v11 = vpop.eup %5497  ;;  %v2713_v50 = vxor.u32 2147483648, %v5496_v61  ;;  %v2521_v12 = vadd.s32 1, %v4784_v13  ;;  %v2792_v36 = vor.u32 %v2791_v8, %v2790_v27  ;;  %v2795_v25 = vshll.u32 %v2794_v9, 23 }
 0x1b6   : > { %v2710_v20 = vxor.u32 2147483648, %v5498_v11  ;;  %v2468_v44 = vadd.s32 %v2467_v18, %v2463_v26  ;;  %v2202_v56 = vand.u32 2147483647, %v6502_v33  ;;  %v2519_v17 = vor.u32 8388608, %v2518_v58 }
 0x1b7   : > { %v2714_v47 = vsel %vm2712_vm14, %v2713_v50, %v5498_v11  ;;  %vm2522_vm0 = vcmp.gt.s32.totalorder %v2521_v12, 0  ;;  %v2796_v53 = vor.u32 4788187, %v2795_v25  ;;  %v2799_v22 = vcvt.s32.f32 %v2792_v36 }
 0x1b8   : > { %v2711_v52 = vsel %vm2709_vm13, %v5496_v61, %v2710_v20  ;;  %v2469_v21 = vadd.s32 536870912, %v2468_v44  ;;  %v2523_v28 = vsel %vm2522_vm0, %v2521_v12, 0  ;;  %v4772_v31 = vadd.s32 4294967169, %v2206_v14 }
 0x1b9   : > { %v2715_v54 = vsel %vm2708_vm9, %v2711_v52, %v2714_v47  ;;  %v2797_v38 = vand.u32 2147483647, %v2796_v53  ;;  %v6550_v37 = vand.u32 3, %v2806_v51  ;;  %v2525_v32 = vand.u32 31, %v2523_v28 }
 0x1ba   : > { %v2716_v29 = vsel %vm2706_vm11, nan, %v2715_v54  ;;  %v6548_v55 = vshrl.u32 %v2469_v21, 30  ;;  %v6553_v30 = vadd.s32 %v6517_v3, %v6512_v0  ;;  %v6558_v63 = vand.u32 8388607, %v2202_v56 }
 0x1bb   : > { %v3242_v7 = vadd.f32 1.0, %v2716_v29  ;;  %v2800_v49 = vmul.f32 %v2799_v22, %v2797_v38  ;;  %v2526_v16 = vsub.s32 32, %v2525_v32  ;;  %v6560_v4 = vshll.u32 %v2519_v17, 8 }
 0x1bc   : > { %v2471_v40 = vshll.u32 %v6548_v55, 30  ;;  %v2212_v42 = vadd.s32 1, %v4772_v31  ;;  %v2528_v15 = vshll.u32 %v5725_v39, %v2525_v32  ;;  %v2531_v60 = vshll.u32 %v5726_v41, %v2525_v32 }
 0x1bd   : > { %v3258_v1 = vmul.f32 0.5, %v3242_v7  ;;  %v2801_v59 = vxor.u32 2147483648, %v2800_v49  ;;  %v2524_v0 = vshrl.u32 %v2523_v28, 5  ;;  %v2529_v3 = vshrl.u32 %v5726_v41, %v2526_v16 }
 0x1be   : > { %v6562_v2 = vsub.s32 %v2468_v44, %v2471_v40  ;;  %v2532_v24 = vshrl.u32 %v5727_v43, %v2526_v16  ;;  %v2534_v27 = vshll.u32 %v5727_v43, %v2525_v32  ;;  %v2535_v6 = vshrl.u32 %v5728_v46, %v2526_v16 }
 0x1bf   : > { %3316 = vperm.xlu0 %5445, %v3258_v1   ;;  %v2802_v5 = vsel %vm2719_vm8, %v2801_v59, %v2800_v49  ;;  %v2210_v13 = vor.u32 8388608, %v6558_v63  ;;  %v2527_v8 = vshrl.u32 %v5725_v39, %v2526_v16  ;;  %v2537_v9 = vshll.u32 %v5728_v46, %v2525_v32 }
 0x1c0   : > { %v2474_v26 = vsub.s32 0, %v6562_v2  ;;  %v2805_v61 = vsel %vm6507_vm10, %v6313_v62, %v2802_v5  ;;  %vm2213_vm1 = vcmp.gt.s32.totalorder %v2212_v42, 0  ;;  %v2530_v58 = vor.u32 %v2529_v3, %v2528_v15 }
 0x1c1   : > { %5499 = vcosq.f32 %v2805_v61  ;;  %v2533_v11 = vor.u32 %v2532_v24, %v2531_v60  ;;  %v2536_v50 = vor.u32 %v2535_v6, %v2534_v27  ;;  %v2538_v18 = vshrl.u32 %v5729_v48, %v2526_v16 }
 0x1c2   : > { %v4781_v34 = vmin.u32 %v2474_v26, %v6562_v2  ;;  %5501 = vsinq.f32 %v2805_v61  ;;  %vm2543_vm2 = vcmp.lt.s32.totalorder %v2524_v0, 1  ;;  %vm2410_vm3 = vcmp.lt.s32.totalorder %v6379_v19, 0 }
 0x1c3   : > { %v2540_v23 = vshll.u32 %v5729_v48, %v2525_v32  ;;  %v2541_v14 = vshrl.u32 %v5730_v57, %v2526_v16  ;;  %vm2544_vm4 = vcmp.lt.s32.totalorder %v2524_v0, 2  ;;  %v2539_v20 = vor.u32 %v2538_v18, %v2537_v9  ;;  %v1559_v16 = vld [vmem:[%s5837_s27 + $0x38] sm:$0xff] }
 0x1c4   : > { %v2476_v12 = vclz %v4781_v34  ;;  %vm2545_vm5 = vcmp.lt.s32.totalorder %v2524_v0, 3  ;;  %vm2546_vm6 = vcmp.lt.s32.totalorder %v2524_v0, 4  ;;  %v2547_v36 = vsel %vm2543_vm2, %v2527_v8, %v2530_v58 }
 0x1c5   : > { %v2542_v44 = vor.u32 %v2541_v14, %v2540_v23  ;;  %v2548_v47 = vsel %vm2546_vm6, %v2536_v50, 2102212464  ;;  %v2551_v51 = vsel %vm2543_vm2, %v2530_v58, %v2533_v11  ;;  %v2494_v52 = vsub.s32 4, %v6548_v55 }
 0x1c6   : > { %v4782_v25 = vadd.s32 4294967294, %v2476_v12  ;;  %v2549_v53 = vsel %vm2545_vm5, %v2533_v11, %v2548_v47  ;;  %v2552_v22 = vsel %vm2546_vm6, %v2539_v20, 920167782  ;;  %v2555_v21 = vsel %vm2543_vm2, %v2533_v11, %v2536_v50 }
 0x1c7   : > { %v2553_v54 = vsel %vm2545_vm5, %v2536_v50, %v2552_v22  ;;  %v2556_v17 = vsel %vm2546_vm6, %v2542_v44, 1326507024  ;;  %v2214_v28 = vsel %vm2213_vm1, %v2212_v42, 0  ;;  %v2550_v29 = vsel %vm2544_vm4, %v2547_v36, %v2549_v53 }
 0x1c8   : > { %vm4783_vm7 = vcmp.lt.s32.totalorder %v4782_v25, 0  ;;  %v2554_v38 = vsel %vm2544_vm4, %v2551_v51, %v2553_v54  ;;  %v2557_v7 = vsel %vm2545_vm5, %v2539_v20, %v2556_v17  ;;  %vm2809_vm8 = vweird.f32 %v6313_v62 }
 0x1c9   : > { %v2479_v31 = vsel %vm4783_vm7, 0, %v4782_v25  ;;  %v2558_v1 = vsel %vm2544_vm4, %v2555_v21, %v2557_v7  ;;  %v6603_v42 = vmul.u32.u64.low %v6560_v4, %v2554_v38  ;;  %v6604_v60 = vmul.u32.u64.high %v6560_v4, %v2554_v38, %v6603_v42 }
 0x1ca   : > { %v2480_v32 = vsub.s32 32, %v2479_v31  ;;  %v2481_v49 = vshll.u32 %v6562_v2, %v2479_v31  ;;  %v2484_v40 = vsub.s32 4294967266, %v2479_v31  ;;  %vm6609_vm9 = vcmp.le.f32.partialorder %v2408_v45, 0.7853982 }
 0x1cb   : > { %v6599_v59 = vmul.u32.u64.low %v6560_v4, %v2558_v1  ;;  %v6600_v15 = vmul.u32.u64.high %v6560_v4, %v2558_v1, %v6599_v59  ;;  %v2216_v24 = vand.u32 31, %v2214_v28  ;;  %vm2811_vm10 = vcmp.lt.s32.totalorder %v6550_v37, 2 }
 0x1cc   : > { %v2482_v2 = vshrl.u32 %v6553_v30, %v2480_v32  ;;  %v2485_v0 = vadd.s32 127, %v2484_v40  ;;  %vm2812_vm11 = vcmp.eq.s32.totalorder %v6550_v37, 0  ;;  %v6619_v27 = vsel %vm2410_vm3, %v2494_v52, %v6548_v55 }
 0x1cd   : > { %v6621_v5 = vmul.f32 0.31415927, %v1559_v16  ;;  %v2566_v6 = vmul.u32 %v6560_v4, %v2550_v29  ;;  %v2217_v61 = vsub.s32 32, %v2216_v24  ;;  %vm2815_vm12 = vcmp.eq.s32.totalorder %v6550_v37, 2 }
 0x1ce   : > { %v2483_v26 = vor.u32 %v2482_v2, %v2481_v49  ;;  %v2486_v45 = vshll.u32 %v2485_v0, 23  ;;  %v5500_v8 = vpop.eup %5499  ;;  %vm2568_vm13 = vc.u32 %v6600_v15, %v6603_v42  ;;  %v2569_v30 = vadd.s32 1, %v6604_v60 }
 0x1cf   : > { %v6630_v9 = vshll.u32 %v2210_v13, 8  ;;  %v5502_v55 = vpop.eup %5501  ;;  %v2816_v34 = vxor.u32 2147483648, %v5500_v8  ;;  %v2497_v4 = vsel %vm6609_vm9, 0, %v6619_v27  ;;  %v2219_v12 = vshll.u32 %v5725_v39, %v2216_v24 }
 0x1d0   : > { %v2487_v58 = vor.u32 4788187, %v2486_v45  ;;  %v2490_v11 = vcvt.s32.f32 %v2483_v26  ;;  %v2813_v50 = vxor.u32 2147483648, %v5502_v55  ;;  %v2570_v18 = vsel %vm2568_vm13, %v2569_v30, %v6604_v60 }
 0x1d1   : > { %v2222_v23 = vshll.u32 %v5726_v41, %v2216_v24  ;;  %v2817_v14 = vsel %vm2815_vm12, %v2816_v34, %v5502_v55  ;;  %v2571_v63 = vadd.s32 %v2570_v18, %v2566_v6  ;;  %v2220_v13 = vshrl.u32 %v5726_v41, %v2217_v61 }
 0x1d2   : > { %v2488_v20 = vand.u32 2147483647, %v2487_v58  ;;  %v2814_v36 = vsel %vm2812_vm11, %v5500_v8, %v2813_v50  ;;  %v2223_v25 = vshrl.u32 %v5727_v43, %v2217_v61  ;;  %v2225_v44 = vshll.u32 %v5727_v43, %v2216_v24 }
 0x1d3   : > { %v2226_v47 = vshrl.u32 %v5728_v46, %v2217_v61  ;;  %v2818_v51 = vsel %vm2811_vm10, %v2814_v36, %v2817_v14  ;;  %v2572_v53 = vadd.s32 536870912, %v2571_v63  ;;  %v2228_v22 = vshll.u32 %v5728_v46, %v2216_v24 }
 0x1d4   : > { %v2491_v52 = vmul.f32 %v2490_v11, %v2488_v20  ;;  %v2819_v21 = vsel %vm2809_vm8, nan, %v2818_v51  ;;  %v2215_v54 = vshrl.u32 %v2214_v28, 5  ;;  %v2229_v17 = vshrl.u32 %v5729_v48, %v2217_v61 }
 0x1d5   : > { %v2231_v31 = vshll.u32 %v5729_v48, %v2216_v24  ;;  %v3243_v29 = vadd.f32 1.0, %v2819_v21  ;;  %v6651_v7 = vshrl.u32 %v2572_v53, 30  ;;  %v2232_v32 = vshrl.u32 %v5730_v57, %v2217_v61 }
 0x1d6   : > { %v2492_v38 = vxor.u32 2147483648, %v2491_v52  ;;  %v2218_v37 = vshrl.u32 %v5725_v39, %v2217_v61  ;;  %v2221_v49 = vor.u32 %v2220_v13, %v2219_v12  ;;  %v2224_v40 = vor.u32 %v2223_v25, %v2222_v23 }
 0x1d7   : > { %v2227_v1 = vor.u32 %v2226_v47, %v2225_v44  ;;  %v3259_v16 = vmul.f32 0.5, %v3243_v29  ;;  %v2574_v28 = vshll.u32 %v6651_v7, 30  ;;  %v2230_v59 = vor.u32 %v2229_v17, %v2228_v22 }
 0x1d8   : > { %v2493_v62 = vsel %vm2410_vm3, %v2492_v38, %v2491_v52  ;;  %v2233_v2 = vor.u32 %v2232_v32, %v2231_v31  ;;  %vm2234_vm14 = vcmp.lt.s32.totalorder %v2215_v54, 1  ;;  %vm2237_vm15 = vcmp.lt.s32.totalorder %v2215_v54, 4 }
 0x1d9   : > { %v2496_v60 = vsel %vm6609_vm9, %v6379_v19, %v2493_v62  ;;  %3321 = vperm.xlu1 %5446, %v3259_v16   ;;  %v6661_v0 = vsub.s32 %v2571_v63, %v2574_v28  ;;  %vm2236_vm0 = vcmp.lt.s32.totalorder %v2215_v54, 3  ;;  %v2239_v24 = vsel %vm2237_vm15, %v2227_v1, 2102212464 }
 0x1da   : > { %5503 = vcosq.f32 %v2496_v60  ;;  %vm2235_vm1 = vcmp.lt.s32.totalorder %v2215_v54, 2  ;;  %v2238_v27 = vsel %vm2234_vm14, %v2218_v37, %v2221_v49  ;;  %v2308_v26 = vand.u32 2139095040, %v6621_v5 }
 0x1db   : > { %5505 = vsinq.f32 %v2496_v60  ;;  %v2577_v45 = vsub.s32 0, %v6661_v0  ;;  %v2240_v3 = vsel %vm2236_vm0, %v2224_v40, %v2239_v24  ;;  %v2242_v6 = vsel %vm2234_vm14, %v2221_v49, %v2224_v40 }
 0x1dc   : > { %v2243_v61 = vsel %vm2237_vm15, %v2230_v59, 920167782  ;;  %v2246_v30 = vsel %vm2234_vm14, %v2224_v40, %v2227_v1  ;;  %v2247_v55 = vsel %vm2237_vm15, %v2233_v2, 1326507024  ;;  %v2501_v34 = vand.u32 3, %v2497_v4 }
 0x1dd   : > { %v2244_v8 = vsel %vm2236_vm0, %v2227_v1, %v2243_v61  ;;  %v4785_v58 = vmin.u32 %v2577_v45, %v6661_v0  ;;  %v2241_v11 = vsel %vm2235_vm1, %v2238_v27, %v2240_v3  ;;  %v2248_v18 = vsel %vm2236_vm0, %v2230_v59, %v2247_v55  ;;  %v1556_v59 = vld [vmem:[%s5837_s27 + $0x20] sm:$0xff] }
 0x1de   : > { %v2245_v50 = vsel %vm2235_vm1, %v2242_v6, %v2244_v8  ;;  %v2309_v12 = vshrl.u32 %v2308_v26, 23  ;;  %v2249_v14 = vsel %vm2235_vm1, %v2246_v30, %v2248_v18  ;;  %vm2500_vm2 = vweird.f32 %v6379_v19 }
 0x1df   : > { %v2579_v23 = vclz %v4785_v58  ;;  %v6679_v20 = vmul.u32.u64.low %v6630_v9, %v2245_v50  ;;  %v6680_v63 = vmul.u32.u64.high %v6630_v9, %v2245_v50, %v6679_v20  ;;  %vm2502_vm3 = vcmp.lt.s32.totalorder %v2501_v34, 2 }
 0x1e0   : > { %v6683_v13 = vmul.u32.u64.low %v6630_v9, %v2249_v14  ;;  %v6684_v36 = vmul.u32.u64.high %v6630_v9, %v2249_v14, %v6683_v13  ;;  %v4776_v4 = vadd.s32 4294967169, %v2309_v12  ;;  %vm2513_vm4 = vcmp.lt.s32.totalorder %v6486_v35, 0 }
 0x1e1   : > { %v4786_v25 = vadd.s32 4294967294, %v2579_v23  ;;  %v2257_v44 = vmul.u32 %v6630_v9, %v2241_v11  ;;  %v2567_v51 = vadd.s32 %v6603_v42, %v6600_v15  ;;  %v2597_v52 = vsub.s32 4, %v6651_v7 }
 0x1e2   : > { %v2315_v47 = vadd.s32 1, %v4776_v4  ;;  %v2260_v53 = vadd.s32 1, %v6680_v63  ;;  %vm2259_vm6 = vc.u32 %v6684_v36, %v6679_v20  ;;  %v2305_v21 = vand.u32 2147483647, %v6621_v5 }
 0x1e3   : > { %vm4787_vm5 = vcmp.lt.s32.totalorder %v4786_v25, 0  ;;  %vm2503_vm8 = vcmp.eq.s32.totalorder %v2501_v34, 0  ;;  %vm2506_vm9 = vcmp.eq.s32.totalorder %v2501_v34, 2  ;;  %v6700_v40 = vsel %vm2513_vm4, %v2597_v52, %v6651_v7 }
 0x1e4   : > { %v2582_v22 = vsel %vm4787_vm5, 0, %v4786_v25  ;;  %vm2316_vm7 = vcmp.gt.s32.totalorder %v2315_v47, 0  ;;  %v2261_v9 = vsel %vm2259_vm6, %v2260_v53, %v6680_v63  ;;  %v2312_v62 = vand.u32 8388607, %v2305_v21 }
 0x1e5   : > { %v2583_v54 = vsub.s32 32, %v2582_v22  ;;  %v2584_v17 = vshll.u32 %v6661_v0, %v2582_v22  ;;  %v2587_v31 = vsub.s32 4294967266, %v2582_v22  ;;  %v2262_v15 = vadd.s32 %v2261_v9, %v2257_v44 }
 0x1e6   : > { %v2317_v42 = vsel %vm2316_vm7, %v2315_v47, 0  ;;  %vm6707_vm10 = vcmp.le.f32.partialorder %v2511_v10, 0.7853982  ;;  %v6718_v8 = vmul.f32 0.31415927, %v1556_v59  ;;  %v2313_v55 = vor.u32 8388608, %v2312_v62 }
 0x1e7   : > { %v5504_v29 = vpop.eup %5503  ;;  %v2585_v37 = vshrl.u32 %v2567_v51, %v2583_v54  ;;  %v2588_v49 = vadd.s32 127, %v2587_v31  ;;  %v2263_v16 = vadd.s32 536870912, %v2262_v15  ;;  %v2319_v28 = vand.u32 31, %v2317_v42 }
 0x1e8   : > { %v5506_v38 = vpop.eup %5505  ;;  %v2507_v32 = vxor.u32 2147483648, %v5504_v29  ;;  %v2600_v7 = vsel %vm6707_vm10, 0, %v6700_v40  ;;  %v2318_v58 = vshrl.u32 %v2317_v42, 5  ;;  %v2258_v18 = vadd.s32 %v6679_v20, %v6684_v36 }
 0x1e9   : > { %v2504_v1 = vxor.u32 2147483648, %v5506_v38  ;;  %v2586_v0 = vor.u32 %v2585_v37, %v2584_v17  ;;  %v2589_v24 = vshll.u32 %v2588_v49, 23  ;;  %v6715_v26 = vshrl.u32 %v2263_v16, 30 }
 0x1ea   : > { %v2508_v60 = vsel %vm2506_vm9, %v2507_v32, %v5506_v38  ;;  %v2320_v45 = vsub.s32 32, %v2319_v28  ;;  %v2322_v12 = vshll.u32 %v5725_v39, %v2319_v28  ;;  %v2325_v14 = vshll.u32 %v5726_v41, %v2319_v28 }
 0x1eb   : > { %v2505_v27 = vsel %vm2503_vm8, %v5504_v29, %v2504_v1  ;;  %v2590_v6 = vor.u32 4788187, %v2589_v24  ;;  %v2593_v61 = vcvt.s32.f32 %v2586_v0  ;;  %v2265_v30 = vshll.u32 %v6715_v26, 30 }
 0x1ec   : > { %v2509_v3 = vsel %vm2502_vm3, %v2505_v27, %v2508_v60  ;;  %v2323_v34 = vshrl.u32 %v5726_v41, %v2320_v45  ;;  %v2326_v63 = vshrl.u32 %v5727_v43, %v2320_v45  ;;  %v2328_v4 = vshll.u32 %v5727_v43, %v2319_v28 }
 0x1ed   : > { %v2510_v10 = vsel %vm2500_vm2, nan, %v2509_v3  ;;  %v2591_v50 = vand.u32 2147483647, %v2590_v6  ;;  %v6725_v23 = vsub.s32 %v2262_v15, %v2265_v30  ;;  %v2329_v25 = vshrl.u32 %v5728_v46, %v2320_v45 }
 0x1ee   : > { %v3240_v11 = vadd.f32 1.0, %v2510_v10  ;;  %vm2337_vm11 = vcmp.lt.s32.totalorder %v2318_v58, 1  ;;  %v6733_v20 = vshll.u32 %v2313_v55, 8  ;;  %v1999_v36 = vand.u32 2139095040, %v6718_v8 }
 0x1ef   : > { %v2594_v13 = vmul.f32 %v2593_v61, %v2591_v50  ;;  %v2268_v44 = vsub.s32 0, %v6725_v23  ;;  %v2331_v51 = vshll.u32 %v5728_v46, %v2319_v28  ;;  %v2332_v52 = vshrl.u32 %v5729_v48, %v2320_v45 }
 0x1f0   : > { %v3256_v19 = vmul.f32 0.5, %v3240_v11  ;;  %v2334_v53 = vshll.u32 %v5729_v48, %v2319_v28  ;;  %v2321_v54 = vshrl.u32 %v5725_v39, %v2320_v45  ;;  %v2324_v17 = vor.u32 %v2323_v34, %v2322_v12 }
 0x1f1   : > { %v2595_v47 = vxor.u32 2147483648, %v2594_v13  ;;  %v4773_v22 = vmin.u32 %v2268_v44, %v6725_v23  ;;  %v2327_v31 = vor.u32 %v2326_v63, %v2325_v14  ;;  %v2330_v29 = vor.u32 %v2329_v25, %v2328_v4 }
 0x1f2   : > { %3306 = vperm.xlu0 %5445, %v3256_v19   ;;  %v2333_v15 = vor.u32 %v2332_v52, %v2331_v51  ;;  %v2335_v42 = vshrl.u32 %v5730_v57, %v2320_v45  ;;  %vm2338_vm12 = vcmp.lt.s32.totalorder %v2318_v58, 2  ;;  %vm2340_vm13 = vcmp.lt.s32.totalorder %v2318_v58, 4  ;;  %v1557_v52 = vld [vmem:[%s5837_s27 + $0x28] sm:$0xff] }
 0x1f3   : > { %v2596_v9 = vsel %vm2513_vm4, %v2595_v47, %v2594_v13  ;;  %v2270_v32 = vclz %v4773_v22  ;;  %vm2339_vm14 = vcmp.lt.s32.totalorder %v2318_v58, 3  ;;  %v2342_v49 = vsel %vm2340_vm13, %v2330_v29, 2102212464 }
 0x1f4   : > { %v2599_v38 = vsel %vm6707_vm10, %v6486_v35, %v2596_v9  ;;  %v2336_v37 = vor.u32 %v2335_v42, %v2334_v53  ;;  %v2341_v16 = vsel %vm2337_vm11, %v2321_v54, %v2324_v17  ;;  %v2345_v62 = vsel %vm2337_vm11, %v2324_v17, %v2327_v31 }
 0x1f5   : > { %5507 = vcosq.f32 %v2599_v38  ;;  %v4774_v1 = vadd.s32 4294967294, %v2270_v32  ;;  %v2343_v28 = vsel %vm2339_vm14, %v2327_v31, %v2342_v49  ;;  %v2346_v59 = vsel %vm2340_vm13, %v2333_v15, 920167782 }
 0x1f6   : > { %5509 = vsinq.f32 %v2599_v38  ;;  %v2349_v60 = vsel %vm2337_vm11, %v2327_v31, %v2330_v29  ;;  %v2350_v0 = vsel %vm2340_vm13, %v2336_v37, 1326507024  ;;  %v2288_v24 = vsub.s32 4, %v6715_v26 }
 0x1f7   : > { %vm4775_vm15 = vcmp.lt.s32.totalorder %v4774_v1, 0  ;;  %v2347_v27 = vsel %vm2339_vm14, %v2330_v29, %v2346_v59  ;;  %v2351_v45 = vsel %vm2339_vm14, %v2333_v15, %v2350_v0  ;;  %v2000_v10 = vshrl.u32 %v1999_v36, 23 }
 0x1f8   : > { %v2273_v3 = vsel %vm4775_vm15, 0, %v4774_v1  ;;  %v2348_v6 = vsel %vm2338_vm12, %v2345_v62, %v2347_v27  ;;  %v2352_v61 = vsel %vm2338_vm12, %v2349_v60, %v2351_v45  ;;  %v2344_v50 = vsel %vm2338_vm12, %v2341_v16, %v2343_v28 }
 0x1f9   : > { %v2274_v30 = vsub.s32 32, %v2273_v3  ;;  %v2275_v55 = vshll.u32 %v6725_v23, %v2273_v3  ;;  %v2278_v11 = vsub.s32 4294967266, %v2273_v3  ;;  %vm2204_vm0 = vcmp.lt.s32.totalorder %v6502_v33, 0 }
 0x1fa   : > { %v6756_v12 = vmul.u32.u64.low %v6733_v20, %v2352_v61  ;;  %v6757_v34 = vmul.u32.u64.high %v6733_v20, %v2352_v61, %v6756_v12  ;;  %v6760_v14 = vmul.u32.u64.low %v6733_v20, %v2348_v6  ;;  %v6761_v63 = vmul.u32.u64.high %v6733_v20, %v2348_v6, %v6760_v14 }
 0x1fb   : > { %v2276_v19 = vshrl.u32 %v2258_v18, %v2274_v30  ;;  %v2279_v13 = vadd.s32 127, %v2278_v11  ;;  %v4764_v4 = vadd.s32 4294967169, %v2000_v10  ;;  %v2604_v58 = vand.u32 3, %v2600_v7 }
 0x1fc   : > { %v2289_v23 = vsel %vm2204_vm0, %v2288_v24, %v6715_v26  ;;  %v1996_v25 = vand.u32 2147483647, %v6718_v8  ;;  %v2360_v47 = vmul.u32 %v6733_v20, %v2344_v50  ;;  %vm2603_vm1 = vweird.f32 %v6486_v35 }
 0x1fd   : > { %v2277_v44 = vor.u32 %v2276_v19, %v2275_v55  ;;  %v2280_v36 = vshll.u32 %v2279_v13, 23  ;;  %v2006_v51 = vadd.s32 1, %v4764_v4  ;;  %vm6778_vm2 = vcmp.le.f32.partialorder %v2202_v56, 0.7853982 }
 0x1fe   : > { %vm2362_vm3 = vc.u32 %v6757_v34, %v6760_v14  ;;  %v2363_v40 = vadd.s32 1, %v6761_v63  ;;  %v2291_v18 = vsel %vm6778_vm2, 0, %v2289_v23  ;;  %v2003_v53 = vand.u32 8388607, %v1996_v25 }
 0x1ff   : > { %v2281_v7 = vor.u32 4788187, %v2280_v36  ;;  %v2284_v26 = vcvt.s32.f32 %v2277_v44  ;;  %vm2007_vm4 = vcmp.gt.s32.totalorder %v2006_v51, 0  ;;  %v6790_v22 = vmul.f32 0.31415927, %v1557_v52 }
 0x200   : > { %v2364_v20 = vsel %vm2362_vm3, %v2363_v40, %v6761_v63  ;;  %v2008_v56 = vsel %vm2007_vm4, %v2006_v51, 0  ;;  %vm2609_vm5 = vcmp.eq.s32.totalorder %v2604_v58, 2  ;;  %vm2605_vm6 = vcmp.lt.s32.totalorder %v2604_v58, 2 }
 0x201   : > { %v2282_v17 = vand.u32 2147483647, %v2281_v7  ;;  %v2365_v31 = vadd.s32 %v2364_v20, %v2360_v47  ;;  %v2010_v9 = vand.u32 31, %v2008_v56  ;;  %vm2606_vm7 = vcmp.eq.s32.totalorder %v2604_v58, 0 }
 0x202   : > { %v5508_v54 = vpop.eup %5507  ;;  %v6792_v42 = vand.u32 3, %v2291_v18  ;;  %v2004_v16 = vor.u32 8388608, %v2003_v53  ;;  %v2102_v28 = vand.u32 2139095040, %v6790_v22  ;;  %v2009_v12 = vshrl.u32 %v2008_v56, 5 }
 0x203   : > { %v5510_v29 = vpop.eup %5509  ;;  %v2610_v15 = vxor.u32 2147483648, %v5508_v54  ;;  %v2285_v32 = vmul.f32 %v2284_v26, %v2282_v17  ;;  %v2366_v37 = vadd.s32 536870912, %v2365_v31  ;;  %v2011_v49 = vsub.s32 32, %v2010_v9 }
 0x204   : > { %v2607_v38 = vxor.u32 2147483648, %v5510_v29  ;;  %v2013_v62 = vshll.u32 %v5725_v39, %v2010_v9  ;;  %v2016_v24 = vshll.u32 %v5726_v41, %v2010_v9  ;;  %v2019_v6 = vshll.u32 %v5727_v43, %v2010_v9 }
 0x205   : > { %v2611_v1 = vsel %vm2609_vm5, %v2610_v15, %v5510_v29  ;;  %v2286_v60 = vxor.u32 2147483648, %v2285_v32  ;;  %v6796_v0 = vshrl.u32 %v2366_v37, 30  ;;  %v2014_v45 = vshrl.u32 %v5726_v41, %v2011_v49 }
 0x206   : > { %v2608_v59 = vsel %vm2606_vm7, %v5508_v54, %v2607_v38  ;;  %v2017_v3 = vshrl.u32 %v5727_v43, %v2011_v49  ;;  %v2020_v55 = vshrl.u32 %v5728_v46, %v2011_v49  ;;  %v2103_v63 = vshrl.u32 %v2102_v28, 23 }
 0x207   : > { %v2612_v27 = vsel %vm2605_vm6, %v2608_v59, %v2611_v1  ;;  %v2287_v10 = vsel %vm2204_vm0, %v2286_v60, %v2285_v32  ;;  %v2368_v30 = vshll.u32 %v6796_v0, 30  ;;  %v2012_v35 = vshrl.u32 %v5725_v39, %v2011_v49 }
 0x208   : > { %v2613_v61 = vsel %vm2603_vm1, nan, %v2612_v27  ;;  %v2290_v50 = vsel %vm6778_vm2, %v6502_v33, %v2287_v10  ;;  %v2015_v13 = vor.u32 %v2014_v45, %v2013_v62  ;;  %v2018_v58 = vor.u32 %v2017_v3, %v2016_v24 }
 0x209   : > { %v3241_v11 = vadd.f32 1.0, %v2613_v61  ;;  %5511 = vcosq.f32 %v2290_v50  ;;  %v6812_v19 = vsub.s32 %v2365_v31, %v2368_v30  ;;  %v2022_v23 = vshll.u32 %v5728_v46, %v2010_v9 }
 0x20a   : > { %5513 = vsinq.f32 %v2290_v50  ;;  %v2021_v36 = vor.u32 %v2020_v55, %v2019_v6  ;;  %v2023_v47 = vshrl.u32 %v5729_v48, %v2011_v49  ;;  %v2025_v51 = vshll.u32 %v5729_v48, %v2010_v9 }
 0x20b   : > { %v3257_v4 = vmul.f32 0.5, %v3241_v11  ;;  %v2371_v44 = vsub.s32 0, %v6812_v19  ;;  %v2026_v52 = vshrl.u32 %v5730_v57, %v2011_v49  ;;  %vm2028_vm8 = vcmp.lt.s32.totalorder %v2009_v12, 1 }
 0x20c   : > { %v2099_v2 = vand.u32 2147483647, %v6790_v22  ;;  %v4768_v40 = vadd.s32 4294967169, %v2103_v63  ;;  %vm2029_vm9 = vcmp.lt.s32.totalorder %v2009_v12, 2  ;;  %vm2030_vm10 = vcmp.lt.s32.totalorder %v2009_v12, 3 }
 0x20d   : > { %3311 = vperm.xlu1 %5446, %v3257_v4   ;;  %v4777_v7 = vmin.u32 %v2371_v44, %v6812_v19  ;;  %v6822_v26 = vshll.u32 %v2004_v16, 8  ;;  %v2024_v18 = vor.u32 %v2023_v47, %v2022_v23  ;;  %v2027_v20 = vor.u32 %v2026_v52, %v2025_v51 }
 0x20e   : > { %vm2031_vm11 = vcmp.lt.s32.totalorder %v2009_v12, 4  ;;  %v2032_v53 = vsel %vm2028_vm8, %v2012_v35, %v2015_v13  ;;  %vm2297_vm12 = vcmp.eq.s32.totalorder %v6792_v42, 0  ;;  %v2036_v17 = vsel %vm2028_vm8, %v2015_v13, %v2018_v58 }
 0x20f   : > { %v2373_v56 = vclz %v4777_v7  ;;  %v2033_v54 = vsel %vm2031_vm11, %v2021_v36, 2102212464  ;;  %v2040_v31 = vsel %vm2028_vm8, %v2018_v58, %v2021_v36  ;;  %vm2296_vm13 = vcmp.lt.s32.totalorder %v6792_v42, 2 }
 0x210   : > { %v2034_v9 = vsel %vm2030_vm10, %v2018_v58, %v2033_v54  ;;  %v2037_v29 = vsel %vm2031_vm11, %v2024_v18, 920167782  ;;  %v2041_v15 = vsel %vm2031_vm11, %v2027_v20, 1326507024  ;;  %v2109_v38 = vadd.s32 1, %v4768_v40 }
 0x211   : > { %vm2294_vm14 = vweird.f32 %v6502_v33  ;;  %v2361_v32 = vadd.s32 %v6760_v14, %v6757_v34  ;;  %v4778_v37 = vadd.s32 4294967294, %v2373_v56  ;;  %v2038_v49 = vsel %vm2030_vm10, %v2021_v36, %v2037_v29 }
 0x212   : > { %v2042_v1 = vsel %vm2030_vm10, %v2024_v18, %v2041_v15  ;;  %v2035_v16 = vsel %vm2029_vm9, %v2032_v53, %v2034_v9  ;;  %v2039_v62 = vsel %vm2029_vm9, %v2036_v17, %v2038_v49  ;;  %vm2110_vm15 = vcmp.gt.s32.totalorder %v2109_v38, 0 }
 0x213   : > { %v2043_v28 = vsel %vm2029_vm9, %v2040_v31, %v2042_v1  ;;  %vm4779_vm0 = vcmp.lt.s32.totalorder %v4778_v37, 0  ;;  %v2111_v24 = vsel %vm2110_vm15, %v2109_v38, 0  ;;  %vm2300_vm1 = vcmp.eq.s32.totalorder %v6792_v42, 2 }
 0x214   : > { %v6836_v59 = vmul.u32.u64.low %v6822_v26, %v2043_v28  ;;  %v6837_v60 = vmul.u32.u64.high %v6822_v26, %v2043_v28, %v6836_v59  ;;  %v2376_v27 = vsel %vm4779_vm0, 0, %v4778_v37  ;;  %v6844_v45 = vshrl.u32 %v2111_v24, 5 }
 0x215   : > { %v6840_v34 = vmul.u32.u64.low %v6822_v26, %v2039_v62  ;;  %v6841_v14 = vmul.u32.u64.high %v6822_v26, %v2039_v62, %v6840_v34  ;;  %v2377_v3 = vsub.s32 32, %v2376_v27  ;;  %v2378_v6 = vshll.u32 %v6812_v19, %v2376_v27 }
 0x216   : > { %v2381_v61 = vsub.s32 4294967266, %v2376_v27  ;;  %v2113_v10 = vand.u32 31, %v2111_v24  ;;  %v5512_v30 = vpop.eup %5511  ;;  %v2391_v55 = vsub.s32 4, %v6796_v0  ;;  %v2051_v11 = vmul.u32 %v6822_v26, %v2035_v16  ;;  %v1554_v27 = vld [vmem:[%s5837_s27 + $0x10] sm:$0xff] }
 0x217   : > { %v6852_v50 = vand.u32 8388607, %v2099_v2  ;;  %v5514_v12 = vpop.eup %5513  ;;  %v2301_v63 = vxor.u32 2147483648, %v5512_v30  ;;  %v2379_v35 = vshrl.u32 %v2361_v32, %v2377_v3  ;;  %vm2131_vm2 = vcmp.lt.s32.totalorder %v6844_v45, 1 }
 0x218   : > { %v2382_v13 = vadd.s32 127, %v2381_v61  ;;  %v2298_v19 = vxor.u32 2147483648, %v5514_v12  ;;  %vm2307_vm3 = vcmp.lt.s32.totalorder %v6621_v5, 0  ;;  %vm2053_vm4 = vc.u32 %v6837_v60, %v6840_v34 }
 0x219   : > { %v2054_v4 = vadd.s32 1, %v6841_v14  ;;  %v2114_v58 = vsub.s32 32, %v2113_v10  ;;  %v2302_v23 = vsel %vm2300_vm1, %v2301_v63, %v5514_v12  ;;  %vm6861_vm5 = vcmp.le.f32.partialorder %v2305_v21, 0.7853982 }
 0x21a   : > { %v2380_v36 = vor.u32 %v2379_v35, %v2378_v6  ;;  %v2383_v47 = vshll.u32 %v2382_v13, 23  ;;  %v2116_v51 = vshll.u32 %v5725_v39, %v2113_v10  ;;  %v2299_v52 = vsel %vm2297_vm12, %v5512_v30, %v2298_v19 }
 0x21b   : > { %v2055_v40 = vsel %vm2053_vm4, %v2054_v4, %v6841_v14  ;;  %v2117_v7 = vshrl.u32 %v5726_v41, %v2114_v58  ;;  %vm2134_vm6 = vcmp.lt.s32.totalorder %v6844_v45, 4  ;;  %v2303_v26 = vsel %vm2296_vm13, %v2299_v52, %v2302_v23 }
 0x21c   : > { %v2384_v21 = vor.u32 4788187, %v2383_v47  ;;  %v2387_v18 = vcvt.s32.f32 %v2380_v36  ;;  %v2056_v20 = vadd.s32 %v2055_v40, %v2051_v11  ;;  %v2304_v53 = vsel %vm2294_vm14, nan, %v2303_v26 }
 0x21d   : > { %v2118_v56 = vor.u32 %v2117_v7, %v2116_v51  ;;  %v2119_v54 = vshll.u32 %v5726_v41, %v2113_v10  ;;  %v2120_v17 = vshrl.u32 %v5727_v43, %v2114_v58  ;;  %v3238_v31 = vadd.f32 1.0, %v2304_v53 }
 0x21e   : > { %v2385_v9 = vand.u32 2147483647, %v2384_v21  ;;  %v2057_v29 = vadd.s32 536870912, %v2056_v20  ;;  %v2122_v15 = vshll.u32 %v5727_v43, %v2113_v10  ;;  %v2123_v42 = vshrl.u32 %v5728_v46, %v2114_v58  ;;  %v1555_v21 = vld [vmem:[%s5837_s27 + $0x18] sm:$0xff] }
 0x21f   : > { %v2121_v38 = vor.u32 %v2120_v17, %v2119_v54  ;;  %v2125_v32 = vshll.u32 %v5728_v46, %v2113_v10  ;;  %v2126_v37 = vshrl.u32 %v5729_v48, %v2114_v58  ;;  %v3254_v33 = vmul.f32 0.5, %v3238_v31 }
 0x220   : > { %v2388_v49 = vmul.f32 %v2387_v18, %v2385_v9  ;;  %v2058_v1 = vshrl.u32 %v2057_v29, 30  ;;  %v2128_v16 = vshll.u32 %v5729_v48, %v2113_v10  ;;  %v2115_v62 = vshrl.u32 %v5725_v39, %v2114_v58 }
 0x221   : > { %v2124_v28 = vor.u32 %v2123_v42, %v2122_v15  ;;  %v2127_v59 = vor.u32 %v2126_v37, %v2125_v32  ;;  %v2129_v24 = vshrl.u32 %v5730_v57, %v2114_v58  ;;  %3296 = vperm.xlu0 %5445, %v3254_v33   ;;  %v2107_v6 = vor.u32 8388608, %v6852_v50 }
 0x222   : > { %v2389_v14 = vxor.u32 2147483648, %v2388_v49  ;;  %v2059_v3 = vshll.u32 %v2058_v1, 30  ;;  %vm2133_vm7 = vcmp.lt.s32.totalorder %v6844_v45, 3  ;;  %vm2132_vm8 = vcmp.lt.s32.totalorder %v6844_v45, 2 }
 0x223   : > { %v2130_v61 = vor.u32 %v2129_v24, %v2128_v16  ;;  %v2139_v10 = vsel %vm2131_vm2, %v2118_v56, %v2121_v38  ;;  %v2140_v30 = vsel %vm2134_vm6, %v2127_v59, 920167782  ;;  %v2136_v63 = vsel %vm2134_vm6, %v2124_v28, 2102212464 }
 0x224   : > { %v2390_v11 = vsel %vm2307_vm3, %v2389_v14, %v2388_v49  ;;  %v6894_v12 = vsub.s32 %v2056_v20, %v2059_v3  ;;  %v6898_v50 = vmul.f32 0.31415927, %v1554_v27  ;;  %v2392_v35 = vsel %vm2307_vm3, %v2391_v55, %v6796_v0 }
 0x225   : > { %v2393_v13 = vsel %vm6861_vm5, %v6621_v5, %v2390_v11  ;;  %v2135_v19 = vsel %vm2131_vm2, %v2115_v62, %v2118_v56  ;;  %v2141_v4 = vsel %vm2133_vm7, %v2124_v28, %v2140_v30  ;;  %v2143_v0 = vsel %vm2131_vm2, %v2121_v38, %v2124_v28 }
 0x226   : > { %5515 = vcosq.f32 %v2393_v13  ;;  %v2062_v58 = vsub.s32 0, %v6894_v12  ;;  %v2142_v23 = vsel %vm2132_vm8, %v2139_v10, %v2141_v4  ;;  %v2137_v55 = vsel %vm2133_vm7, %v2121_v38, %v2136_v63 }
 0x227   : > { %5517 = vsinq.f32 %v2393_v13  ;;  %v2144_v36 = vsel %vm2134_vm6, %v2130_v61, 1326507024  ;;  %v2147_v47 = vshll.u32 %v2107_v6, 8  ;;  %v2394_v51 = vsel %vm6861_vm5, 0, %v2392_v35 }
 0x228   : > { %v4765_v52 = vmin.u32 %v2062_v58, %v6894_v12  ;;  %v2145_v40 = vsel %vm2133_vm7, %v2127_v59, %v2144_v36  ;;  %v2138_v20 = vsel %vm2132_vm8, %v2135_v19, %v2137_v55  ;;  %v1793_v44 = vand.u32 2139095040, %v6898_v50 }
 0x229   : > { %v6924_v7 = vmul.u32.u64.low %v2147_v47, %v2142_v23  ;;  %v6925_v26 = vmul.u32.u64.high %v2147_v47, %v2142_v23, %v6924_v7  ;;  %v2146_v53 = vsel %vm2132_vm8, %v2143_v0, %v2145_v40  ;;  %v2398_v56 = vand.u32 3, %v2394_v51 }
 0x22a   : > { %v2064_v18 = vclz %v4765_v52  ;;  %v2082_v54 = vsub.s32 4, %v2058_v1  ;;  %v6934_v17 = vmul.u32.u64.low %v2147_v47, %v2146_v53  ;;  %v6935_v31 = vmul.u32.u64.high %v2147_v47, %v2146_v53, %v6934_v17 }
 0x22b   : > { %v1794_v29 = vshrl.u32 %v1793_v44, 23  ;;  %v6937_v15 = vmul.f32 0.31415927, %v1555_v21  ;;  %vm6941_vm9 = vcmp.le.f32.partialorder %v1996_v25, 0.7853982  ;;  %vm1998_vm10 = vcmp.lt.s32.totalorder %v6718_v8, 0 }
 0x22c   : > { %v4766_v9 = vadd.s32 4294967294, %v2064_v18  ;;  %v2154_v45 = vmul.u32 %v2147_v47, %v2138_v20  ;;  %v2157_v42 = vadd.s32 1, %v6925_v26  ;;  %vm2397_vm11 = vweird.f32 %v6621_v5 }
 0x22d   : > { %v2052_v32 = vadd.s32 %v6840_v34, %v6837_v60  ;;  %v1790_v37 = vand.u32 2147483647, %v6898_v50  ;;  %v4756_v33 = vadd.s32 4294967169, %v1794_v29  ;;  %vm2399_vm13 = vcmp.lt.s32.totalorder %v2398_v56, 2 }
 0x22e   : > { %vm4767_vm12 = vcmp.lt.s32.totalorder %v4766_v9, 0  ;;  %v2083_v25 = vsel %vm1998_vm10, %v2082_v54, %v2058_v1  ;;  %vm2156_vm14 = vc.u32 %v6935_v31, %v6924_v7  ;;  %vm2400_vm15 = vcmp.eq.s32.totalorder %v2398_v56, 0 }
 0x22f   : > { %v2067_v49 = vsel %vm4767_vm12, 0, %v4766_v9  ;;  %v2158_v59 = vsel %vm2156_vm14, %v2157_v42, %v6925_v26  ;;  %v1800_v34 = vadd.s32 1, %v4756_v33  ;;  %v1896_v24 = vand.u32 2139095040, %v6937_v15 }
 0x230   : > { %v2068_v16 = vsub.s32 32, %v2067_v49  ;;  %v2069_v62 = vshll.u32 %v6894_v12, %v2067_v49  ;;  %v2072_v28 = vsub.s32 4294967266, %v2067_v49  ;;  %v2159_v60 = vadd.s32 %v2158_v59, %v2154_v45 }
 0x231   : > { %vm2403_vm0 = vcmp.eq.s32.totalorder %v2398_v56, 2  ;;  %v2085_v1 = vsel %vm6941_vm9, 0, %v2083_v25  ;;  %v1797_v61 = vand.u32 8388607, %v1790_v37  ;;  %vm1801_vm1 = vcmp.gt.s32.totalorder %v1800_v34, 0 }
 0x232   : > { %v2070_v27 = vshrl.u32 %v2052_v32, %v2068_v16  ;;  %v2073_v14 = vadd.s32 127, %v2072_v28  ;;  %v2160_v6 = vadd.s32 536870912, %v2159_v60  ;;  %v1893_v10 = vand.u32 2147483647, %v6937_v15 }
 0x233   : > { %v5516_v3 = vpop.eup %5515  ;;  %v1802_v35 = vsel %vm1801_vm1, %v1800_v34, 0  ;;  %v1897_v58 = vshrl.u32 %v1896_v24, 23  ;;  %v6966_v36 = vand.u32 3, %v2085_v1  ;;  %v1798_v52 = vor.u32 8388608, %v1797_v61 }
 0x234   : > { %v5518_v30 = vpop.eup %5517  ;;  %v2404_v11 = vxor.u32 2147483648, %v5516_v3  ;;  %v2071_v12 = vor.u32 %v2070_v27, %v2069_v62  ;;  %v2074_v63 = vshll.u32 %v2073_v14, 23  ;;  %v6963_v19 = vshrl.u32 %v2160_v6, 30 }
 0x235   : > { %v2401_v13 = vxor.u32 2147483648, %v5518_v30  ;;  %v1804_v4 = vand.u32 31, %v1802_v35  ;;  %v2155_v18 = vadd.s32 %v6924_v7, %v6935_v31  ;;  %v6975_v20 = vand.u32 8388607, %v1893_v10 }
 0x236   : > { %v2405_v23 = vsel %vm2403_vm0, %v2404_v11, %v5518_v30  ;;  %v2075_v0 = vor.u32 4788187, %v2074_v63  ;;  %v2078_v55 = vcvt.s32.f32 %v2071_v12  ;;  %v2162_v51 = vshll.u32 %v6963_v19, 30 }
 0x237   : > { %v2402_v47 = vsel %vm2400_vm15, %v5516_v3, %v2401_v13  ;;  %v1805_v40 = vsub.s32 32, %v1804_v4  ;;  %v1807_v54 = vshll.u32 %v5725_v39, %v1804_v4  ;;  %v4760_v17 = vadd.s32 4294967169, %v1897_v58 }
 0x238   : > { %v2406_v26 = vsel %vm2399_vm13, %v2402_v47, %v2405_v23  ;;  %v2076_v21 = vand.u32 2147483647, %v2075_v0  ;;  %v6979_v44 = vsub.s32 %v2159_v60, %v2162_v51  ;;  %v1810_v45 = vshll.u32 %v5726_v41, %v1804_v4 }
 0x239   : > { %v2407_v53 = vsel %vm2397_vm11, nan, %v2406_v26  ;;  %v1808_v56 = vshrl.u32 %v5726_v41, %v1805_v40  ;;  %v1811_v31 = vshrl.u32 %v5727_v43, %v1805_v40  ;;  %v1813_v42 = vshll.u32 %v5727_v43, %v1804_v4 }
 0x23a   : > { %v3239_v9 = vadd.f32 1.0, %v2407_v53  ;;  %v2079_v29 = vmul.f32 %v2078_v55, %v2076_v21  ;;  %v2165_v7 = vsub.s32 0, %v6979_v44  ;;  %v6987_v32 = vshll.u32 %v1798_v52, 8 }
 0x23b   : > { %v1803_v49 = vshrl.u32 %v1802_v35, 5  ;;  %v1814_v25 = vshrl.u32 %v5728_v46, %v1805_v40  ;;  %v1806_v62 = vshrl.u32 %v5725_v39, %v1805_v40  ;;  %v1809_v28 = vor.u32 %v1808_v56, %v1807_v54 }
 0x23c   : > { %v3255_v5 = vmul.f32 0.5, %v3239_v9  ;;  %v2080_v33 = vxor.u32 2147483648, %v2079_v29  ;;  %v4769_v16 = vmin.u32 %v2165_v7, %v6979_v44  ;;  %v1903_v59 = vadd.s32 1, %v4760_v17 }
 0x23d   : > { %v1812_v34 = vor.u32 %v1811_v31, %v1810_v45  ;;  %v1815_v24 = vor.u32 %v1814_v25, %v1813_v42  ;;  %v1816_v27 = vshll.u32 %v5728_v46, %v1804_v4  ;;  %v1817_v3 = vshrl.u32 %v5729_v48, %v1805_v40 }
 0x23e   : > { %3301 = vperm.xlu1 %5446, %v3255_v5   ;;  %v2081_v60 = vsel %vm1998_vm10, %v2080_v33, %v2079_v29  ;;  %v2167_v1 = vclz %v4769_v16  ;;  %v1819_v6 = vshll.u32 %v5729_v48, %v1804_v4  ;;  %v1820_v61 = vshrl.u32 %v5730_v57, %v1805_v40  ;;  %v1552_v33 = vld [vmem:[%s5837_s27] sm:$0xff] }
 0x23f   : > { %v2084_v14 = vsel %vm6941_vm9, %v6718_v8, %v2081_v60  ;;  %vm1822_vm2 = vcmp.lt.s32.totalorder %v1803_v49, 1  ;;  %vm1823_vm3 = vcmp.lt.s32.totalorder %v1803_v49, 2  ;;  %vm2101_vm4 = vcmp.lt.s32.totalorder %v6790_v22, 0 }
 0x240   : > { %5519 = vcosq.f32 %v2084_v14  ;;  %v4770_v30 = vadd.s32 4294967294, %v2167_v1  ;;  %v1818_v11 = vor.u32 %v1817_v3, %v1816_v27  ;;  %vm1824_vm5 = vcmp.lt.s32.totalorder %v1803_v49, 3 }
 0x241   : > { %5521 = vsinq.f32 %v2084_v14  ;;  %v1821_v12 = vor.u32 %v1820_v61, %v1819_v6  ;;  %vm1825_vm6 = vcmp.lt.s32.totalorder %v1803_v49, 4  ;;  %v1826_v38 = vsel %vm1822_vm2, %v1806_v62, %v1809_v28 }
 0x242   : > { %v1830_v63 = vsel %vm1822_vm2, %v1809_v28, %v1812_v34  ;;  %vm4771_vm7 = vcmp.lt.s32.totalorder %v4770_v30, 0  ;;  %v1827_v35 = vsel %vm1825_vm6, %v1815_v24, 2102212464  ;;  %v1831_v13 = vsel %vm1825_vm6, %v1818_v11, 920167782 }
 0x243   : > { %v1834_v58 = vsel %vm1822_vm2, %v1812_v34, %v1815_v24  ;;  %v2170_v4 = vsel %vm4771_vm7, 0, %v4770_v30  ;;  %v1828_v23 = vsel %vm1824_vm5, %v1812_v34, %v1827_v35  ;;  %v1832_v0 = vsel %vm1824_vm5, %v1815_v24, %v1831_v13 }
 0x244   : > { %v1835_v55 = vsel %vm1825_vm6, %v1821_v12, 1326507024  ;;  %v2171_v47 = vsub.s32 32, %v2170_v4  ;;  %v2172_v51 = vshll.u32 %v6979_v44, %v2170_v4  ;;  %v2175_v52 = vsub.s32 4294967266, %v2170_v4 }
 0x245   : > { %v2185_v40 = vsub.s32 4, %v6963_v19  ;;  %v1829_v26 = vsel %vm1823_vm3, %v1826_v38, %v1828_v23  ;;  %v1833_v21 = vsel %vm1823_vm3, %v1830_v63, %v1832_v0  ;;  %v1836_v53 = vsel %vm1824_vm5, %v1818_v11, %v1835_v55  ;;  %v5463_v55 = vld [vmem:[#allocation2 + $0x38] sm:$0xff]  }
 0x246   : > { %vm1904_vm8 = vcmp.gt.s32.totalorder %v1903_v59, 0  ;;  %v2173_v54 = vshrl.u32 %v2155_v18, %v2171_v47  ;;  %v2176_v17 = vadd.s32 127, %v2175_v52  ;;  %v1837_v9 = vsel %vm1823_vm3, %v1834_v58, %v1836_v53  ;;  %v5464_v47 = vld [vmem:[#allocation2 + $0x30] sm:$0xff]   ;;  %5195 = vmatprep.subr.bf16.mxu0 %v5463_v55 }
 0x247   : > { %v1905_v29 = vsel %vm1904_vm8, %v1903_v59, 0  ;;  %vm2088_vm9 = vweird.f32 %v6718_v8  ;;  %v7012_v44 = vmul.u32.u64.low %v6987_v32, %v1837_v9  ;;  %v7013_v56 = vmul.u32.u64.high %v6987_v32, %v1837_v9, %v7012_v44  ;;  %5196 = vmatpush3.bf16.msra.mxu0 %v5463_v55 }
 0x248   : > { %v7016_v45 = vmul.u32.u64.low %v6987_v32, %v1833_v21  ;;  %v7017_v7 = vmul.u32.u64.high %v6987_v32, %v1833_v21, %v7016_v45  ;;  %vm7022_vm10 = vcmp.le.f32.partialorder %v2099_v2, 0.7853982  ;;  %v2174_v18 = vor.u32 %v2173_v54, %v2172_v51  ;;  %5197 = vmatprep.subr.bf16.mxu0 %v5464_v47 }
 0x249   : > { %v2177_v42 = vshll.u32 %v2176_v17, 23  ;;  %v1907_v5 = vand.u32 31, %v1905_v29  ;;  %vm2090_vm11 = vcmp.lt.s32.totalorder %v6966_v36, 2  ;;  %vm2091_vm12 = vcmp.eq.s32.totalorder %v6966_v36, 0 }
 0x24a   : > { %vm2094_vm13 = vcmp.eq.s32.totalorder %v6966_v36, 2  ;;  %v7033_v49 = vsel %vm2101_vm4, %v2185_v40, %v6963_v19  ;;  %v2181_v2 = vcvt.s32.f32 %v2174_v18  ;;  %v1845_v16 = vmul.u32 %v6987_v32, %v1829_v26  ;;  %v5465_v18 = vld [vmem:[#allocation2 + $0x28] sm:$0xff]  }
 0x24b   : > { %v2178_v25 = vor.u32 4788187, %v2177_v42  ;;  %v1908_v62 = vsub.s32 32, %v1907_v5  ;;  %vm1847_vm14 = vc.u32 %v7013_v56, %v7016_v45  ;;  %v1848_v28 = vadd.s32 1, %v7017_v7  ;;  %5198 = vmatpush3.bf16.msra.mxu0 %v5464_v47 }
 0x24c   : > { %v1901_v59 = vor.u32 8388608, %v6975_v20  ;;  %v7040_v60 = vmul.f32 0.31415927, %v1552_v33  ;;  %v2188_v19 = vsel %vm7022_vm10, 0, %v7033_v49  ;;  %v7045_v27 = vshrl.u32 %v1905_v29, 5  ;;  %5199 = vmatprep.subr.bf16.mxu0 %v5465_v18 }
 0x24d   : > { %v5520_v34 = vpop.eup %5519  ;;  %v2179_v24 = vand.u32 2147483647, %v2178_v25  ;;  %v1910_v32 = vshll.u32 %v5725_v39, %v1907_v5  ;;  %v1849_v3 = vsel %vm1847_vm14, %v1848_v28, %v7017_v7  ;;  %v1911_v6 = vshrl.u32 %v5726_v41, %v1908_v62 }
 0x24e   : > { %v5522_v14 = vpop.eup %5521  ;;  %v2095_v1 = vxor.u32 2147483648, %v5520_v34  ;;  %v1913_v20 = vshll.u32 %v5726_v41, %v1907_v5  ;;  %v1850_v11 = vadd.s32 %v1849_v3, %v1845_v16  ;;  %v1914_v12 = vshrl.u32 %v5727_v43, %v1908_v62 }
 0x24f   : > { %v2092_v61 = vxor.u32 2147483648, %v5522_v14  ;;  %v2182_v30 = vmul.f32 %v2181_v2, %v2179_v24  ;;  %v1916_v63 = vshll.u32 %v5727_v43, %v1907_v5  ;;  %v1917_v35 = vshrl.u32 %v5728_v46, %v1908_v62  ;;  %5200 = vmatpush3.bf16.msra.mxu0 %v5465_v18 }
 0x250   : > { %v2096_v38 = vsel %vm2094_vm13, %v2095_v1, %v5522_v14  ;;  %v1919_v13 = vshll.u32 %v5728_v46, %v1907_v5  ;;  %v1851_v23 = vadd.s32 536870912, %v1850_v11  ;;  %v1920_v0 = vshrl.u32 %v5729_v48, %v1908_v62 }
 0x251   : > { %v2093_v58 = vsel %vm2091_vm12, %v5520_v34, %v2092_v61  ;;  %v2183_v4 = vxor.u32 2147483648, %v2182_v30  ;;  %v1912_v52 = vor.u32 %v1911_v6, %v1910_v32  ;;  %v1922_v40 = vshll.u32 %v5729_v48, %v1907_v5  ;;  %v5466_v34 = vld [vmem:[#allocation2 + $0x20] sm:$0xff]  }
 0x252   : > { %v2097_v51 = vsel %vm2090_vm11, %v2093_v58, %v2096_v38  ;;  %v1923_v26 = vshrl.u32 %v5730_v57, %v1908_v62  ;;  %v1852_v54 = vshrl.u32 %v1851_v23, 30  ;;  %v1915_v17 = vor.u32 %v1914_v12, %v1913_v20  ;;  %v1553_v12 = vld [vmem:[%s5837_s27 + $0x8] sm:$0xff]  ;;  %5201 = vmatprep.subr.bf16.mxu0 %v5466_v34 }
 0x253   : > { %v2098_v21 = vsel %vm2088_vm9, nan, %v2097_v51  ;;  %v2184_v53 = vsel %vm2101_vm4, %v2183_v4, %v2182_v30  ;;  %v1921_v29 = vor.u32 %v1920_v0, %v1919_v13  ;;  %vm1925_vm15 = vcmp.lt.s32.totalorder %v7045_v27, 1  ;;  %v5467_v13 = vld [vmem:[#allocation2 + $0x18] sm:$0xff]   ;;  %5202 = vmatpush3.bf16.msra.mxu0 %v5466_v34 }
 0x254   : > { %v3236_v9 = vadd.f32 1.0, %v2098_v21  ;;  %v2187_v36 = vsel %vm7022_vm10, %v6790_v22, %v2184_v53  ;;  %v1853_v44 = vshll.u32 %v1852_v54, 30  ;;  %v1918_v7 = vor.u32 %v1917_v35, %v1916_v63  ;;  %5203 = vmatprep.subr.bf16.mxu0 %v5467_v13  ;;  %v5468_v21 = vld [vmem:[#allocation2 + $0x10] sm:$0xff]  }
 0x255   : > { %5523 = vcosq.f32 %v2187_v36  ;;  %v1924_v8 = vor.u32 %v1923_v26, %v1922_v40  ;;  %vm1927_vm0 = vcmp.lt.s32.totalorder %v7045_v27, 3  ;;  %vm1928_vm1 = vcmp.lt.s32.totalorder %v7045_v27, 4 }
 0x256   : > { %v3252_v42 = vmul.f32 0.5, %v3236_v9  ;;  %5525 = vsinq.f32 %v2187_v36  ;;  %v7074_v5 = vsub.s32 %v1850_v11, %v1853_v44  ;;  %v1909_v31 = vshrl.u32 %v5725_v39, %v1908_v62 }
 0x257   : > { %vm1926_vm2 = vcmp.lt.s32.totalorder %v7045_v27, 2  ;;  %v1933_v33 = vsel %vm1925_vm15, %v1912_v52, %v1915_v17  ;;  %v1930_v49 = vsel %vm1928_vm1, %v1918_v7, 2102212464  ;;  %v1934_v25 = vsel %vm1928_vm1, %v1921_v29, 920167782  ;;  %5204 = vmatpush3.bf16.msra.mxu0 %v5467_v13 }
 0x258   : > { %3286 = vperm.xlu0 %5445, %v3252_v42   ;;  %v7084_v2 = vshll.u32 %v1901_v59, 8  ;;  %v1587_v16 = vand.u32 2139095040, %v7040_v60  ;;  %v1856_v62 = vsub.s32 0, %v7074_v5  ;;  %v1935_v28 = vsel %vm1927_vm0, %v1918_v7, %v1934_v25  ;;  %5205 = vmatprep.subr.bf16.mxu0 %v5468_v21  ;;  %v5469_v25 = vld [vmem:[#allocation2 + $0x8] sm:$0xff]  }
 0x259   : > { %v7090_v24 = vand.u32 3, %v2188_v19  ;;  %v1936_v32 = vsel %vm1926_vm2, %v1933_v33, %v1935_v28  ;;  %v1937_v59 = vsel %vm1925_vm15, %v1915_v17, %v1918_v7  ;;  %v1938_v14 = vsel %vm1928_vm1, %v1924_v8, 1326507024 }
 0x25a   : > { %v4757_v1 = vmin.u32 %v1856_v62, %v7074_v5  ;;  %v1876_v3 = vsub.s32 4, %v1852_v54  ;;  %v1929_v6 = vsel %vm1925_vm15, %v1909_v31, %v1912_v52  ;;  %v1931_v20 = vsel %vm1927_vm0, %v1915_v17, %v1930_v49 }
 0x25b   : > { %v1939_v19 = vsel %vm1927_vm0, %v1921_v29, %v1938_v14  ;;  %v7106_v61 = vmul.u32.u64.low %v7084_v2, %v1936_v32  ;;  %v7107_v30 = vmul.u32.u64.high %v7084_v2, %v1936_v32, %v7106_v61  ;;  %v1588_v11 = vshrl.u32 %v1587_v16, 23  ;;  %5206 = vmatpush3.bf16.msra.mxu0 %v5468_v21 }
 0x25c   : > { %vm2191_vm3 = vweird.f32 %v6790_v22  ;;  %vm7114_vm4 = vcmp.le.f32.partialorder %v1790_v37, 0.7853982  ;;  %vm1792_vm5 = vcmp.lt.s32.totalorder %v6898_v50, 0  ;;  %v1858_v63 = vclz %v4757_v1  ;;  %5207 = vmatprep.subr.bf16.mxu0 %v5469_v25  ;;  %v5470_v22 = vld [vmem:[#allocation2] sm:$0xff]  }
 0x25d   : > { %v1940_v35 = vsel %vm1926_vm2, %v1937_v59, %v1939_v19  ;;  %v1932_v58 = vsel %vm1926_vm2, %v1929_v6, %v1931_v20  ;;  %v4748_v0 = vadd.s32 4294967169, %v1588_v11  ;;  %vm2193_vm6 = vcmp.lt.s32.totalorder %v7090_v24, 2 }
 0x25e   : > { %v7124_v4 = vmul.u32.u64.low %v7084_v2, %v1940_v35  ;;  %v7125_v23 = vmul.u32.u64.high %v7084_v2, %v1940_v35, %v7124_v4  ;;  %v4758_v37 = vadd.s32 4294967294, %v1858_v63  ;;  %v1877_v55 = vsel %vm1792_vm5, %v1876_v3, %v1852_v54 }
 0x25f   : > { %v7130_v47 = vmul.f32 0.31415927, %v1553_v12  ;;  %vm2194_vm7 = vcmp.eq.s32.totalorder %v7090_v24, 0  ;;  %v1951_v51 = vadd.s32 1, %v7107_v30  ;;  %v1584_v27 = vand.u32 2147483647, %v7040_v60  ;;  %5208 = vmatpush3.bf16.msra.mxu0 %v5469_v25 }
 0x260   : > { %v1594_v52 = vadd.s32 1, %v4748_v0  ;;  %vm2197_vm8 = vcmp.eq.s32.totalorder %v7090_v24, 2  ;;  %v1846_v40 = vadd.s32 %v7016_v45, %v7013_v56  ;;  %vm4759_vm9 = vcmp.lt.s32.totalorder %v4758_v37, 0  ;;  %5209 = vmatprep.subr.bf16.mxu0 %v5470_v22 }
 0x261   : > { %v1948_v26 = vmul.u32 %v7084_v2, %v1932_v58  ;;  %v1861_v54 = vsel %vm4759_vm9, 0, %v4758_v37  ;;  %v1879_v17 = vsel %vm7114_vm4, 0, %v1877_v55  ;;  %vm1950_vm10 = vc.u32 %v7125_v23, %v7106_v61 }
 0x262   : > { %v5524_v53 = vpop.eup %5523  ;;  %vm1595_vm11 = vcmp.gt.s32.totalorder %v1594_v52, 0  ;;  %v1862_v29 = vsub.s32 32, %v1861_v54  ;;  %v1863_v44 = vshll.u32 %v7074_v5, %v1861_v54  ;;  %v1866_v56 = vsub.s32 4294967266, %v1861_v54 }
 0x263   : > { %v5526_v9 = vpop.eup %5525  ;;  %v2198_v36 = vxor.u32 2147483648, %v5524_v53  ;;  %v1952_v7 = vsel %vm1950_vm10, %v1951_v51, %v7107_v30  ;;  %v1591_v8 = vand.u32 8388607, %v1584_v27  ;;  %v1596_v18 = vsel %vm1595_vm11, %v1594_v52, 0  ;;  %5210 = vmatpush3.bf16.msra.mxu0 %v5470_v22 }
 0x264   : > { %v2195_v45 = vxor.u32 2147483648, %v5526_v9  ;;  %v1864_v31 = vshrl.u32 %v1846_v40, %v1862_v29  ;;  %v1867_v33 = vadd.s32 127, %v1866_v56  ;;  %v1953_v49 = vadd.s32 %v1952_v7, %v1948_v26  ;;  %v5471_v40 = vld [vmem:[%s8537_s7 + $0x38] sm:$0xff]  }
 0x265   : > { %v2199_v42 = vsel %vm2197_vm8, %v2198_v36, %v5526_v9  ;;  %v7151_v2 = vand.u32 3, %v1879_v17  ;;  %v1598_v16 = vand.u32 31, %v1596_v18  ;;  %v1690_v62 = vand.u32 2139095040, %v7130_v47  ;;  %5163 = vmatprep.subr.bf16.mxu1 %v5471_v40 }
 0x266   : > { %v2196_v5 = vsel %vm2194_vm7, %v5524_v53, %v2195_v45  ;;  %v1865_v34 = vor.u32 %v1864_v31, %v1863_v44  ;;  %v1868_v32 = vshll.u32 %v1867_v33, 23  ;;  %v1954_v59 = vadd.s32 536870912, %v1953_v49  ;;  %5164 = vmatpush3.bf16.msra.mxu1 %v5471_v40 }
 0x267   : > { %v2200_v28 = vsel %vm2193_vm6, %v2196_v5, %v2199_v42  ;;  %v1592_v1 = vor.u32 8388608, %v1591_v8  ;;  %v1599_v3 = vsub.s32 32, %v1598_v16  ;;  %v1687_v6 = vand.u32 2147483647, %v7130_v47 }
 0x268   : > { %v2201_v14 = vsel %vm2191_vm3, nan, %v2200_v28  ;;  %v1869_v19 = vor.u32 4788187, %v1868_v32  ;;  %v1872_v30 = vcvt.s32.f32 %v1865_v34  ;;  %v7159_v11 = vshrl.u32 %v1954_v59, 30 }
 0x269   : > { %v3237_v20 = vadd.f32 1.0, %v2201_v14  ;;  %v1601_v24 = vshll.u32 %v5725_v39, %v1598_v16  ;;  %v1602_v12 = vshrl.u32 %v5726_v41, %v1599_v3  ;;  %v1604_v63 = vshll.u32 %v5726_v41, %v1598_v16 }
 0x26a   : > { %v1691_v35 = vshrl.u32 %v1690_v62, 23  ;;  %v1870_v58 = vand.u32 2147483647, %v1869_v19  ;;  %v1956_v4 = vshll.u32 %v7159_v11, 30  ;;  %v1605_v0 = vshrl.u32 %v5727_v43, %v1599_v3 }
 0x26b   : > { %v3253_v13 = vmul.f32 0.5, %v3237_v20  ;;  %v1597_v37 = vshrl.u32 %v1596_v18, 5  ;;  %v1607_v55 = vshll.u32 %v5727_v43, %v1598_v16  ;;  %v1608_v51 = vshrl.u32 %v5728_v46, %v1599_v3 }
 0x26c   : > { %v1610_v52 = vshll.u32 %v5728_v46, %v1598_v16  ;;  %v1873_v26 = vmul.f32 %v1872_v30, %v1870_v58  ;;  %v7172_v21 = vsub.s32 %v1953_v49, %v1956_v4  ;;  %v1611_v53 = vshrl.u32 %v5729_v48, %v1599_v3 }
 0x26d   : > { %3291 = vperm.xlu1 %5446, %v3253_v13   ;;  %v7177_v54 = vand.u32 8388607, %v1687_v6  ;;  %v1600_v17 = vshrl.u32 %v5725_v39, %v1599_v3  ;;  %v1613_v9 = vshll.u32 %v5729_v48, %v1598_v16  ;;  %v1614_v36 = vshrl.u32 %v5730_v57, %v1599_v3 }
 0x26e   : > { %v7182_v29 = vshll.u32 %v1592_v1, 8  ;;  %v1874_v44 = vxor.u32 2147483648, %v1873_v26  ;;  %v1959_v56 = vsub.s32 0, %v7172_v21  ;;  %v1603_v45 = vor.u32 %v1602_v12, %v1601_v24  ;;  %v5472_v12 = vld [vmem:[%s8537_s7 + $0x30] sm:$0xff]  }
 0x26f   : > { %v1606_v7 = vor.u32 %v1605_v0, %v1604_v63  ;;  %v1609_v8 = vor.u32 %v1608_v51, %v1607_v55  ;;  %v1612_v18 = vor.u32 %v1611_v53, %v1610_v52  ;;  %vm1616_vm12 = vcmp.lt.s32.totalorder %v1597_v37, 1  ;;  %5165 = vmatprep.subr.bf16.mxu1 %v5472_v12 }
 0x270   : > { %v4752_v42 = vadd.s32 4294967169, %v1691_v35  ;;  %v1875_v31 = vsel %vm1792_vm5, %v1874_v44, %v1873_v26  ;;  %v4761_v33 = vmin.u32 %v1959_v56, %v7172_v21  ;;  %v1615_v49 = vor.u32 %v1614_v36, %v1613_v9  ;;  %v5473_v35 = vld [vmem:[%s8537_s7 + $0x28] sm:$0xff]   ;;  %5166 = vmatpush3.bf16.msra.mxu1 %v5472_v12  ;;  %v5474_v26 = vld [vmem:[%s8537_s7 + $0x20] sm:$0xff]  }
 0x271   : > { %vm1617_vm13 = vcmp.lt.s32.totalorder %v1597_v37, 2  ;;  %v1878_v25 = vsel %vm7114_vm4, %v6898_v50, %v1875_v31  ;;  %vm1618_vm14 = vcmp.lt.s32.totalorder %v1597_v37, 3  ;;  %vm1619_vm15 = vcmp.lt.s32.totalorder %v1597_v37, 4  ;;  %5167 = vmatprep.subr.bf16.mxu1 %v5473_v35 }
 0x272   : > { %v1620_v5 = vsel %vm1616_vm12, %v1600_v17, %v1603_v45  ;;  %5527 = vcosq.f32 %v1878_v25  ;;  %v1961_v16 = vclz %v4761_v33  ;;  %v1621_v62 = vsel %vm1619_vm15, %v1609_v8, 2102212464 }
 0x273   : > { %v1624_v28 = vsel %vm1616_vm12, %v1603_v45, %v1606_v7  ;;  %5529 = vsinq.f32 %v1878_v25  ;;  %v1622_v34 = vsel %vm1618_vm14, %v1606_v7, %v1621_v62  ;;  %v1625_v32 = vsel %vm1619_vm15, %v1612_v18, 920167782 }
 0x274   : > { %v1628_v59 = vsel %vm1616_vm12, %v1606_v7, %v1609_v8  ;;  %v1949_v14 = vadd.s32 %v7106_v61, %v7125_v23  ;;  %v4762_v38 = vadd.s32 4294967294, %v1961_v16  ;;  %v1626_v1 = vsel %vm1618_vm14, %v1609_v8, %v1625_v32  ;;  %5168 = vmatpush3.bf16.msra.mxu1 %v5473_v35 }
 0x275   : > { %v1629_v3 = vsel %vm1619_vm15, %v1615_v49, 1326507024  ;;  %v1623_v20 = vsel %vm1617_vm13, %v1620_v5, %v1622_v34  ;;  %v1627_v19 = vsel %vm1617_vm13, %v1624_v28, %v1626_v1  ;;  %v1697_v24 = vadd.s32 1, %v4752_v42  ;;  %5169 = vmatprep.subr.bf16.mxu1 %v5474_v26 }
 0x276   : > { %v1630_v30 = vsel %vm1618_vm14, %v1612_v18, %v1629_v3  ;;  %vm4763_vm0 = vcmp.lt.s32.totalorder %v4762_v38, 0  ;;  %v7206_v61 = vmul.u32.u64.low %v7182_v29, %v1627_v19  ;;  %v7207_v23 = vmul.u32.u64.high %v7182_v29, %v1627_v19, %v7206_v61 }
 0x277   : > { %v1631_v63 = vsel %vm1617_vm13, %v1628_v59, %v1630_v30  ;;  %v1964_v22 = vsel %vm4763_vm0, 0, %v4762_v38  ;;  %vm1698_vm1 = vcmp.gt.s32.totalorder %v1697_v24, 0  ;;  %v1979_v51 = vsub.s32 4, %v7159_v11 }
 0x278   : > { %v7214_v13 = vmul.u32.u64.low %v7182_v29, %v1631_v63  ;;  %v7215_v58 = vmul.u32.u64.high %v7182_v29, %v1631_v63, %v7214_v13  ;;  %v1965_v4 = vsub.s32 32, %v1964_v22  ;;  %v1966_v0 = vshll.u32 %v7172_v21, %v1964_v22  ;;  %5170 = vmatpush3.bf16.msra.mxu1 %v5474_v26 }
 0x279   : > { %v1969_v37 = vsub.s32 4294967266, %v1964_v22  ;;  %v1699_v55 = vsel %vm1698_vm1, %v1697_v24, 0  ;;  %v1639_v52 = vmul.u32 %v7182_v29, %v1623_v20  ;;  %vm1882_vm2 = vweird.f32 %v6898_v50  ;;  %v7329_v29 = vld [vmem:[%s8536_s6] ss:$0 sm:$0xff] }
 0x27a   : > { %v1701_v40 = vand.u32 31, %v1699_v55  ;;  %v1967_v53 = vshrl.u32 %v1949_v14, %v1965_v4  ;;  %v1642_v9 = vadd.s32 1, %v7207_v23  ;;  %v1695_v21 = vor.u32 8388608, %v7177_v54 }
 0x27b   : > { %v1970_v17 = vadd.s32 127, %v1969_v37  ;;  %vm1884_vm3 = vcmp.lt.s32.totalorder %v7151_v2, 2  ;;  %vm1895_vm4 = vcmp.lt.s32.totalorder %v6937_v15, 0  ;;  %vm1641_vm5 = vc.u32 %v7215_v58, %v7206_v61 }
 0x27c   : > { %v1702_v36 = vsub.s32 32, %v1701_v40  ;;  %vm1885_vm6 = vcmp.eq.s32.totalorder %v7151_v2, 0  ;;  %vm7233_vm7 = vcmp.le.f32.partialorder %v1893_v10, 0.7853982  ;;  %v1968_v44 = vor.u32 %v1967_v53, %v1966_v0  ;;  %v5475_v10 = vld [vmem:[%s8537_s7 + $0x18] sm:$0xff]  }
 0x27d   : > { %v1971_v56 = vshll.u32 %v1970_v17, 23  ;;  %v1643_v54 = vsel %vm1641_vm5, %v1642_v9, %v7207_v23  ;;  %vm1888_vm8 = vcmp.eq.s32.totalorder %v7151_v2, 2  ;;  %v7242_v45 = vsel %vm1895_vm4, %v1979_v51, %v7159_v11  ;;  %5171 = vmatprep.subr.bf16.mxu1 %v5475_v10 }
 0x27e   : > { %v1644_v7 = vadd.s32 %v1643_v54, %v1639_v52  ;;  %v7244_v8 = vshrl.u32 %v1699_v55, 5  ;;  %v1975_v42 = vcvt.s32.f32 %v1968_v44  ;;  %v1704_v31 = vshll.u32 %v5725_v39, %v1701_v40  ;;  %5172 = vmatpush3.bf16.msra.mxu1 %v5475_v10  ;;  %v5149_v55 = vpop.f32.mrf.mxu0 }
 0x27f   : > { %v1972_v18 = vor.u32 4788187, %v1971_v56  ;;  %v7250_v33 = vshll.u32 %v1695_v21, 8  ;;  %v5528_v49 = vpop.eup %5527  ;;  %v1705_v5 = vshrl.u32 %v5726_v41, %v1702_v36  ;;  %v1707_v11 = vshll.u32 %v5726_v41, %v1701_v40  ;;  %v5476_v41 = vld [vmem:[%s8537_s7 + $0x10] sm:$0xff]  }
 0x280   : > { %v1645_v25 = vadd.s32 536870912, %v1644_v7  ;;  %v1708_v16 = vshrl.u32 %v5727_v43, %v1702_v36  ;;  %v5530_v62 = vpop.eup %5529  ;;  %v1889_v28 = vxor.u32 2147483648, %v5528_v49  ;;  %v1710_v32 = vshll.u32 %v5727_v43, %v1701_v40  ;;  %5173 = vmatprep.subr.bf16.mxu1 %v5476_v41  ;;  %v7304_v44 = vpop.f32.mrf.mxu0 }
 0x281   : > { %v1973_v34 = vand.u32 2147483647, %v1972_v18  ;;  %v1711_v59 = vshrl.u32 %v5728_v46, %v1702_v36  ;;  %v1886_v14 = vxor.u32 2147483648, %v5530_v62  ;;  %v1713_v1 = vshll.u32 %v5728_v46, %v1701_v40 }
 0x282   : > { %v7257_v38 = vshrl.u32 %v1645_v25, 30  ;;  %v1714_v3 = vshrl.u32 %v5729_v48, %v1702_v36  ;;  %v1890_v20 = vsel %vm1888_vm8, %v1889_v28, %v5530_v62  ;;  %v1716_v43 = vshll.u32 %v5729_v48, %v1701_v40  ;;  %5174 = vmatpush3.bf16.msra.mxu1 %v5476_v41  ;;  %v5150_v62 = vpop.f32.mrf.mxu0 }
 0x283   : > { %v1976_v19 = vmul.f32 %v1975_v42, %v1973_v34  ;;  %v1717_v30 = vshrl.u32 %v5730_v57, %v1702_v36  ;;  %v1887_v24 = vsel %vm1885_vm6, %v5528_v49, %v1886_v14  ;;  %v1703_v12 = vshrl.u32 %v5725_v39, %v1702_v36  ;;  %v5477_v39 = vld [vmem:[%s8537_s7 + $0x8] sm:$0xff]  }
 0x284   : > { %v1647_v46 = vshll.u32 %v7257_v38, 30  ;;  %v1706_v63 = vor.u32 %v1705_v5, %v1704_v31  ;;  %v1891_v23 = vsel %vm1884_vm3, %v1887_v24, %v1890_v20  ;;  %v1709_v22 = vor.u32 %v1708_v16, %v1707_v11  ;;  %5175 = vmatprep.subr.bf16.mxu1 %v5477_v39  ;;  %v7345_v20 = vpop.f32.mrf.mxu0 }
 0x285   : > { %v1977_v35 = vxor.u32 2147483648, %v1976_v19  ;;  %v1712_v13 = vor.u32 %v1711_v59, %v1710_v32  ;;  %v1892_v48 = vsel %vm1882_vm2, nan, %v1891_v23  ;;  %v1715_v57 = vor.u32 %v1714_v3, %v1713_v1 }
 0x286   : > { %v7276_v4 = vsub.s32 %v1644_v7, %v1647_v46  ;;  %vm1719_vm9 = vcmp.lt.s32.totalorder %v7244_v8, 1  ;;  %v3234_v0 = vadd.f32 1.0, %v1892_v48  ;;  %v1718_v37 = vor.u32 %v1717_v30, %v1716_v43  ;;  %5176 = vmatpush3.bf16.msra.mxu1 %v5477_v39 }
 0x287   : > { %v1978_v2 = vsel %vm1895_vm4, %v1977_v35, %v1976_v19  ;;  %vm1722_vm10 = vcmp.lt.s32.totalorder %v7244_v8, 4  ;;  %vm1720_vm11 = vcmp.lt.s32.totalorder %v7244_v8, 2  ;;  %vm1721_vm12 = vcmp.lt.s32.totalorder %v7244_v8, 3 }
 0x288   : > { %v1981_v50 = vsel %vm7233_vm7, %v6937_v15, %v1978_v2  ;;  %v1650_v51 = vsub.s32 0, %v7276_v4  ;;  %v1724_v52 = vsel %vm1722_vm10, %v1712_v13, 2102212464  ;;  %v3250_v40 = vmul.f32 0.5, %v3234_v0 }
 0x289   : > { %5531 = vcosq.f32 %v1981_v50  ;;  %v1723_v26 = vsel %vm1719_vm9, %v1703_v12, %v1706_v63  ;;  %v1725_v17 = vsel %vm1721_vm12, %v1709_v22, %v1724_v52  ;;  %v1727_v9 = vsel %vm1719_vm9, %v1706_v63, %v1709_v22 }
 0x28a   : > { %5533 = vsinq.f32 %v1981_v50  ;;  %v4749_v53 = vmin.u32 %v1650_v51, %v7276_v4  ;;  %3276 = vperm.xlu0 %5445, %v3250_v40   ;;  %v1728_v21 = vsel %vm1722_vm10, %v1715_v57, 920167782  ;;  %v1731_v36 = vsel %vm1719_vm9, %v1709_v22, %v1712_v13  ;;  %v5153_v22 = vpop.f32.mrf.mxu0 }
 0x28b   : > { %v1729_v54 = vsel %vm1721_vm12, %v1712_v13, %v1728_v21  ;;  %v1732_v7 = vsel %vm1722_vm10, %v1718_v37, 1326507024  ;;  %v1982_v10 = vsel %vm7233_vm7, 0, %v7242_v45  ;;  %v1726_v18 = vsel %vm1720_vm11, %v1723_v26, %v1725_v17 }
 0x28c   : > { %v1652_v56 = vclz %v4749_v53  ;;  %v1730_v42 = vsel %vm1720_vm11, %v1727_v9, %v1729_v54  ;;  %v1733_v31 = vsel %vm1721_vm12, %v1715_v57, %v1732_v7  ;;  %v1640_v28 = vadd.s32 %v7206_v61, %v7215_v58  ;;  %v1025_v52 = vpop.f32.mrf.mxu0 }
 0x28d   : > { %v1734_v25 = vsel %vm1720_vm11, %v1731_v36, %v1733_v31  ;;  %v7322_v5 = vmul.u32.u64.low %v7250_v33, %v1730_v42  ;;  %v7323_v11 = vmul.u32.u64.high %v7250_v33, %v1730_v42, %v7322_v5  ;;  %v1986_v8 = vand.u32 3, %v1982_v10 }
 0x28e   : > { %v4750_v49 = vadd.s32 4294967294, %v1652_v56  ;;  %v7332_v45 = vmul.u32.u64.low %v7250_v33, %v1734_v25  ;;  %v7333_v16 = vmul.u32.u64.high %v7250_v33, %v1734_v25, %v7332_v45  ;;  %v1742_v32 = vmul.u32 %v7250_v33, %v1726_v18  ;;  %v5154_v18 = vpop.f32.mrf.mxu0 }
 0x28f   : > { %v7339_v59 = vadd.f32 %v5149_v55, %v7329_v29  ;;  %v1745_v41 = vadd.s32 1, %v7323_v11  ;;  %vm1991_vm15 = vcmp.eq.s32.totalorder %v1986_v8, 2  ;;  %vm1988_vm0 = vcmp.eq.s32.totalorder %v1986_v8, 0 }
 0x290   : > { %vm4751_vm13 = vcmp.lt.s32.totalorder %v4750_v49, 0  ;;  %vm1744_vm14 = vc.u32 %v7333_v16, %v7322_v5  ;;  %v7350_v35 = vadd.f32 %v5150_v62, %v7329_v29  ;;  %vm1987_vm1 = vcmp.lt.s32.totalorder %v1986_v8, 2 }
 0x291   : > { %v1655_v34 = vsel %vm4751_vm13, 0, %v4750_v49  ;;  %v1746_v19 = vsel %vm1744_vm14, %v1745_v41, %v7323_v11  ;;  %v1122_v33 = vand.u32 2147483647, %v7339_v59  ;;  %vm1985_vm2 = vweird.f32 %v6937_v15  ;;  %v7373_v49 = vpop.permute.xlu0 %3379  ;;  %v7378_v11 = vpop.permute.xlu1 %3385 }
 0x292   : > { %v1656_v14 = vsub.s32 32, %v1655_v34  ;;  %v1657_v1 = vshll.u32 %v7276_v4, %v1655_v34  ;;  %v1660_v3 = vsub.s32 4294967266, %v1655_v34  ;;  %v1747_v43 = vadd.s32 %v1746_v19, %v1742_v32  ;;  %v1028_v34 = vpop.f32.mrf.mxu0 }
 0x293   : > { %v1138_v0 = vsub.f32 0.0, %v1122_v33  ;;  %v1123_v51 = vand.u32 2147483647, %v7350_v35  ;;  %vm1586_vm3 = vcmp.lt.s32.totalorder %v7040_v60, 0  ;;  %vm7360_vm4 = vcmp.le.f32.partialorder %v1584_v27, 0.7853982 }
 0x294   : > { %v1658_v61 = vshrl.u32 %v1640_v28, %v1656_v14  ;;  %v1661_v58 = vadd.s32 127, %v1660_v3  ;;  %v1748_v23 = vadd.s32 536870912, %v1747_v43  ;;  %v1670_v36 = vsub.s32 4, %v7257_v38 }
 0x295   : > { %v1156_v9 = vmul.f32 1.442695, %v1138_v0  ;;  %v7366_v56 = vadd.f32 %v5153_v22, %v7329_v29  ;;  %v1139_v10 = vsub.f32 0.0, %v1123_v51  ;;  %v7382_v8 = vadd.f32 %v7329_v29, %v1025_v52 }
 0x296   : > { %v5532_v30 = vpop.eup %5531  ;;  %v1659_v24 = vor.u32 %v1658_v61, %v1657_v1  ;;  %v1662_v46 = vshll.u32 %v1661_v58, 23  ;;  %v7353_v39 = vshrl.u32 %v1748_v23, 30  ;;  %v1671_v25 = vsel %vm1586_vm3, %v1670_v36, %v7257_v38  ;;  %v7395_v58 = vpop.permute.xlu0 %3382 }
 0x297   : > { %v5534_v12 = vpop.eup %5533  ;;  %v1992_v63 = vxor.u32 2147483648, %v5532_v30  ;;  %5535 = vpow2.f32 %v1156_v9  ;;  %v1126_v45 = vand.u32 2147483647, %v7366_v56  ;;  %v1158_v28 = vmul.f32 1.442695, %v1139_v10 }
 0x298   : > { %v1989_v13 = vxor.u32 2147483648, %v5534_v12  ;;  %v1663_v48 = vor.u32 4788187, %v1662_v46  ;;  %v1666_v4 = vcvt.s32.f32 %v1659_v24  ;;  %v1750_v50 = vshll.u32 %v7353_v39, 30  ;;  %v7401_v24 = vpop.permute.xlu1 %3388 }
 0x299   : > { %v1993_v57 = vsel %vm1991_vm15, %v1992_v63, %v5534_v12  ;;  %v7385_v32 = vadd.f32 %v5154_v18, %v7329_v29  ;;  %v1673_v14 = vsel %vm7360_vm4, 0, %v1671_v25  ;;  %v1142_v38 = vsub.f32 0.0, %v1126_v45  ;;  %v5157_v12 = vpop.f32.mrf.mxu0 }
 0x29a   : > { %v1990_v2 = vsel %vm1988_vm0, %v5532_v30, %v1989_v13  ;;  %v1664_v37 = vand.u32 2147483647, %v1663_v48  ;;  %v1751_v17 = vsub.s32 %v1747_v43, %v1750_v50  ;;  %v1124_v3 = vand.u32 2147483647, %v7382_v8  ;;  %v7417_v52 = vpop.permute.xlu0 %3391 }
 0x29b   : > { %v1994_v55 = vsel %vm1987_vm1, %v1990_v2, %v1993_v57  ;;  %v7391_v41 = vadd.f32 %v7329_v29, %v1028_v34  ;;  %v1743_v61 = vadd.s32 %v7322_v5, %v7333_v16  ;;  %v7399_v19 = vadd.f32 %v7329_v29, %v7304_v44 }
 0x29c   : > { %v1995_v40 = vsel %vm1985_vm2, nan, %v1994_v55  ;;  %v1667_v26 = vmul.f32 %v1666_v4, %v1664_v37  ;;  %v1753_v7 = vsub.s32 0, %v1751_v17  ;;  %v1677_v43 = vand.u32 3, %v1673_v14  ;;  %v1041_v55 = vpop.f32.mrf.mxu0 }
 0x29d   : > { %v3235_v53 = vadd.f32 1.0, %v1995_v40  ;;  %v8546_v30 = vlaneseq  ;;  %v1127_v46 = vand.u32 2147483647, %v7385_v32  ;;  %v1140_v5 = vsub.f32 0.0, %v1124_v3 }
 0x29e   : > { %v1668_v21 = vxor.u32 2147483648, %v1667_v26  ;;  %v4753_v31 = vmin.u32 %v1753_v7, %v1751_v17  ;;  %v1164_v16 = vmul.f32 1.442695, %v1142_v38  ;;  %v1125_v48 = vand.u32 2147483647, %v7391_v41  ;;  %v7433_v38 = vpop.permute.xlu0 %3397 }
 0x29f   : > { %v3251_v54 = vmul.f32 0.5, %v3235_v53  ;;  %v1143_v13 = vsub.f32 0.0, %v1127_v46  ;;  %vm1676_vm6 = vweird.f32 %v7040_v60  ;;  %v1120_v57 = vand.u32 2147483647, %v7399_v19 }
 0x2a0   : > { %v1669_v42 = vsel %vm1586_vm3, %v1668_v21, %v1667_v26  ;;  %v1755_v62 = vclz %v4753_v31  ;;  %vm1678_vm7 = vcmp.lt.s32.totalorder %v1677_v43, 2  ;;  %v7408_v0 = vand.u32 127, %v8546_v30 }
 0x2a1   : > { %3281 = vperm.xlu1 %5446, %v3251_v54   ;;  %v1672_v27 = vsel %vm7360_vm4, %v7040_v60, %v1669_v42  ;;  %v7412_v2 = vadd.f32 %v7329_v29, %v7345_v20  ;;  %v7415_v37 = vadd.f32 %v5157_v12, %v7329_v29  ;;  %v1160_v40 = vmul.f32 1.442695, %v1140_v5 }
 0x2a2   : > { %5537 = vcosq.f32 %v1672_v27  ;;  %v4754_v1 = vadd.s32 4294967294, %v1755_v62  ;;  %v1141_v26 = vsub.f32 0.0, %v1125_v48  ;;  %vm1679_vm8 = vcmp.eq.s32.totalorder %v1677_v43, 0 }
 0x2a3   : > { %5539 = vsinq.f32 %v1672_v27  ;;  %vm1682_vm9 = vcmp.eq.s32.totalorder %v1677_v43, 2  ;;  %v1166_v9 = vmul.f32 1.442695, %v1143_v13  ;;  %v1136_v36 = vsub.f32 0.0, %v1120_v57 }
 0x2a4   : > { %vm4755_vm5 = vcmp.lt.s32.totalorder %v4754_v1, 0  ;;  %5541 = vpow2.f32 %v1158_v28  ;;  %v7419_v53 = vpop.eup %5535  ;;  %v7424_v54 = vadd.f32 %v7329_v29, %v1041_v55  ;;  %v1773_v18 = vsub.s32 4, %v7353_v39 }
 0x2a5   : > { %v1758_v33 = vsel %vm4755_vm5, 0, %v4754_v1  ;;  %5543 = vpow2.f32 %v1164_v16  ;;  %v1121_v42 = vand.u32 2147483647, %v7412_v2  ;;  %v1130_v27 = vand.u32 2147483647, %v7415_v37 }
 0x2a6   : > { %v1759_v63 = vsub.s32 32, %v1758_v33  ;;  %v1760_v23 = vshll.u32 %v1751_v17, %v1758_v33  ;;  %v1763_v22 = vsub.s32 4294967266, %v1758_v33  ;;  %v7421_v17 = vpop.permute.xlu1 %3394  ;;  %5545 = vpow2.f32 %v1160_v40 }
 0x2a7   : > { %v1162_v45 = vmul.f32 1.442695, %v1141_v26  ;;  %v1202_v28 = vadd.f32 1.0, %v7419_v53  ;;  %5547 = vpow2.f32 %v1166_v9  ;;  %v1146_v34 = vsub.f32 0.0, %v1130_v27  ;;  %v7472_v26 = vpop.permute.xlu0 %3403 }
 0x2a8   : > { %v1761_v44 = vshrl.u32 %v1743_v61, %v1759_v63  ;;  %v1764_v4 = vadd.s32 127, %v1763_v22  ;;  %vm1689_vm10 = vcmp.lt.s32.totalorder %v7130_v47, 0  ;;  %v1128_v3 = vand.u32 2147483647, %v7424_v54  ;;  %v5158_v22 = vpop.f32.mrf.mxu0 }
 0x2a9   : > { %vm7441_vm11 = vcmp.le.f32.partialorder %v1687_v6, 0.7853982  ;;  %v1774_v12 = vsel %vm1689_vm10, %v1773_v18, %v7353_v39  ;;  %5549 = vpow2.f32 %v1162_v45  ;;  %v1172_v43 = vmul.f32 1.442695, %v1146_v34  ;;  %v5478_v39 = vld [vmem:[%s8537_s7] sm:$0xff]  }
 0x2aa   : > { %v1762_v50 = vor.u32 %v1761_v44, %v1760_v23  ;;  %v1765_v51 = vshll.u32 %v1764_v4, 23  ;;  %v7448_v63 = vpop.permute.xlu1 %3400  ;;  %v1137_v23 = vsub.f32 0.0, %v1121_v42  ;;  %vm3426_vm12 = vcmp.eq.s32.totalorder %v7373_v49, %v7408_v0  ;;  %5177 = vmatprep.subr.bf16.mxu1 %v5478_v39 }
 0x2ab   : > { %5551 = vlog2.f32 %v1202_v28  ;;  %v1152_v6 = vmul.f32 1.442695, %v1136_v36  ;;  %v1144_v60 = vsub.f32 0.0, %v1128_v3  ;;  %v7461_v4 = vadd.f32 %v5158_v22, %v7329_v29  ;;  %5178 = vmatpush3.bf16.msra.mxu1 %v5478_v39 }
 0x2ac   : > { %v1766_v15 = vor.u32 4788187, %v1765_v51  ;;  %v1769_v21 = vcvt.s32.f32 %v1762_v50  ;;  %v1776_v50 = vsel %vm7441_vm11, 0, %v1774_v12  ;;  %5553 = vpow2.f32 %v1172_v43  ;;  %v1044_v51 = vpop.f32.mrf.mxu0 }
 0x2ad   : > { %vm3428_vm13 = vcmp.eq.s32.totalorder %v7378_v11, %v7408_v0  ;;  %vm3427_vm14 = vcmp.eq.s32.totalorder %v7395_v58, %v7408_v0  ;;  %v1154_v40 = vmul.f32 1.442695, %v1137_v23  ;;  %vm3429_vm15 = vcmp.eq.s32.totalorder %v7401_v24, %v7408_v0 }
 0x2ae   : > { %v1767_v25 = vand.u32 2147483647, %v1766_v15  ;;  %vm3430_vm0 = vcmp.eq.s32.totalorder %v7417_v52, %v7408_v0  ;;  %v7478_v9 = vpop.permute.xlu1 %3406  ;;  %v1074_v36 = vmax.f32 %v7339_v59, 0.0  ;;  %vm3431_vm1 = vcmp.eq.s32.totalorder %v7421_v17, %v7408_v0  ;;  %v5161_v42 = vpop.f32.mrf.mxu0 }
 0x2af   : > { %v5538_v20 = vpop.eup %5537  ;;  %v1072_v18 = vmax.f32 %v7399_v19, 0.0  ;;  %v1075_v27 = vmax.f32 %v7350_v35, 0.0  ;;  %vm3432_vm2 = vcmp.eq.s32.totalorder %v7433_v38, %v7408_v0  ;;  %vm3433_vm3 = vcmp.eq.s32.totalorder %v7448_v63, %v7408_v0 }
 0x2b0   : > { %v5540_v7 = vpop.eup %5539  ;;  %v1683_v10 = vxor.u32 2147483648, %v5538_v20  ;;  %v1770_v1 = vmul.f32 %v1769_v21, %v1767_v25  ;;  %v7482_v21 = vand.u32 3, %v1776_v50  ;;  %v7493_v25 = vadd.f32 %v7329_v29, %v1044_v51 }
 0x2b1   : > { %v1680_v31 = vxor.u32 2147483648, %v5540_v7  ;;  %v7436_v61 = vpop.eup %5541  ;;  %v1078_v28 = vmax.f32 %v7366_v56, 0.0  ;;  %v1208_v23 = vand.u32 2147483647, %v7419_v53  ;;  %v1076_v22 = vmax.f32 %v7382_v8, 0.0 }
 0x2b2   : > { %v1684_v62 = vsel %vm1682_vm9, %v1683_v10, %v5540_v7  ;;  %v1771_v16 = vxor.u32 2147483648, %v1770_v1  ;;  %v1211_v44 = vadd.f32 1.0, %v7436_v61  ;;  %v7480_v15 = vpop.eup %5543  ;;  %v1131_v7 = vand.u32 2147483647, %v7461_v4 }
 0x2b3   : > { %v1681_v14 = vsel %vm1679_vm8, %v5538_v20, %v1680_v31  ;;  %v1168_v20 = vmul.f32 1.442695, %v1144_v60  ;;  %v1205_v10 = vmul.f32 -0.5, %v7419_v53  ;;  %v1073_v31 = vmax.f32 %v7412_v2, 0.0  ;;  %v7495_v45 = vpop.eup %5545  ;;  %vm7522_vm8 = vmpackc.low %vm3427_vm14, %vm3426_vm12 }
 0x2b4   : > { %v1685_v33 = vsel %vm1678_vm7, %v1681_v14, %v1684_v62  ;;  %v1772_v48 = vsel %vm1689_vm10, %v1771_v16, %v1770_v1  ;;  %v1214_v62 = vmul.f32 -0.5, %v7436_v61  ;;  %v1238_v34 = vadd.f32 1.0, %v7480_v15  ;;  %v7504_v14 = vpop.eup %5547  ;;  %v7510_v1 = vpop.permute.xlu0 %3409  ;;  %vm7555_vm12 = vmpackc.low %vm3431_vm1, %vm3430_vm0 }
 0x2b5   : > { %v1686_v5 = vsel %vm1676_vm6, nan, %v1685_v33  ;;  %v1775_v55 = vsel %vm7441_vm11, %v7130_v47, %v1772_v48  ;;  %vm1782_vm4 = vcmp.eq.s32.totalorder %v7482_v21, 0  ;;  %vm1785_vm5 = vcmp.eq.s32.totalorder %v7482_v21, 2  ;;  %v1057_v16 = vpop.f32.mrf.mxu0  ;;  %vm7539_vm11 = vmpackc.low %vm3429_vm15, %vm3428_vm13 }
 0x2b6   : > { %v3232_v13 = vadd.f32 1.0, %v1686_v5  ;;  %5555 = vcosq.f32 %v1775_v55  ;;  %vm3434_vm6 = vcmp.eq.s32.totalorder %v7472_v26, %v7408_v0  ;;  %v1147_v3 = vsub.f32 0.0, %v1131_v7  ;;  %v7530_v5 = vpop.permute.xlu1 %3412  ;;  %v7547_v39 = vpop.eup %5549 }
 0x2b7   : > { %5557 = vsinq.f32 %v1775_v55  ;;  %v7513_v33 = vadd.f32 %v5161_v42, %v7329_v29  ;;  %vm1781_vm7 = vcmp.lt.s32.totalorder %v7482_v21, 2  ;;  %v1206_v12 = vadd.f32 1.0, %v1205_v10  ;;  %v5162_v7 = vpop.f32.mrf.mxu0 }
 0x2b8   : > { %v3248_v57 = vmul.f32 0.5, %v3232_v13  ;;  %5559 = vlog2.f32 %v1211_v44  ;;  %vm3435_vm9 = vcmp.eq.s32.totalorder %v7478_v9, %v7408_v0  ;;  %vm1779_vm10 = vweird.f32 %v7130_v47  ;;  %v5552_v44 = vpop.eup %5551 }
 0x2b9   : > { %5561 = vpow2.f32 %v1152_v6  ;;  %v1217_v58 = vand.u32 2147483647, %v7436_v61  ;;  %v1220_v43 = vadd.f32 1.0, %v7495_v45  ;;  %v1079_v13 = vmax.f32 %v7385_v32, 0.0  ;;  %v7577_v10 = vpop.eup %5553 }
 0x2ba   : > { %3266 = vperm.xlu0 %5445, %v3248_v57   ;;  %5563 = vpow2.f32 %v1154_v40  ;;  %v1129_v6 = vand.u32 2147483647, %v7493_v25  ;;  %v1215_v24 = vadd.f32 1.0, %v1214_v62  ;;  %v1247_v48 = vadd.f32 1.0, %v7504_v14 }
 0x2bb   : > { %5565 = vpow2.f32 %v1168_v20  ;;  %v1174_v60 = vmul.f32 1.442695, %v1147_v3  ;;  %v1134_v55 = vand.u32 2147483647, %v7513_v33  ;;  %v5731_v50 = vmov 1.0|1.0  }
 0x2bc   : > { %5567 = vlog2.f32 %v1238_v34  ;;  %v1145_v57 = vsub.f32 0.0, %v1129_v6  ;;  %5211 = vmatprep.mubr.msk.bf16.mxu0 %vm7522_vm8, %v5731_v50  ;;  %v7565_v52 = vadd.f32 %v7329_v29, %v1057_v16  ;;  %v1207_v17 = vmul.f32 %v7419_v53, %v1206_v12  ;;  %v7591_v12 = vpop.permute.xlu0 %3415 }
 0x2bd   : > { %vm7568_vm13 = vcmp.lt.f32.partialorder %v1208_v23, 0.0004427343  ;;  %v1077_v40 = vmax.f32 %v7391_v41, 0.0  ;;  %5212 = vmatmul.mubr.msk.bf16.vlgmr.msra.gmra.mxu0 %vm7539_vm11, %v5731_v50  ;;  %v1241_v42 = vmul.f32 -0.5, %v7480_v15  ;;  %5569 = vlog2.f32 %v1220_v43  ;;  %v7593_v23 = vpop.permute.xlu1 %3418  ;;  %vm7616_vm11 = vmpackc.low %vm3433_vm3, %vm3432_vm2 }
 0x2be   : > { %v1229_v53 = vadd.f32 1.0, %v7547_v39  ;;  %v1170_v62 = vmul.f32 1.442695, %v1145_v57  ;;  %5215 = vmatprep.mubr.msk.bf16.mxu0 %vm7555_vm12, %v5731_v50  ;;  %v1204_v3 = vmul.f32 0.6931472, %v5552_v44  ;;  %v7585_v46 = vmul.f32 %v7436_v61, %v1215_v24  ;;  %vm7633_vm2 = vmpackc.low %vm3435_vm9, %vm3434_vm6 }
 0x2bf   : > { %vm3436_vm14 = vcmp.eq.s32.totalorder %v7510_v1, %v7408_v0  ;;  %5571 = vlog2.f32 %v1247_v48  ;;  %vm3437_vm15 = vcmp.eq.s32.totalorder %v7530_v5, %v7408_v0  ;;  %v1132_v16 = vand.u32 2147483647, %v7565_v52 }
 0x2c0   : > { %vm7596_vm0 = vcmp.lt.f32.partialorder %v1217_v58, 0.0004427343  ;;  %vm3438_vm1 = vcmp.eq.s32.totalorder %v7591_v12, %v7408_v0  ;;  %vm3439_vm8 = vcmp.eq.s32.totalorder %v7593_v23, %v7408_v0  ;;  %5573 = vpow2.f32 %v1174_v60  ;;  %v1060_v58 = vpop.f32.mrf.mxu0  ;;  %vm7692_vm6 = vmpackc.low %vm3437_vm15, %vm3436_vm14 }
 0x2c1   : > { %v1150_v11 = vsub.f32 0.0, %v1134_v55  ;;  %v1274_v44 = vadd.f32 1.0, %v7577_v10  ;;  %5575 = vpow2.f32 %v1170_v62  ;;  %v1148_v57 = vsub.f32 0.0, %v1132_v16  ;;  %v7663_v47 = vpop.permute.xlu1 %3424  ;;  %vm7709_vm9 = vmpackc.low %vm3439_vm8, %vm3438_vm1 }
 0x2c2   : > { %v1242_v55 = vadd.f32 1.0, %v1241_v42  ;;  %v1244_v62 = vand.u32 2147483647, %v7480_v15  ;;  %5577 = vlog2.f32 %v1229_v53  ;;  %v1223_v63 = vmul.f32 -0.5, %v7495_v45 }
 0x2c3   : > { %v5556_v34 = vpop.eup %5555  ;;  %v7639_v42 = vadd.f32 %v5162_v7, %v7329_v29  ;;  %v7646_v26 = vadd.f32 %v7329_v29, %v1060_v58  ;;  %5579 = vlog2.f32 %v1274_v44  ;;  %v7661_v29 = vpop.permute.xlu0 %3421  ;;  %v1253_v58 = vand.u32 2147483647, %v7504_v14 }
 0x2c4   : > { %v5558_v49 = vpop.eup %5557  ;;  %v1786_v43 = vxor.u32 2147483648, %v5556_v34  ;;  %vm7668_vm3 = vcmp.lt.f32.partialorder %v1244_v62, 0.0004427343  ;;  %v1277_v1 = vmul.f32 -0.5, %v7577_v10  ;;  %vm1089_vm1 = vcmp.ne.f32.partialorder %v7412_v2, %v7412_v2 }
 0x2c5   : > { %v5560_v24 = vpop.eup %5559  ;;  %v1783_v48 = vxor.u32 2147483648, %v5558_v49  ;;  %5216 = vmatmul.mubr.msk.bf16.gmra.mxu0 %vm7616_vm11, %v5731_v50  ;;  %v1133_v60 = vand.u32 2147483647, %v7646_v26 }
 0x2c6   : > { %v7606_v30 = vpop.eup %5561  ;;  %v1787_v20 = vsel %vm1785_vm5, %v1786_v43, %v5558_v49  ;;  %v1210_v49 = vsel %vm7568_vm13, %v1207_v17, %v1204_v3  ;;  %v1213_v51 = vmul.f32 0.6931472, %v5560_v24  ;;  %v1250_v3 = vmul.f32 -0.5, %v7504_v14  ;;  %5219 = vmatprep.mubr.msk.bf16.mxu0 %vm7633_vm2, %v5731_v50 }
 0x2c7   : > { %v7621_v16 = vpop.eup %5563  ;;  %v1784_v61 = vsel %vm1782_vm4, %v5556_v34, %v1783_v48  ;;  %v1176_v34 = vmul.f32 1.442695, %v1148_v57  ;;  %v1180_v43 = vmul.f32 1.442695, %v1150_v11  ;;  %v7656_v21 = vadd.f32 %v1210_v49, %v1074_v36 }
 0x2c8   : > { %v7641_v53 = vpop.eup %5565  ;;  %v1788_v17 = vsel %vm1781_vm7, %v1784_v61, %v1787_v20  ;;  %v7659_v20 = vmul.f32 %v7480_v15, %v1242_v55  ;;  %v1226_v11 = vand.u32 2147483647, %v7495_v45  ;;  %vm3440_vm4 = vcmp.eq.s32.totalorder %v7661_v29, %v7408_v0 }
 0x2c9   : > { %v1789_v9 = vsel %vm1779_vm10, nan, %v1788_v17  ;;  %5581 = vpow2.f32 %v1176_v34  ;;  %v1256_v36 = vadd.f32 1.0, %v7641_v53  ;;  %v1083_v15 = vmax.f32 %v7461_v4, 0.0  ;;  %v5568_v48 = vpop.eup %5567 }
 0x2ca   : > { %v3233_v7 = vadd.f32 1.0, %v1789_v9  ;;  %vm3441_vm5 = vcmp.eq.s32.totalorder %v7663_v47, %v7408_v0  ;;  %v1135_v24 = vand.u32 2147483647, %v7639_v42  ;;  %v1224_v57 = vadd.f32 1.0, %v1223_v63 }
 0x2cb   : > { %v1219_v55 = vsel %vm7596_vm0, %v7585_v46, %v1213_v51  ;;  %v1251_v62 = vadd.f32 1.0, %v1250_v3  ;;  %v1232_v49 = vmul.f32 -0.5, %v7547_v39  ;;  %5583 = vpow2.f32 %v1180_v43  ;;  %v5570_v51 = vpop.eup %5569  ;;  %vm7754_vm13 = vmpackc.low %vm3441_vm5, %vm3440_vm4 }
 0x2cc   : > { %v3249_v44 = vmul.f32 0.5, %v3233_v7  ;;  %v1235_v63 = vand.u32 2147483647, %v7547_v39  ;;  %v1151_v17 = vsub.f32 0.0, %v1135_v24  ;;  %v1149_v6 = vsub.f32 0.0, %v1133_v60  ;;  %v5572_v3 = vpop.eup %5571 }
 0x2cd   : > { %v1184_v46 = vadd.f32 1.0, %v7606_v30  ;;  %vm7698_vm7 = vcmp.lt.f32.partialorder %v1226_v11, 0.0004427343  ;;  %5585 = vlog2.f32 %v1256_v36  ;;  %v1081_v9 = vmax.f32 %v7493_v25, 0.0  ;;  %v7714_v24 = vpop.eup %5573  ;;  %5220 = vmatmul.mubr.msk.bf16.gmra.mxu0 %vm7692_vm6, %v5731_v50 }
 0x2ce   : > { %3271 = vperm.xlu1 %5446, %v3249_v44   ;;  %v1240_v43 = vmul.f32 0.6931472, %v5568_v48  ;;  %v1182_v7 = vmul.f32 1.442695, %v1151_v17  ;;  %v1178_v11 = vmul.f32 1.442695, %v1149_v6  ;;  %v7718_v12 = vadd.f32 %v1219_v55, %v1075_v27  ;;  %v7729_v48 = vpop.eup %5575  ;;  %5223 = vmatprep.mubr.msk.bf16.mxu0 %vm7709_vm9, %v5731_v50 }
 0x2cf   : > { %5587 = vlog2.f32 %v1184_v46  ;;  %v1225_v23 = vmul.f32 %v7495_v45, %v1224_v57  ;;  %vm7721_vm10 = vcmp.lt.f32.partialorder %v1253_v58, 0.0004427343  ;;  %v1193_v36 = vadd.f32 1.0, %v7621_v16  ;;  %v5578_v45 = vpop.eup %5577 }
 0x2d0   : > { %v1252_v60 = vmul.f32 %v7504_v14, %v1251_v62  ;;  %v1233_v17 = vadd.f32 1.0, %v1232_v49  ;;  %vm7732_vm12 = vcmp.lt.f32.partialorder %v1235_v63, 0.0004427343  ;;  %5589 = vpow2.f32 %v1182_v7  ;;  %v5580_v46 = vpop.eup %5579 }
 0x2d1   : > { %v1278_v57 = vadd.f32 1.0, %v1277_v1  ;;  %v1280_v58 = vand.u32 2147483647, %v7577_v10  ;;  %v1265_v55 = vadd.f32 1.0, %v7729_v48  ;;  %5591 = vpow2.f32 %v1178_v11 }
 0x2d2   : > { %v1246_v14 = vsel %vm7668_vm3, %v7659_v20, %v1240_v43  ;;  %v1222_v62 = vmul.f32 0.6931472, %v5570_v51  ;;  %v1259_v49 = vmul.f32 -0.5, %v7641_v53  ;;  %5593 = vlog2.f32 %v1193_v36 }
 0x2d3   : > { %v1249_v38 = vmul.f32 0.6931472, %v5572_v3  ;;  %v1283_v63 = vadd.f32 1.0, %v7714_v24  ;;  %v1286_v6 = vmul.f32 -0.5, %v7714_v24  ;;  %5595 = vlog2.f32 %v1265_v55 }
 0x2d4   : > { %v1231_v1 = vmul.f32 0.6931472, %v5578_v45  ;;  %v1234_v5 = vmul.f32 %v7547_v39, %v1233_v17  ;;  %v1084_v61 = vmax.f32 %v7565_v52, 0.0  ;;  %v1187_v51 = vmul.f32 -0.5, %v7606_v30 }
 0x2d5   : > { %v7764_v43 = vadd.f32 %v1246_v14, %v1078_v28  ;;  %v7767_v39 = vmul.f32 %v7577_v10, %v1278_v57  ;;  %vm7769_vm14 = vcmp.lt.f32.partialorder %v1280_v58, 0.0004427343  ;;  %v1268_v0 = vmul.f32 -0.5, %v7729_v48  ;;  %5224 = vmatmul.mubr.msk.bf16.gmra.mxu0 %vm7754_vm13, %v5731_v50 }
 0x2d6   : > { %v7760_v3 = vpop.eup %5581  ;;  %v1228_v47 = vsel %vm7698_vm7, %v1225_v23, %v1222_v62  ;;  %v1260_v7 = vadd.f32 1.0, %v1259_v49  ;;  %v1262_v11 = vand.u32 2147483647, %v7641_v53  ;;  %v1196_v36 = vmul.f32 -0.5, %v7621_v16 }
 0x2d7   : > { %v1255_v28 = vsel %vm7721_vm10, %v1252_v60, %v1249_v38  ;;  %5597 = vlog2.f32 %v1283_v63  ;;  %v1287_v10 = vadd.f32 1.0, %v1286_v6  ;;  %v1292_v17 = vadd.f32 1.0, %v7760_v3 }
 0x2d8   : > { %v7784_v45 = vpop.eup %5583  ;;  %v1237_v34 = vsel %vm7732_vm12, %v1234_v5, %v1231_v1  ;;  %v7788_v23 = vmul.f32 0.6931472, %v5580_v46  ;;  %v1188_v57 = vadd.f32 1.0, %v1187_v51  ;;  %v1190_v58 = vand.u32 2147483647, %v7606_v30 }
 0x2d9   : > { %v1332_v44 = vadd.f32 %v1228_v47, %v1076_v22  ;;  %v1269_v60 = vadd.f32 1.0, %v1268_v0  ;;  %v1271_v55 = vand.u32 2147483647, %v7729_v48  ;;  %5599 = vlog2.f32 %v1292_v17 }
 0x2da   : > { %v5586_v14 = vpop.eup %5585  ;;  %v7796_v62 = vadd.f32 %v1255_v28, %v1079_v13  ;;  %v7799_v27 = vmul.f32 %v7641_v53, %v1260_v7  ;;  %vm7801_vm15 = vcmp.lt.f32.partialorder %v1262_v11, 0.0004427343  ;;  %v1197_v38 = vadd.f32 1.0, %v1196_v36 }
 0x2db   : > { %v1199_v63 = vand.u32 2147483647, %v7621_v16  ;;  %v1333_v6 = vadd.f32 %v1237_v34, %v1077_v40  ;;  %v7809_v46 = vmul.f32 %v7714_v24, %v1287_v10  ;;  %v1289_v13 = vand.u32 2147483647, %v7714_v24 }
 0x2dc   : > { %v5588_v22 = vpop.eup %5587  ;;  %v1310_v1 = vadd.f32 1.0, %v7784_v45  ;;  %vm1088_vm0 = vcmp.ne.f32.partialorder %v7399_v19, %v7399_v19  ;;  %v1282_v53 = vsel %vm7769_vm14, %v7767_v39, %v7788_v23  ;;  %v1189_v40 = vmul.f32 %v7606_v30, %v1188_v57 }
 0x2dd   : > { %v1186_v5 = vmul.f32 0.6931472, %v5588_v22  ;;  %vm7822_vm8 = vcmp.lt.f32.partialorder %v1190_v58, 0.0004427343  ;;  %v7826_v24 = vpop.eup %5589  ;;  %v1258_v51 = vmul.f32 0.6931472, %v5586_v14  ;;  %v1270_v0 = vmul.f32 %v7729_v48, %v1269_v60 }
 0x2de   : > { %vm7829_vm11 = vcmp.lt.f32.partialorder %v1271_v55, 0.0004427343  ;;  %v1313_v7 = vmul.f32 -0.5, %v7784_v45  ;;  %v7834_v11 = vpop.eup %5591  ;;  %v1319_v36 = vadd.f32 1.0, %v7826_v24  ;;  %v1198_v30 = vmul.f32 %v7621_v16, %v1197_v38 }
 0x2df   : > { %vm7838_vm2 = vcmp.lt.f32.partialorder %v1199_v63, 0.0004427343  ;;  %vm1090_vm3 = vcmp.ne.f32.partialorder %v7339_v59, %v7339_v59  ;;  %v5594_v48 = vpop.eup %5593  ;;  %5601 = vlog2.f32 %v1310_v1  ;;  %v1295_v10 = vmul.f32 -0.5, %v7760_v3 }
 0x2e0   : > { %v1301_v17 = vadd.f32 1.0, %v7834_v11  ;;  %v1192_v34 = vsel %vm7822_vm8, %v1189_v40, %v1186_v5  ;;  %v5596_v57 = vpop.eup %5595  ;;  %5603 = vlog2.f32 %v1319_v36  ;;  %v1195_v58 = vmul.f32 0.6931472, %v5594_v48 }
 0x2e1   : > { %vm1091_vm4 = vcmp.ne.f32.partialorder %v7350_v35, %v7350_v35  ;;  %vm1093_vm5 = vcmp.ne.f32.partialorder %v7391_v41, %v7391_v41  ;;  %v1267_v16 = vmul.f32 0.6931472, %v5596_v57  ;;  %vm1092_vm6 = vcmp.ne.f32.partialorder %v7382_v8, %v7382_v8 }
 0x2e2   : > { %5605 = vlog2.f32 %v1301_v17  ;;  %v1349_v60 = vsel %vm1093_vm5, %v7391_v41, %v1333_v6  ;;  %vm7855_vm7 = vcmp.lt.f32.partialorder %v1289_v13, 0.0004427343  ;;  %v1201_v14 = vsel %vm7838_vm2, %v1198_v30, %v1195_v58 }
 0x2e3   : > { %v1328_v38 = vadd.f32 %v1192_v34, %v1072_v18  ;;  %v1347_v63 = vsel %vm1091_vm4, %v7350_v35, %v7718_v12  ;;  %v1348_v22 = vsel %vm1092_vm6, %v7382_v8, %v1332_v44  ;;  %v1264_v1 = vsel %vm7801_vm15, %v7799_v27, %v1258_v51 }
 0x2e4   : > { %v1273_v41 = vsel %vm7829_vm11, %v1270_v0, %v1267_v16  ;;  %v1298_v6 = vand.u32 2147483647, %v7760_v3  ;;  %v1329_v13 = vadd.f32 %v1201_v14, %v1073_v31  ;;  %v5598_v5 = vpop.eup %5597  ;;  %v1296_v40 = vadd.f32 1.0, %v1295_v10 }
 0x2e5   : > { %v1344_v35 = vsel %vm1088_vm0, %v7399_v19, %v1328_v38  ;;  %v1346_v8 = vsel %vm1090_vm3, %v7339_v59, %v7656_v21  ;;  %v4728_v18 = vadd.f32 -0.6931472, %v1349_v60  ;;  %v1337_v12 = vadd.f32 %v1273_v41, %v1081_v9 }
 0x2e6   : > { %v1345_v31 = vsel %vm1089_vm1, %v7412_v2, %v1329_v13  ;;  %v4726_v44 = vadd.f32 -0.6931472, %v1347_v63  ;;  %v4727_v27 = vadd.f32 -0.6931472, %v1348_v22  ;;  %v5600_v49 = vpop.eup %5599  ;;  %v1314_v20 = vadd.f32 1.0, %v1313_v7 }
 0x2e7   : > { %v1304_v19 = vmul.f32 -0.5, %v7834_v11  ;;  %v4723_v51 = vadd.f32 -0.6931472, %v1344_v35  ;;  %v4724_v0 = vadd.f32 -0.6931472, %v1345_v31  ;;  %v8621_v47 = vmax.f32 %v7424_v54, 0.0 }
 0x2e8   : > { %v1285_v21 = vmul.f32 0.6931472, %v5598_v5  ;;  %v1322_v36 = vmul.f32 -0.5, %v7826_v24  ;;  %v4725_v9 = vadd.f32 -0.6931472, %v1346_v8  ;;  %v1378_v48 = vpack.c.bf16 %v4728_v18, %v4727_v27 }
 0x2e9   : > { %v1336_v59 = vadd.f32 %v1264_v1, %v8621_v47  ;;  %v1294_v30 = vmul.f32 0.6931472, %v5600_v49  ;;  %v1376_v28 = vpack.c.bf16 %v4724_v0, %v4723_v51  ;;  %vm1097_vm9 = vcmp.ne.f32.partialorder %v7493_v25, %v7493_v25 }
 0x2ea   : > { %v1297_v2 = vmul.f32 %v7760_v3, %v1296_v40  ;;  %v1377_v7 = vpack.c.bf16 %v4726_v44, %v4725_v9  ;;  %vm1095_vm10 = vcmp.ne.f32.partialorder %v7385_v32, %v7385_v32  ;;  %v1353_v10 = vsel %vm1097_vm9, %v7493_v25, %v1337_v12 }
 0x2eb   : > { %v1305_v17 = vadd.f32 1.0, %v1304_v19  ;;  %5179 = vmatprep.mubr.bf16.mxu1 %v1376_v28  ;;  %vm1094_vm12 = vcmp.ne.f32.partialorder %v7366_v56, %v7366_v56  ;;  %v1351_v34 = vsel %vm1095_vm10, %v7385_v32, %v7796_v62  ;;  %vm1096_vm13 = vcmp.ne.f32.partialorder %v7424_v54, %v7424_v54 }
 0x2ec   : > { %v1291_v3 = vsel %vm7855_vm7, %v7809_v46, %v1285_v21  ;;  %vm7908_vm15 = vcmp.lt.f32.partialorder %v1298_v6, 0.0004427343  ;;  %5180 = vmatmul.mubr.bf16.vlgmr.msra.gmra.mxu1 %v1377_v7  ;;  %v1350_v25 = vsel %vm1094_vm12, %v7366_v56, %v7764_v43  ;;  %v1352_v58 = vsel %vm1096_vm13, %v7424_v54, %v1336_v59  ;;  %v5602_v16 = vpop.eup %5601 }
 0x2ed   : > { %v1300_v32 = vsel %vm7908_vm15, %v1297_v2, %v1294_v30  ;;  %v1323_v62 = vadd.f32 1.0, %v1322_v36  ;;  %v1307_v60 = vand.u32 2147483647, %v7834_v11  ;;  %5183 = vmatprep.mubr.bf16.mxu1 %v1378_v48  ;;  %v4732_v55 = vadd.f32 -0.6931472, %v1353_v10  ;;  %v5604_v46 = vpop.eup %5603 }
 0x2ee   : > { %v8624_v14 = vmax.f32 %v7415_v37, 0.0  ;;  %v1316_v54 = vand.u32 2147483647, %v7784_v45  ;;  %v1085_v43 = vmax.f32 %v7646_v26, 0.0  ;;  %v4730_v38 = vadd.f32 -0.6931472, %v1351_v34 }
 0x2ef   : > { %v5606_v63 = vpop.eup %5605  ;;  %v1339_v22 = vadd.f32 %v1291_v3, %v1083_v15  ;;  %v1325_v1 = vand.u32 2147483647, %v7826_v24  ;;  %v1306_v41 = vmul.f32 %v7834_v11, %v1305_v17  ;;  %v4731_v6 = vadd.f32 -0.6931472, %v1352_v58  ;;  %v4852_v48 = vld [vmem:[%s501_s19] ss:$0 sm:$0xff] }
 0x2f0   : > { %v1338_v56 = vadd.f32 %v1282_v53, %v8624_v14  ;;  %v1340_v29 = vadd.f32 %v1300_v32, %v1084_v61  ;;  %v1321_v13 = vmul.f32 0.6931472, %v5604_v46  ;;  %v1303_v39 = vmul.f32 0.6931472, %v5606_v63  ;;  %v3747_v3 = vld [vmem:[#allocation3 + $0x58] sm:$0xff] }
 0x2f1   : > { %v4729_v23 = vadd.f32 -0.6931472, %v1350_v25  ;;  %v1315_v53 = vmul.f32 %v7784_v45, %v1314_v20  ;;  %v1324_v5 = vmul.f32 %v7826_v24, %v1323_v62  ;;  %vm1308_vm14 = vcmp.lt.f32.partialorder %v1307_v60, 0.0004427343  ;;  %v3745_v25 = vld [vmem:[#allocation3 + $0x30] sm:$0xff] }
 0x2f2   : > { %v1380_v40 = vpack.c.bf16 %v4732_v55, %v4731_v6  ;;  %v1312_v35 = vmul.f32 0.6931472, %v5602_v16  ;;  %v1309_v8 = vsel %vm1308_vm14, %v1306_v41, %v1303_v39  ;;  %vm1099_vm0 = vcmp.ne.f32.partialorder %v7461_v4, %v7461_v4 }
 0x2f3   : > { %v1379_v15 = vpack.c.bf16 %v4730_v38, %v4729_v23  ;;  %vm7937_vm1 = vcmp.lt.f32.partialorder %v1325_v1, 0.0004427343  ;;  %v1341_v61 = vadd.f32 %v1309_v8, %v1085_v43  ;;  %v1355_v18 = vsel %vm1099_vm0, %v7461_v4, %v1339_v22 }
 0x2f4   : > { %vm1100_vm8 = vcmp.ne.f32.partialorder %v7565_v52, %v7565_v52  ;;  %v1327_v45 = vsel %vm7937_vm1, %v1324_v5, %v1321_v13  ;;  %vm1098_vm11 = vcmp.ne.f32.partialorder %v7415_v37, %v7415_v37  ;;  %vm1101_vm2 = vcmp.ne.f32.partialorder %v7646_v26, %v7646_v26 }
 0x2f5   : > { %5184 = vmatmul.mubr.bf16.gmra.mxu1 %v1379_v15  ;;  %v1356_v24 = vsel %vm1100_vm8, %v7565_v52, %v1340_v29  ;;  %vm1317_vm3 = vcmp.lt.f32.partialorder %v1316_v54, 0.0004427343  ;;  %v1087_v12 = vmax.f32 %v7639_v42, 0.0  ;;  %v1354_v4 = vsel %vm1098_vm11, %v7415_v37, %v1338_v56  ;;  %v3342_v15 = vpop.permute.xlu1 %3341 }
 0x2f6   : > { %5187 = vmatprep.mubr.bf16.mxu1 %v1380_v40  ;;  %v1357_v31 = vsel %vm1101_vm2, %v7646_v26, %v1341_v61  ;;  %v1318_v44 = vsel %vm1317_vm3, %v1315_v53, %v1312_v35  ;;  %v4734_v27 = vadd.f32 -0.6931472, %v1355_v18  ;;  %v1086_v20 = vmax.f32 %v7513_v33, 0.0  ;;  %v3337_v18 = vpop.permute.xlu0 %3336 }
 0x2f7   : > { %v4736_v49 = vadd.f32 -0.6931472, %v1357_v31  ;;  %v1343_v19 = vadd.f32 %v1327_v45, %v1087_v12  ;;  %v4735_v51 = vadd.f32 -0.6931472, %v1356_v24  ;;  %v4733_v0 = vadd.f32 -0.6931472, %v1354_v4 }
 0x2f8   : > { %v1342_v47 = vadd.f32 %v1318_v44, %v1086_v20  ;;  %vm1103_vm4 = vcmp.ne.f32.partialorder %v7639_v42, %v7639_v42  ;;  %vm1102_vm5 = vcmp.ne.f32.partialorder %v7513_v33, %v7513_v33  ;;  %v8627_v30 = vlaneseq }
 0x2f9   : > { %v1382_v59 = vpack.c.bf16 %v4736_v49, %v4735_v51  ;;  %v1381_v52 = vpack.c.bf16 %v4734_v27, %v4733_v0  ;;  %v1359_v21 = vsel %vm1103_vm4, %v7639_v42, %v1343_v19  ;;  %v3332_v4 = vpop.permute.xlu1 %3331 }
 0x2fa   : > { %v1358_v37 = vsel %vm1102_vm5, %v7513_v33, %v1342_v47  ;;  %v4738_v26 = vadd.f32 -0.6931472, %v1359_v21  ;;  %v3668_v28 = vshrl.u32 %v8627_v30, 7  ;;  %v3327_v44 = vpop.permute.xlu0 %3326 }
 0x2fb   : > { %v4737_v36 = vadd.f32 -0.6931472, %v1358_v37 }
 0x2fc   : > { %v3669_v2 = vadd.s32 8, %v3668_v28  ;;  %vm3689_vm6 = vcmp.eq.s32.totalorder %v3668_v28, %v4852_v48  ;;  %v3670_v42 = vadd.s32 16, %v3668_v28  ;;  %v3671_v7 = vadd.s32 24, %v3668_v28 }
 0x2fd   : > { %5188 = vmatmul.mubr.bf16.gmra.mxu1 %v1381_v52  ;;  %v1383_v9 = vpack.c.bf16 %v4738_v26, %v4737_v36  ;;  %v3672_v10 = vadd.s32 32, %v3668_v28  ;;  %v3673_v17 = vadd.s32 40, %v3668_v28  ;;  %v3674_v33 = vadd.s32 48, %v3668_v28  ;;  %v3322_v19 = vpop.permute.xlu1 %3321 }
 0x2fe   : > { %5191 = vmatprep.mubr.bf16.mxu1 %v1382_v59  ;;  %vm3690_vm7 = vcmp.eq.s32.totalorder %v3669_v2, %v4852_v48  ;;  %vm3691_vm9 = vcmp.eq.s32.totalorder %v3670_v42, %v4852_v48  ;;  %vm3692_vm10 = vcmp.eq.s32.totalorder %v3671_v7, %v4852_v48  ;;  %v3675_v34 = vadd.s32 56, %v3668_v28  ;;  %v3317_v47 = vpop.permute.xlu0 %3316  ;;  %v8027_v59 = vld [vmem:[%s8538_s8] ss:$0 sm:$0xff] }
 0x2ff   : > { %vm4869_vm12 = vmpackc.low %vm3690_vm7, %vm3689_vm6  ;;  %vm3693_vm13 = vcmp.eq.s32.totalorder %v3672_v10, %v4852_v48  ;;  %vm3694_vm15 = vcmp.eq.s32.totalorder %v3673_v17, %v4852_v48  ;;  %vm3695_vm0 = vcmp.eq.s32.totalorder %v3674_v33, %v4852_v48  ;;  %v3676_v58 = vadd.s32 64, %v3668_v28 }
 0x300   : > { %vm7968_vm14 = vmpackc.low %vm3692_vm10, %vm3691_vm9  ;;  %vm3696_vm8 = vcmp.eq.s32.totalorder %v3675_v34, %v4852_v48  ;;  %v3677_v16 = vadd.s32 72, %v3668_v28  ;;  %v3678_v32 = vadd.s32 80, %v3668_v28  ;;  %v3679_v62 = vadd.s32 88, %v3668_v28 }
 0x301   : > { %vm7972_vm1 = vmpackc.low %vm3694_vm15, %vm3693_vm13  ;;  %vm3697_vm2 = vcmp.eq.s32.totalorder %v3676_v58, %v4852_v48  ;;  %v3680_v46 = vadd.s32 96, %v3668_v28  ;;  %v3681_v14 = vadd.s32 104, %v3668_v28  ;;  %v3682_v56 = vadd.s32 112, %v3668_v28 }
 0x302   : > { %vm7976_vm11 = vmpackc.low %vm3696_vm8, %vm3695_vm0  ;;  %vm3698_vm3 = vcmp.eq.s32.totalorder %v3677_v16, %v4852_v48  ;;  %vm3699_vm5 = vcmp.eq.s32.totalorder %v3678_v32, %v4852_v48  ;;  %vm3700_vm6 = vcmp.eq.s32.totalorder %v3679_v62, %v4852_v48  ;;  %v3683_v54 = vadd.s32 120, %v3668_v28 }
 0x303   : > { %vm7980_vm4 = vmpackc.low %vm3698_vm3, %vm3697_vm2  ;;  %vm3701_vm9 = vcmp.eq.s32.totalorder %v3680_v46, %v4852_v48  ;;  %vm3702_vm10 = vcmp.eq.s32.totalorder %v3681_v14, %v4852_v48  ;;  %vm3703_vm13 = vcmp.eq.s32.totalorder %v3682_v56, %v4852_v48 }
 0x304   : > { %vm7984_vm7 = vmpackc.low %vm3700_vm6, %vm3699_vm5  ;;  %vm3704_vm15 = vcmp.eq.s32.totalorder %v3683_v54, %v4852_v48  ;;  %v3307_v48 = vpop.permute.xlu0 %3306 }
 0x305   : > { %5192 = vmatmul.mubr.bf16.gmra.mxu1 %v1383_v9  ;;  %vm7992_vm0 = vmpackc.low %vm3704_vm15, %vm3703_vm13  ;;  %v3312_v9 = vpop.permute.xlu1 %3311 }
 0x306   : > { %5243 = vmatprep.mubr.msk.bf16.mxu1 %vm4869_vm12, %v5731_v50  ;;  %vm7988_vm12 = vmpackc.low %vm3702_vm10, %vm3701_vm9 }
 0x309   : > { %v3302_v56 = vpop.permute.xlu1 %3301 }
 0x37d   : > { %v7996_v63 = vpop.f32.mrf.mxu0 }
 0x37f   : > { %v7998_v22 = vpop.f32.mrf.mxu0 }
 0x381   : > { %v8000_v1 = vpop.f32.mrf.mxu0 }
 0x383   : > { %v8002_v41 = vpop.f32.mrf.mxu0 }
 0x385   : > { %v8004_v6 = vpop.f32.mrf.mxu0 }
 0x387   : > { %v8006_v29 = vpop.f32.mrf.mxu0 }
 0x389   : > { %v8008_v13 = vpop.f32.mrf.mxu0 }
 0x38b   : > { %v8012_v23 = vpop.f32.mrf.mxu0 }
 0x38d   : > { %v5221_v40 = vpop.f32.mrf.mxu0 }
 0x38f   : > { %v8020_v11 = vpop.f32.mrf.mxu0 }
 0x391   : > { %v5222_v24 = vpop.f32.mrf.mxu0 }
 0x393   : > { %v3615_v27 = vpop.f32.mrf.mxu0 }
 0x395   : > { %v5225_v51 = vpop.f32.mrf.mxu0 }
 0x397   : > { %v3628_v37 = vpop.f32.mrf.mxu0 }
 0x399   : > { %v5226_v7 = vpop.f32.mrf.mxu0 }
 0x39b   : > { %v3631_v54 = vpop.f32.mrf.mxu0 }
 0x3ac   : > { %v8010_v39 = vpop.f32.mrf.mxu1 }
 0x3ae   : > { %v8014_v53 = vpop.f32.mrf.mxu1 }
 0x3b0   : > { %v8016_v5 = vpop.f32.mrf.mxu1 }
 0x3b2   : > { %v8018_v35 = vpop.f32.mrf.mxu1 }
 0x3b5   : > { %v5185_v8 = vpop.f32.mrf.mxu1 }
 0x3b7   : > { %v8022_v61 = vpop.f32.mrf.mxu1 }
 0x3b9   : > { %v5186_v45 = vpop.f32.mrf.mxu1 }
 0x3bb   : > { %v1508_v12 = vpop.f32.mrf.mxu1 }
 0x3bd   : > { %v5189_v31 = vpop.f32.mrf.mxu1 }
 0x3be   : > { %v1530_v10 = vadd.f32 %v5189_v31, %v8027_v59  ;;  %v3297_v31 = vpop.permute.xlu0 %3296 }
 0x3bf   : > { %v1521_v49 = vpop.f32.mrf.mxu1 }
 0x3c1   : > { %v5190_v20 = vpop.f32.mrf.mxu1 }
 0x3c2   : > { %v1533_v30 = vadd.f32 %v5190_v20, %v8027_v59  ;;  %v3354_v20 = vmul.f32 %v3317_v47, %v1530_v10 }
 0x3c3   : > { %v1524_v0 = vpop.f32.mrf.mxu1 }
 0x3c4   : > { %v3355_v16 = vmul.f32 %v3322_v19, %v1533_v30  ;;  %v1525_v32 = vadd.f32 %v8027_v59, %v1524_v0  ;;  %v3653_v0 = vmul.f32 %v5221_v40, %v3354_v20  ;;  %v3292_v30 = vpop.permute.xlu1 %3291  ;;  %v1501_v40 = vadd.f32 %v8016_v5, %v8027_v59 }
 0x3c5   : > { %v5193_v52 = vpop.f32.mrf.mxu1 }
 0x3c6   : > { %v1546_v21 = vadd.f32 %v5193_v52, %v8027_v59 }
 0x3c7   : > { %v1537_v26 = vpop.f32.mrf.mxu1 }
 0x3c8   : > { %v1538_v36 = vadd.f32 %v8027_v59, %v1537_v26  ;;  %v3358_v2 = vmul.f32 %v3337_v18, %v1546_v21  ;;  %v1522_v18 = vadd.f32 %v8027_v59, %v1521_v49  ;;  %v1509_v49 = vadd.f32 %v8027_v59, %v1508_v12 }
 0x3c9   : > { %v5194_v28 = vpop.f32.mrf.mxu1  ;;  %v1498_v12 = vadd.f32 %v8010_v39, %v8027_v59 }
 0x3ca   : > { %v1549_v42 = vadd.f32 %v5194_v28, %v8027_v59  ;;  %v3356_v33 = vmul.f32 %v3327_v44, %v1538_v36  ;;  %v3657_v62 = vmul.f32 %v5225_v51, %v3358_v2  ;;  %v1517_v44 = vadd.f32 %v5186_v45, %v8027_v59  ;;  %v3287_v2 = vpop.permute.xlu0 %3286 }
 0x3cb   : > { %v1540_v17 = vpop.f32.mrf.mxu1  ;;  %v3353_v36 = vmul.f32 %v3312_v9, %v1525_v32  ;;  %v1514_v51 = vadd.f32 %v5185_v8, %v8027_v59  ;;  %v1506_v45 = vadd.f32 %v8027_v59, %v8022_v61  ;;  %v3349_v9 = vmul.f32 %v3292_v30, %v1509_v49 }
 0x3cc   : > { %v3359_v34 = vmul.f32 %v3342_v15, %v1549_v42  ;;  %v1541_v58 = vadd.f32 %v8027_v59, %v1540_v17  ;;  %v3655_v52 = vmul.f32 %v3628_v37, %v3356_v33  ;;  %v3654_v15 = vmul.f32 %v5222_v24, %v3355_v16 }
 0x3cd   : > { %v3351_v47 = vmul.f32 %v3302_v56, %v1517_v44  ;;  %v3652_v37 = vmul.f32 %v3615_v27, %v3353_v36  ;;  %v3350_v42 = vmul.f32 %v3297_v31, %v1514_v51  ;;  %v3348_v10 = vmul.f32 %v3287_v2, %v1506_v45  ;;  %v3750_v31 = vld [vmem:[#allocation3 + $0x68] sm:$0xff]  ;;  %v3755_v36 = vld [vmem:[#allocation3 + $0x10] sm:$0xff]  ;;  %v3759_v45 = vld [vmem:[#allocation3 + $0x78] sm:$0xff] }
 0x3ce   : > { %v3658_v46 = vmul.f32 %v5226_v7, %v3359_v34  ;;  %v3357_v14 = vmul.f32 %v3332_v4, %v1541_v58  ;;  %v3352_v4 = vmul.f32 %v3307_v48, %v1522_v18  ;;  %v3664_v28 = vpack.c.bf16 %v3654_v15, %v3653_v0  ;;  %v3282_v7 = vpop.permute.xlu1 %3281  ;;  %v3277_v61 = vpop.permute.xlu0 %3276  ;;  %v3749_v18 = vld [vmem:[#allocation3 + $0x50] sm:$0xff]  ;;  %v3753_v0 = vld [vmem:[#allocation3 + $0x40] sm:$0xff] }
 0x3cf   : > { %v3650_v8 = vmul.f32 %v8008_v13, %v3351_v47  ;;  %v3649_v27 = vmul.f32 %v8004_v6, %v3350_v42  ;;  %v3347_v17 = vmul.f32 %v3282_v7, %v1501_v40  ;;  %v3648_v5 = vmul.f32 %v8012_v23, %v3349_v9  ;;  %v3756_v47 = vld [vmem:[#allocation3 + $0x38] sm:$0xff]  ;;  %v3760_v7 = vld [vmem:[#allocation3 + $0x28] sm:$0xff] }
 0x3d0   : > { %v3656_v21 = vmul.f32 %v3631_v54, %v3357_v14  ;;  %v3666_v26 = vpack.c.bf16 %v3658_v46, %v3657_v62  ;;  %v3651_v24 = vmul.f32 %v8020_v11, %v3352_v4  ;;  %v1493_v11 = vadd.f32 %v8027_v59, %v8018_v35  ;;  %v3751_v54 = vld [vmem:[#allocation3 + $0x8] sm:$0xff] }
 0x3d1   : > { %v3662_v33 = vpack.c.bf16 %v3650_v8, %v3649_v27  ;;  %v3346_v13 = vmul.f32 %v3277_v61, %v1498_v12  ;;  %v1490_v34 = vadd.f32 %v8027_v59, %v8014_v53  ;;  %v3647_v58 = vmul.f32 %v8006_v29, %v3348_v10  ;;  %v3746_v59 = vld [vmem:[#allocation3] sm:$0xff]  ;;  %v3758_v10 = vld [vmem:[#allocation3 + $0x70] sm:$0xff] }
 0x3d2   : > { %5227 = vmatprep.subr.bf16.mxu1 %v3666_v26  ;;  %v3665_v19 = vpack.c.bf16 %v3656_v21, %v3655_v52  ;;  %v3663_v48 = vpack.c.bf16 %v3652_v37, %v3651_v24  ;;  %v3272_v39 = vpop.permute.xlu1 %3271  ;;  %v3646_v6 = vmul.f32 %v8000_v1, %v3347_v17  ;;  %v3267_v62 = vpop.permute.xlu0 %3266  ;;  %v3748_v1 = vld [vmem:[#allocation3 + $0x18] sm:$0xff]  ;;  %v3752_v52 = vld [vmem:[#allocation3 + $0x48] sm:$0xff]  ;;  %v3757_v8 = vld [vmem:[#allocation3 + $0x60] sm:$0xff] }
 0x3d3   : > { %5228 = vmatpush3.bf16.msra.mxu1 %v3666_v26  ;;  %v3345_v16 = vmul.f32 %v3272_v39, %v1493_v11  ;;  %v3661_v32 = vpack.c.bf16 %v3648_v5, %v3647_v58  ;;  %v3645_v35 = vmul.f32 %v7996_v63, %v3346_v13  ;;  %v3344_v46 = vmul.f32 %v3267_v62, %v1490_v34 }
 0x3d4   : > { %5229 = vmatprep.subr.bf16.mxu1 %v3665_v19 }
 0x3d5   : > { %v3644_v23 = vmul.f32 %v8002_v41, %v3345_v16  ;;  %v3660_v14 = vpack.c.bf16 %v3646_v6, %v3645_v35  ;;  %v3643_v53 = vmul.f32 %v7998_v22, %v3344_v46 }
 0x3d7   : > { %5230 = vmatpush3.bf16.msra.mxu1 %v3665_v19  ;;  %v3659_v29 = vpack.c.bf16 %v3644_v23, %v3643_v53 }
 0x3d8   : > { %5231 = vmatprep.subr.bf16.mxu1 %v3664_v28 }
 0x3db   : > { %5232 = vmatpush3.bf16.msra.mxu1 %v3664_v28  ;;  %v3754_v28 = vld [vmem:[#allocation3 + $0x20] sm:$0xff] }
 0x3dc   : > { %5233 = vmatprep.subr.bf16.mxu1 %v3663_v48 }
 0x3df   : > { %5234 = vmatpush3.bf16.msra.mxu1 %v3663_v48 }
 0x3e0   : > { %5235 = vmatprep.subr.bf16.mxu1 %v3662_v33 }
 0x3e3   : > { %5236 = vmatpush3.bf16.msra.mxu1 %v3662_v33 }
 0x3e4   : > { %5237 = vmatprep.subr.bf16.mxu1 %v3661_v32 }
 0x3e7   : > { %5238 = vmatpush3.bf16.msra.mxu1 %v3661_v32 }
 0x3e8   : > { %5239 = vmatprep.subr.bf16.mxu1 %v3660_v14 }
 0x3eb   : > { %5240 = vmatpush3.bf16.msra.mxu1 %v3660_v14 }
 0x3ec   : > { %5241 = vmatprep.subr.bf16.mxu1 %v3659_v29 }
 0x3ef   : > { %5242 = vmatpush3.bf16.msra.mxu1 %v3659_v29 }
 0x3f2   : > { %5244 = vmatmul.mubr.msk.bf16.vlgmr.msra.gmra.mxu1 %vm7968_vm14, %v5731_v50 }
 0x3f3   : > { %5247 = vmatprep.mubr.msk.bf16.mxu1 %vm7972_vm1, %v5731_v50 }
 0x3fa   : > { %5248 = vmatmul.mubr.msk.bf16.gmra.mxu1 %vm7976_vm11, %v5731_v50 }
 0x3fb   : > { %5251 = vmatprep.mubr.msk.bf16.mxu1 %vm7980_vm4, %v5731_v50 }
 0x402   : > { %5252 = vmatmul.mubr.msk.bf16.gmra.mxu1 %vm7984_vm7, %v5731_v50 }
 0x403   : > { %5255 = vmatprep.mubr.msk.bf16.mxu1 %vm7988_vm12, %v5731_v50 }
 0x40a   : > { %5256 = vmatmul.mubr.msk.bf16.gmra.mxu1 %vm7992_vm0, %v5731_v50 }
 0x4b2   : > { %v5245_v57 = vpop.f32.mrf.mxu1 }
 0x4b3   : > { %v3860_v63 = vadd.f32 %v5245_v57, %v3747_v3 }
 0x4b4   : > { %v3795_v22 = vpop.f32.mrf.mxu1 }
 0x4b5   : > { %3876 = vst [vmem:[#allocation3 + $0x58] sm:$0xff] %v3860_v63  ;;  %v3858_v60 = vadd.f32 %v3795_v22, %v3745_v25 }
 0x4b6   : > { %v5246_v41 = vpop.f32.mrf.mxu1 }
 0x4b7   : > { %3874 = vst [vmem:[#allocation3 + $0x30] sm:$0xff] %v3858_v60  ;;  %v3861_v55 = vadd.f32 %v5246_v41, %v3748_v1 }
 0x4b8   : > { %v3798_v56 = vpop.f32.mrf.mxu1 }
 0x4b9   : > { %3877 = vst [vmem:[#allocation3 + $0x18] sm:$0xff] %v3861_v55  ;;  %v3859_v43 = vadd.f32 %v3798_v56, %v3746_v59 }
 0x4ba   : > { %v5249_v20 = vpop.f32.mrf.mxu1 }
 0x4bb   : > { %3875 = vst [vmem:[#allocation3] sm:$0xff] %v3859_v43  ;;  %v3864_v50 = vadd.f32 %v5249_v20, %v3751_v54 }
 0x4bc   : > { %v3811_v38 = vpop.f32.mrf.mxu1 }
 0x4bd   : > { %3880 = vst [vmem:[#allocation3 + $0x8] sm:$0xff] %v3864_v50  ;;  %v3862_v21 = vadd.f32 %v3811_v38, %v3749_v18 }
 0x4be   : > { %v5250_v26 = vpop.f32.mrf.mxu1 }
 0x4bf   : > { %3878 = vst [vmem:[#allocation3 + $0x50] sm:$0xff] %v3862_v21  ;;  %v3865_v44 = vadd.f32 %v5250_v26, %v3752_v52 }
 0x4c0   : > { %v3814_v15 = vpop.f32.mrf.mxu1 }
 0x4c1   : > { %3881 = vst [vmem:[#allocation3 + $0x48] sm:$0xff] %v3865_v44  ;;  %v3863_v19 = vadd.f32 %v3814_v15, %v3750_v31 }
 0x4c2   : > { %v5253_v51 = vpop.f32.mrf.mxu1 }
 0x4c3   : > { %3879 = vst [vmem:[#allocation3 + $0x68] sm:$0xff] %v3863_v19  ;;  %v3868_v4 = vadd.f32 %v5253_v51, %v3755_v36 }
 0x4c4   : > { %v3827_v30 = vpop.f32.mrf.mxu1 }
 0x4c5   : > { %3884 = vst [vmem:[#allocation3 + $0x10] sm:$0xff] %v3868_v4  ;;  %v3866_v49 = vadd.f32 %v3827_v30, %v3753_v0 }
 0x4c6   : > { %v5254_v37 = vpop.f32.mrf.mxu1 }
 0x4c7   : > { %3882 = vst [vmem:[#allocation3 + $0x40] sm:$0xff] %v3866_v49  ;;  %v3869_v2 = vadd.f32 %v5254_v37, %v3756_v47 }
 0x4c8   : > { %v3830_v42 = vpop.f32.mrf.mxu1 }
 0x4c9   : > { %3885 = vst [vmem:[#allocation3 + $0x38] sm:$0xff] %v3869_v2  ;;  %v3867_v24 = vadd.f32 %v3830_v42, %v3754_v28 }
 0x4ca   : > { %v5257_v40 = vpop.f32.mrf.mxu1 }
 0x4cb   : > { %3883 = vst [vmem:[#allocation3 + $0x20] sm:$0xff] %v3867_v24  ;;  %v3872_v9 = vadd.f32 %v5257_v40, %v3759_v45 }
 0x4cc   : > { %v3843_v48 = vpop.f32.mrf.mxu1 }
 0x4cd   : > { %3888 = vst [vmem:[#allocation3 + $0x78] sm:$0xff] %v3872_v9  ;;  %v3870_v12 = vadd.f32 %v3843_v48, %v3757_v8 }
 0x4ce   : > { %v5258_v27 = vpop.f32.mrf.mxu1 }
 0x4cf   : > { %3886 = vst [vmem:[#allocation3 + $0x60] sm:$0xff] %v3870_v12  ;;  %v3873_v61 = vadd.f32 %v5258_v27, %v3760_v7  ;;  %3893 = sbr.rel (%p4885_p6) target bundleno = 1763 (0x6e3), region = 84 }
 0x4d0   : > { %v3846_v17 = vpop.f32.mrf.mxu1 }
 0x4d1   : > { %3889 = vst [vmem:[#allocation3 + $0x28] sm:$0xff] %v3873_v61  ;;  %v3871_v11 = vadd.f32 %v3846_v17, %v3758_v10 }
 0x4d3   : > { %3887 = vst [vmem:[#allocation3 + $0x70] sm:$0xff] %v3871_v11 }
 0x4d4   : > { %v5607_v5 = vld [vmem:[%s8540_s10 + $0x38] sm:$0xff]   ;;  %v5608_v33 = vld [vmem:[%s8540_s10 + $0x30] sm:$0xff]   ;;  %v5609_v13 = vld [vmem:[%s8540_s10 + $0x28] sm:$0xff]  }
 0x4d5   : > { %5259 = vmatprep.subr.bf16.mxu0 %v5607_v5  ;;  %v5610_v34 = vld [vmem:[%s8540_s10 + $0x20] sm:$0xff]   ;;  %v3894_v58 = vld [vmem:[#allocation3 + $0x30] sm:$0xff]  ;;  %v5611_v16 = vld [vmem:[%s8540_s10 + $0x18] sm:$0xff]  }
 0x4d6   : > { %5260 = vmatpush3.bf16.msra.mxu0 %v5607_v5  ;;  %v3895_v39 = vld [vmem:[#allocation3] sm:$0xff]  ;;  %v5612_v32 = vld [vmem:[%s8540_s10 + $0x10] sm:$0xff]   ;;  %v5613_v62 = vld [vmem:[%s8540_s10 + $0x8] sm:$0xff]  }
 0x4d7   : > { %5261 = vmatprep.subr.bf16.mxu0 %v5608_v33  ;;  %v3910_v6 = vpack.c.bf16 %v3895_v39, %v3894_v58  ;;  %v5614_v35 = vld [vmem:[%s8540_s10] sm:$0xff]   ;;  %v3896_v46 = vld [vmem:[#allocation3 + $0x58] sm:$0xff]  ;;  %v3898_v14 = vld [vmem:[#allocation3 + $0x50] sm:$0xff] }
 0x4d8   : > { %v3897_v23 = vld [vmem:[#allocation3 + $0x18] sm:$0xff]  ;;  %v3899_v53 = vld [vmem:[#allocation3 + $0x68] sm:$0xff]  ;;  %v3902_v63 = vld [vmem:[#allocation3 + $0x40] sm:$0xff] }
 0x4d9   : > { %5275 = vmatprep.mubr.bf16.mxu0 %v3910_v6  ;;  %v3911_v29 = vpack.c.bf16 %v3897_v23, %v3896_v46  ;;  %v3912_v3 = vpack.c.bf16 %v3899_v53, %v3898_v14  ;;  %v3900_v57 = vld [vmem:[#allocation3 + $0x8] sm:$0xff]  ;;  %v3903_v22 = vld [vmem:[#allocation3 + $0x20] sm:$0xff]  ;;  %v3904_v41 = vld [vmem:[#allocation3 + $0x10] sm:$0xff] }
 0x4da   : > { %5262 = vmatpush3.bf16.msra.mxu0 %v5608_v33  ;;  %v3901_v25 = vld [vmem:[#allocation3 + $0x48] sm:$0xff]  ;;  %v3914_v60 = vpack.c.bf16 %v3903_v22, %v3902_v63  ;;  %v3905_v59 = vld [vmem:[#allocation3 + $0x38] sm:$0xff]  ;;  %v3906_v55 = vld [vmem:[#allocation3 + $0x60] sm:$0xff] }
 0x4db   : > { %5263 = vmatprep.subr.bf16.mxu0 %v5609_v13  ;;  %v3913_v1 = vpack.c.bf16 %v3901_v25, %v3900_v57  ;;  %v3907_v56 = vld [vmem:[#allocation3 + $0x70] sm:$0xff]  ;;  %v3915_v54 = vpack.c.bf16 %v3905_v59, %v3904_v41  ;;  %v3908_v20 = vld [vmem:[#allocation3 + $0x78] sm:$0xff]  ;;  %v3909_v18 = vld [vmem:[#allocation3 + $0x28] sm:$0xff] }
 0x4dc   : > { %v3916_v43 = vpack.c.bf16 %v3907_v56, %v3906_v55  ;;  %v3917_v50 = vpack.c.bf16 %v3909_v18, %v3908_v20  ;;  %v5615_v38 = vld [vmem:[%s8542_s12 + $0x38] sm:$0xff]   ;;  %v5616_v52 = vld [vmem:[%s8542_s12 + $0x30] sm:$0xff]   ;;  %v5617_v21 = vld [vmem:[%s8542_s12 + $0x28] sm:$0xff]  }
 0x4dd   : > { %5291 = vmatprep.subr.bf16.mxu1 %v5615_v38  ;;  %v5618_v26 = vld [vmem:[%s8542_s12 + $0x20] sm:$0xff]   ;;  %v5619_v31 = vld [vmem:[%s8542_s12 + $0x18] sm:$0xff]   ;;  %v5620_v44 = vld [vmem:[%s8542_s12 + $0x10] sm:$0xff]  }
 0x4de   : > { %5264 = vmatpush3.bf16.msra.mxu0 %v5609_v13  ;;  %5292 = vmatpush3.bf16.msra.mxu1 %v5615_v38  ;;  %v5621_v15 = vld [vmem:[%s8542_s12 + $0x8] sm:$0xff]   ;;  %v5622_v36 = vld [vmem:[%s8542_s12] sm:$0xff]  }
 0x4df   : > { %5265 = vmatprep.subr.bf16.mxu0 %v5610_v34  ;;  %5293 = vmatprep.subr.bf16.mxu1 %v5616_v52  ;;  %v8132_v51 = vld [vmem:[%s8541_s11] ss:$0 sm:$0xff] }
 0x4e2   : > { %5266 = vmatpush3.bf16.msra.mxu0 %v5610_v34  ;;  %5294 = vmatpush3.bf16.msra.mxu1 %v5616_v52 }
 0x4e3   : > { %5267 = vmatprep.subr.bf16.mxu0 %v5611_v16  ;;  %5295 = vmatprep.subr.bf16.mxu1 %v5617_v21 }
 0x4e6   : > { %5268 = vmatpush3.bf16.msra.mxu0 %v5611_v16  ;;  %5296 = vmatpush3.bf16.msra.mxu1 %v5617_v21 }
 0x4e7   : > { %5269 = vmatprep.subr.bf16.mxu0 %v5612_v32  ;;  %5297 = vmatprep.subr.bf16.mxu1 %v5618_v26 }
 0x4ea   : > { %5270 = vmatpush3.bf16.msra.mxu0 %v5612_v32  ;;  %5298 = vmatpush3.bf16.msra.mxu1 %v5618_v26 }
 0x4eb   : > { %5271 = vmatprep.subr.bf16.mxu0 %v5613_v62  ;;  %5299 = vmatprep.subr.bf16.mxu1 %v5619_v31 }
 0x4ee   : > { %5272 = vmatpush3.bf16.msra.mxu0 %v5613_v62  ;;  %5300 = vmatpush3.bf16.msra.mxu1 %v5619_v31 }
 0x4ef   : > { %5273 = vmatprep.subr.bf16.mxu0 %v5614_v35  ;;  %5301 = vmatprep.subr.bf16.mxu1 %v5620_v44 }
 0x4f2   : > { %5274 = vmatpush3.bf16.msra.mxu0 %v5614_v35  ;;  %5302 = vmatpush3.bf16.msra.mxu1 %v5620_v44 }
 0x4f3   : > { %5303 = vmatprep.subr.bf16.mxu1 %v5621_v15 }
 0x4f5   : > { %5276 = vmatmul.mubr.bf16.vlgmr.msra.gmra.mxu0 %v3911_v29 }
 0x4f6   : > { %5279 = vmatprep.mubr.bf16.mxu0 %v3912_v3  ;;  %5304 = vmatpush3.bf16.msra.mxu1 %v5621_v15 }
 0x4f7   : > { %5305 = vmatprep.subr.bf16.mxu1 %v5622_v36 }
 0x4fa   : > { %5306 = vmatpush3.bf16.msra.mxu1 %v5622_v36 }
 0x4fd   : > { %5280 = vmatmul.mubr.bf16.gmra.mxu0 %v3913_v1 }
 0x4fe   : > { %5283 = vmatprep.mubr.bf16.mxu0 %v3914_v60 }
 0x505   : > { %5284 = vmatmul.mubr.bf16.gmra.mxu0 %v3915_v54 }
 0x506   : > { %5287 = vmatprep.mubr.bf16.mxu0 %v3916_v43 }
 0x50d   : > { %5288 = vmatmul.mubr.bf16.gmra.mxu0 %v3917_v50 }
 0x5b5   : > { %v5277_v19 = vpop.f32.mrf.mxu0 }
 0x5b6   : > { %v8135_v4 = vadd.f32 %v5277_v19, %v8132_v51 }
 0x5b7   : > { %v4023_v0 = vpop.f32.mrf.mxu0 }
 0x5b8   : > { %v4136_v49 = vand.u32 2147483647, %v8135_v4  ;;  %v8158_v13 = vadd.f32 %v8132_v51, %v4023_v0  ;;  %vm4104_vm7 = vcmp.ne.f32.partialorder %v8135_v4, %v8135_v4 }
 0x5b9   : > { %v5278_v30 = vpop.f32.mrf.mxu0 }
 0x5ba   : > { %v8139_v37 = vadd.f32 %v5278_v30, %v8132_v51  ;;  %v4152_v45 = vsub.f32 0.0, %v4136_v49  ;;  %v4134_v46 = vand.u32 2147483647, %v8158_v13  ;;  %vm4102_vm6 = vcmp.ne.f32.partialorder %v8158_v13, %v8158_v13 }
 0x5bb   : > { %v4026_v47 = vpop.f32.mrf.mxu0 }
 0x5bc   : > { %v4137_v24 = vand.u32 2147483647, %v8139_v37  ;;  %v4170_v12 = vmul.f32 1.442695, %v4152_v45  ;;  %v8166_v23 = vadd.f32 %v8132_v51, %v4026_v47  ;;  %v4150_v22 = vsub.f32 0.0, %v4134_v46 }
 0x5bd   : > { %v5281_v28 = vpop.f32.mrf.mxu0  ;;  %vm4105_vm5 = vcmp.ne.f32.partialorder %v8139_v37, %v8139_v37 }
 0x5be   : > { %v8142_v2 = vadd.f32 %v5281_v28, %v8132_v51  ;;  %v4153_v27 = vsub.f32 0.0, %v4137_v24  ;;  %5623 = vpow2.f32 %v4170_v12  ;;  %v4135_v1 = vand.u32 2147483647, %v8166_v23 }
 0x5bf   : > { %v4039_v42 = vpop.f32.mrf.mxu0  ;;  %v4166_v20 = vmul.f32 1.442695, %v4150_v22  ;;  %vm4103_vm12 = vcmp.ne.f32.partialorder %v8166_v23, %v8166_v23 }
 0x5c0   : > { %v8146_v8 = vadd.f32 %v8132_v51, %v4039_v42  ;;  %v4140_v9 = vand.u32 2147483647, %v8142_v2  ;;  %v4172_v58 = vmul.f32 1.442695, %v4153_v27  ;;  %v4151_v18 = vsub.f32 0.0, %v4135_v1 }
 0x5c1   : > { %v5282_v40 = vpop.f32.mrf.mxu0  ;;  %v4088_v27 = vmax.f32 %v8135_v4, 0.0 }
 0x5c2   : > { %v8153_v10 = vadd.f32 %v5282_v40, %v8132_v51  ;;  %v4138_v17 = vand.u32 2147483647, %v8146_v8  ;;  %v4156_v5 = vsub.f32 0.0, %v4140_v9  ;;  %5625 = vpow2.f32 %v4172_v58 }
 0x5c3   : > { %v4042_v48 = vpop.f32.mrf.mxu0  ;;  %v4168_v44 = vmul.f32 1.442695, %v4151_v18  ;;  %v4090_v46 = vmax.f32 %v8146_v8, 0.0  ;;  %vm4106_vm9 = vcmp.ne.f32.partialorder %v8146_v8, %v8146_v8 }
 0x5c4   : > { %v8150_v7 = vadd.f32 %v8132_v51, %v4042_v48  ;;  %v4141_v39 = vand.u32 2147483647, %v8153_v10  ;;  %v4154_v16 = vsub.f32 0.0, %v4138_v17  ;;  %v4178_v32 = vmul.f32 1.442695, %v4156_v5 }
 0x5c5   : > { %v5285_v61 = vpop.f32.mrf.mxu0  ;;  %v4089_v5 = vmax.f32 %v8139_v37, 0.0 }
 0x5c6   : > { %v4139_v11 = vand.u32 2147483647, %v8150_v7  ;;  %v4157_v53 = vsub.f32 0.0, %v4141_v39  ;;  %v4174_v29 = vmul.f32 1.442695, %v4154_v16  ;;  %v8169_v3 = vadd.f32 %v5285_v61, %v8132_v51 }
 0x5c7   : > { %v4055_v33 = vpop.f32.mrf.mxu0  ;;  %5627 = vpow2.f32 %v4178_v32  ;;  %v4086_v61 = vmax.f32 %v8158_v13, 0.0  ;;  %v4087_v32 = vmax.f32 %v8166_v23, 0.0  ;;  %vm4107_vm4 = vcmp.ne.f32.partialorder %v8150_v7, %v8150_v7 }
 0x5c8   : > { %v4155_v34 = vsub.f32 0.0, %v4139_v11  ;;  %v8162_v62 = vadd.f32 %v8132_v51, %v4055_v33  ;;  %v4180_v41 = vmul.f32 1.442695, %v4157_v53  ;;  %v4144_v55 = vand.u32 2147483647, %v8169_v3 }
 0x5c9   : > { %v5286_v6 = vpop.f32.mrf.mxu0  ;;  %v4093_v53 = vmax.f32 %v8153_v10, 0.0 }
 0x5ca   : > { %v4176_v14 = vmul.f32 1.442695, %v4155_v34  ;;  %v4142_v63 = vand.u32 2147483647, %v8162_v62  ;;  %v8177_v60 = vadd.f32 %v5286_v6, %v8132_v51  ;;  %v4160_v26 = vsub.f32 0.0, %v4144_v55 }
 0x5cb   : > { %v4058_v35 = vpop.f32.mrf.mxu0  ;;  %v8185_v21 = vpop.eup %5623 }
 0x5cc   : > { %v8172_v57 = vadd.f32 %v8132_v51, %v4058_v35  ;;  %5629 = vpow2.f32 %v4176_v14  ;;  %v4158_v54 = vsub.f32 0.0, %v4142_v63  ;;  %v4145_v50 = vand.u32 2147483647, %v8177_v60 }
 0x5cd   : > { %v5289_v25 = vpop.f32.mrf.mxu0  ;;  %5631 = vpow2.f32 %v4174_v29  ;;  %v4216_v36 = vadd.f32 1.0, %v8185_v21  ;;  %v4186_v30 = vmul.f32 1.442695, %v4160_v26  ;;  %v4219_v11 = vmul.f32 -0.5, %v8185_v21 }
 0x5ce   : > { %v4143_v59 = vand.u32 2147483647, %v8172_v57  ;;  %5633 = vpow2.f32 %v4180_v41  ;;  %v4182_v31 = vmul.f32 1.442695, %v4158_v54  ;;  %v4161_v15 = vsub.f32 0.0, %v4145_v50 }
 0x5cf   : > { %v4071_v56 = vpop.f32.mrf.mxu0  ;;  %v8189_v0 = vpop.eup %5625  ;;  %v8192_v47 = vadd.f32 %v5289_v25, %v8132_v51  ;;  %v4092_v35 = vmax.f32 %v8142_v2, 0.0  ;;  %v4091_v29 = vmax.f32 %v8150_v7, 0.0  ;;  %v4220_v22 = vadd.f32 1.0, %v4219_v11 }
 0x5d0   : > { %v4159_v43 = vsub.f32 0.0, %v4143_v59  ;;  %v8183_v52 = vadd.f32 %v8132_v51, %v4071_v56  ;;  %v4188_v28 = vmul.f32 1.442695, %v4161_v15  ;;  %v4225_v45 = vadd.f32 1.0, %v8189_v0 }
 0x5d1   : > { %v4148_v40 = vand.u32 2147483647, %v8192_v47  ;;  %v5290_v12 = vpop.f32.mrf.mxu0  ;;  %v4228_v58 = vmul.f32 -0.5, %v8189_v0  ;;  %v4222_v1 = vand.u32 2147483647, %v8185_v21 }
 0x5d2   : > { %v4184_v38 = vmul.f32 1.442695, %v4159_v43  ;;  %v4146_v19 = vand.u32 2147483647, %v8183_v52  ;;  %v8213_v16 = vadd.f32 %v5290_v12, %v8132_v51  ;;  %v4231_v43 = vand.u32 2147483647, %v8189_v0 }
 0x5d3   : > { %v4164_v6 = vsub.f32 0.0, %v4148_v40  ;;  %v4074_v59 = vpop.f32.mrf.mxu0  ;;  %v4229_v55 = vadd.f32 1.0, %v4228_v58  ;;  %vm8241_vm14 = vcmp.lt.f32.partialorder %v4222_v1, 0.0004427343 }
 0x5d4   : > { %5635 = vpow2.f32 %v4184_v38  ;;  %v8194_v49 = vpop.eup %5627  ;;  %v4162_v24 = vsub.f32 0.0, %v4146_v19  ;;  %v4149_v54 = vand.u32 2147483647, %v8213_v16  ;;  %vm8256_vm1 = vcmp.lt.f32.partialorder %v4231_v43, 0.0004427343 }
 0x5d5   : > { %5637 = vpow2.f32 %v4166_v20  ;;  %v4252_v48 = vadd.f32 1.0, %v8194_v49  ;;  %v4194_v56 = vmul.f32 1.442695, %v4164_v6  ;;  %v4255_v26 = vmul.f32 -0.5, %v8194_v49 }
 0x5d6   : > { %5639 = vpow2.f32 %v4182_v31  ;;  %v4190_v33 = vmul.f32 1.442695, %v4162_v24  ;;  %v4165_v31 = vsub.f32 0.0, %v4149_v54  ;;  %v4221_v24 = vmul.f32 %v8185_v21, %v4220_v22 }
 0x5d7   : > { %5641 = vpow2.f32 %v4168_v44  ;;  %v8236_v44 = vadd.f32 %v8132_v51, %v4074_v59  ;;  %v8249_v40 = vmul.f32 %v8189_v0, %v4229_v55  ;;  %v4095_v51 = vmax.f32 %v8172_v57, 0.0 }
 0x5d8   : > { %5643 = vlog2.f32 %v4216_v36  ;;  %v4258_v12 = vand.u32 2147483647, %v8194_v49  ;;  %v4196_v11 = vmul.f32 1.442695, %v4165_v31  ;;  %v4256_v58 = vadd.f32 1.0, %v4255_v26 }
 0x5d9   : > { %v8196_v42 = vpop.eup %5629  ;;  %5645 = vpow2.f32 %v4186_v30  ;;  %v4147_v0 = vand.u32 2147483647, %v8236_v44 }
 0x5da   : > { %v8200_v9 = vpop.eup %5631  ;;  %v4243_v17 = vadd.f32 1.0, %v8196_v42  ;;  %5647 = vpow2.f32 %v4188_v28  ;;  %v4246_v59 = vmul.f32 -0.5, %v8196_v42  ;;  %v4249_v43 = vand.u32 2147483647, %v8196_v42 }
 0x5db   : > { %5649 = vlog2.f32 %v4225_v45  ;;  %v8208_v34 = vpop.eup %5633  ;;  %v4234_v39 = vadd.f32 1.0, %v8200_v9  ;;  %v4237_v30 = vmul.f32 -0.5, %v8200_v9  ;;  %v4240_v21 = vand.u32 2147483647, %v8200_v9 }
 0x5dc   : > { %5651 = vlog2.f32 %v4252_v48  ;;  %v4261_v41 = vadd.f32 1.0, %v8208_v34  ;;  %v4264_v28 = vmul.f32 -0.5, %v8208_v34  ;;  %vm8273_vm8 = vcmp.lt.f32.partialorder %v4258_v12, 0.0004427343 }
 0x5dd   : > { %5653 = vlog2.f32 %v4243_v17  ;;  %v4238_v22 = vadd.f32 1.0, %v4237_v30  ;;  %vm8284_vm11 = vcmp.lt.f32.partialorder %v4240_v21, 0.0004427343  ;;  %v4247_v18 = vadd.f32 1.0, %v4246_v59 }
 0x5de   : > { %5655 = vpow2.f32 %v4190_v33  ;;  %v4265_v1 = vadd.f32 1.0, %v4264_v28  ;;  %v4267_v28 = vand.u32 2147483647, %v8208_v34  ;;  %vm8294_vm2 = vcmp.lt.f32.partialorder %v4249_v43, 0.0004427343 }
 0x5df   : > { %5657 = vlog2.f32 %v4234_v39  ;;  %v8282_v26 = vmul.f32 %v8200_v9, %v4238_v22  ;;  %v4248_v33 = vmul.f32 %v8196_v42, %v4247_v18 }
 0x5e0   : > { %5659 = vlog2.f32 %v4261_v41  ;;  %vm8313_vm3 = vcmp.lt.f32.partialorder %v4267_v28, 0.0004427343 }
 0x5e1   : > { %v8218_v14 = vpop.eup %5635  ;;  %5661 = vpow2.f32 %v4194_v56  ;;  %v4163_v56 = vsub.f32 0.0, %v4147_v0 }
 0x5e2   : > { %v8223_v63 = vpop.eup %5637  ;;  %v4279_v50 = vadd.f32 1.0, %v8218_v14  ;;  %v4285_v20 = vand.u32 2147483647, %v8218_v14 }
 0x5e3   : > { %v8232_v38 = vpop.eup %5639  ;;  %v4198_v15 = vadd.f32 1.0, %v8223_v63 }
 0x5e4   : > { %v8239_v36 = vpop.eup %5641  ;;  %v4270_v17 = vadd.f32 1.0, %v8232_v38  ;;  %5663 = vlog2.f32 %v4279_v50  ;;  %vm8382_vm0 = vcmp.lt.f32.partialorder %v4285_v20, 0.0004427343 }
 0x5e5   : > { %v5644_v45 = vpop.eup %5643  ;;  %5665 = vlog2.f32 %v4198_v15  ;;  %v4207_v54 = vadd.f32 1.0, %v8239_v36  ;;  %v8271_v15 = vmul.f32 %v8194_v49, %v4256_v58  ;;  %v8291_v58 = vmul.f32 %v8208_v34, %v4265_v1 }
 0x5e6   : > { %v8252_v48 = vpop.eup %5645  ;;  %v4218_v6 = vmul.f32 0.6931472, %v5644_v45  ;;  %5667 = vpow2.f32 %v4196_v11  ;;  %v4192_v11 = vmul.f32 1.442695, %v4163_v56  ;;  %v4201_v56 = vmul.f32 -0.5, %v8223_v63 }
 0x5e7   : > { %v8262_v39 = vpop.eup %5647  ;;  %v4288_v55 = vadd.f32 1.0, %v8252_v48  ;;  %v4291_v50 = vmul.f32 -0.5, %v8252_v48  ;;  %5669 = vlog2.f32 %v4270_v17  ;;  %v4273_v34 = vmul.f32 -0.5, %v8232_v38 }
 0x5e8   : > { %v5650_v41 = vpop.eup %5649  ;;  %v4297_v45 = vadd.f32 1.0, %v8262_v39  ;;  %v4224_v25 = vsel %vm8241_vm14, %v4221_v24, %v4218_v6  ;;  %5671 = vlog2.f32 %v4207_v54  ;;  %v4300_v22 = vmul.f32 -0.5, %v8262_v39 }
 0x5e9   : > { %v5652_v31 = vpop.eup %5651  ;;  %v4227_v17 = vmul.f32 0.6931472, %v5650_v41  ;;  %5673 = vlog2.f32 %v4288_v55  ;;  %v4292_v9 = vadd.f32 1.0, %v4291_v50  ;;  %v8301_v6 = vadd.f32 %v4224_v25, %v4088_v27 }
 0x5ea   : > { %v5654_v0 = vpop.eup %5653  ;;  %5675 = vpow2.f32 %v4192_v11  ;;  %v4254_v41 = vmul.f32 0.6931472, %v5652_v31  ;;  %v4276_v50 = vand.u32 2147483647, %v8232_v38  ;;  %v4282_v27 = vmul.f32 -0.5, %v8218_v14 }
 0x5eb   : > { %v8288_v12 = vpop.eup %5655  ;;  %5677 = vlog2.f32 %v4297_v45  ;;  %v4233_v1 = vsel %vm8256_vm1, %v8249_v40, %v4227_v17  ;;  %v4245_v59 = vmul.f32 0.6931472, %v5654_v0  ;;  %v4202_v25 = vadd.f32 1.0, %v4201_v56 }
 0x5ec   : > { %v5658_v19 = vpop.eup %5657  ;;  %v4306_v55 = vadd.f32 1.0, %v8288_v12  ;;  %v8319_v40 = vmul.f32 %v8252_v48, %v4292_v9  ;;  %v4204_v31 = vand.u32 2147483647, %v8223_v63  ;;  %v4210_v0 = vmul.f32 -0.5, %v8239_v36 }
 0x5ed   : > { %v5660_v54 = vpop.eup %5659  ;;  %v4236_v43 = vmul.f32 0.6931472, %v5658_v19  ;;  %v4345_v56 = vadd.f32 %v4233_v1, %v4089_v5  ;;  %v4274_v28 = vadd.f32 1.0, %v4273_v34  ;;  %v4301_v19 = vadd.f32 1.0, %v4300_v22 }
 0x5ee   : > { %v8311_v11 = vpop.eup %5661  ;;  %v4303_v21 = vand.u32 2147483647, %v8262_v39  ;;  %v4260_v18 = vsel %vm8273_vm8, %v8271_v15, %v4254_v41  ;;  %v4251_v9 = vsel %vm8294_vm2, %v4248_v33, %v4245_v59  ;;  %5679 = vlog2.f32 %v4306_v55 }
 0x5ef   : > { %v4242_v15 = vsel %vm8284_vm11, %v8282_v26, %v4236_v43  ;;  %vm8347_vm10 = vcmp.lt.f32.partialorder %v4276_v50, 0.0004427343  ;;  %v4283_v24 = vadd.f32 1.0, %v4282_v27  ;;  %v4203_v22 = vmul.f32 %v8223_v63, %v4202_v25 }
 0x5f0   : > { %v4324_v1 = vadd.f32 1.0, %v8311_v11  ;;  %vm4205_vm13 = vcmp.lt.f32.partialorder %v4204_v31, 0.0004427343  ;;  %v4211_v59 = vadd.f32 1.0, %v4210_v0  ;;  %v4263_v49 = vmul.f32 0.6931472, %v5660_v54 }
 0x5f1   : > { %v5664_v17 = vpop.eup %5663  ;;  %v4347_v26 = vadd.f32 %v4251_v9, %v4091_v29  ;;  %v4213_v50 = vand.u32 2147483647, %v8239_v36  ;;  %v8361_v63 = vadd.f32 %v4260_v18, %v4092_v35  ;;  %v4275_v27 = vmul.f32 %v8232_v38, %v4274_v28 }
 0x5f2   : > { %v5666_v42 = vpop.eup %5665  ;;  %v8365_v25 = vmul.f32 %v8262_v39, %v4301_v19  ;;  %v4281_v33 = vmul.f32 0.6931472, %v5664_v17  ;;  %v4346_v54 = vadd.f32 %v4242_v15, %v4090_v46  ;;  %v4284_v0 = vmul.f32 %v8218_v14, %v4283_v24 }
 0x5f3   : > { %v8342_v5 = vpop.eup %5667  ;;  %v4200_v34 = vmul.f32 0.6931472, %v5666_v42  ;;  %v4212_v38 = vmul.f32 %v8239_v36, %v4211_v59  ;;  %v4269_v39 = vsel %vm8313_vm3, %v8291_v58, %v4263_v49  ;;  %vm8378_vm15 = vcmp.lt.f32.partialorder %v4303_v21, 0.0004427343 }
 0x5f4   : > { %v4333_v41 = vadd.f32 1.0, %v8342_v5  ;;  %v5670_v55 = vpop.eup %5669  ;;  %vm4214_vm14 = vcmp.lt.f32.partialorder %v4213_v50, 0.0004427343  ;;  %vm4109_vm1 = vcmp.ne.f32.partialorder %v8153_v10, %v8153_v10  ;;  %v4287_v58 = vsel %vm8382_vm0, %v4284_v0, %v4281_v33 }
 0x5f5   : > { %v4206_v43 = vsel %vm4205_vm13, %v4203_v22, %v4200_v34  ;;  %v5672_v31 = vpop.eup %5671  ;;  %v4272_v9 = vmul.f32 0.6931472, %v5670_v55  ;;  %v4361_v20 = vsel %vm4105_vm5, %v8139_v37, %v4345_v56  ;;  %vm4110_vm8 = vcmp.ne.f32.partialorder %v8162_v62, %v8162_v62 }
 0x5f6   : > { %5681 = vlog2.f32 %v4333_v41  ;;  %v4342_v29 = vadd.f32 %v4206_v43, %v4086_v61  ;;  %v5674_v42 = vpop.eup %5673  ;;  %v4209_v35 = vmul.f32 0.6931472, %v5672_v31  ;;  %v4363_v61 = vsel %vm4107_vm4, %v8150_v7, %v4347_v26 }
 0x5f7   : > { %5683 = vlog2.f32 %v4324_v1  ;;  %v8373_v28 = vpop.eup %5675  ;;  %v4360_v19 = vsel %vm4104_vm7, %v8135_v4, %v8301_v6  ;;  %v4362_v37 = vsel %vm4106_vm9, %v8146_v8, %v4346_v54  ;;  %vm4108_vm11 = vcmp.ne.f32.partialorder %v8142_v2, %v8142_v2 }
 0x5f8   : > { %v5678_v36 = vpop.eup %5677  ;;  %v4315_v21 = vadd.f32 1.0, %v8373_v28  ;;  %v4215_v45 = vsel %vm4214_vm14, %v4212_v38, %v4209_v35  ;;  %v4358_v17 = vsel %vm4102_vm6, %v8158_v13, %v4342_v29  ;;  %v4309_v56 = vmul.f32 -0.5, %v8288_v12 }
 0x5f9   : > { %v4343_v7 = vadd.f32 %v4215_v45, %v4087_v32  ;;  %v4278_v32 = vsel %vm8347_vm10, %v4275_v27, %v4272_v9  ;;  %v4900_v13 = vadd.f32 -0.6931472, %v4363_v61  ;;  %v4299_v18 = vmul.f32 0.6931472, %v5678_v36 }
 0x5fa   : > { %5685 = vlog2.f32 %v4315_v21  ;;  %v4351_v15 = vadd.f32 %v4287_v58, %v4095_v51  ;;  %v4898_v8 = vadd.f32 -0.6931472, %v4361_v20  ;;  %v4349_v6 = vadd.f32 %v4269_v39, %v4093_v53 }
 0x5fb   : > { %v4359_v4 = vsel %vm4103_vm12, %v8166_v23, %v4343_v7  ;;  %v4895_v24 = vadd.f32 -0.6931472, %v4358_v17  ;;  %v4899_v34 = vadd.f32 -0.6931472, %v4362_v37  ;;  %v5680_v22 = vpop.eup %5679  ;;  %v4290_v1 = vmul.f32 0.6931472, %v5674_v42 }
 0x5fc   : > { %v4896_v30 = vadd.f32 -0.6931472, %v4359_v4  ;;  %v8660_v41 = vmax.f32 %v8162_v62, 0.0  ;;  %v4327_v55 = vmul.f32 -0.5, %v8311_v11  ;;  %v4897_v51 = vadd.f32 -0.6931472, %v4360_v19 }
 0x5fd   : > { %v4310_v49 = vadd.f32 1.0, %v4309_v56  ;;  %v4392_v43 = vpack.c.bf16 %v4900_v13, %v4899_v34  ;;  %vm4111_vm2 = vcmp.ne.f32.partialorder %v8172_v57, %v8172_v57  ;;  %v4312_v23 = vand.u32 2147483647, %v8288_v12 }
 0x5fe   : > { %v4350_v59 = vadd.f32 %v4278_v32, %v8660_v41  ;;  %v4390_v26 = vpack.c.bf16 %v4896_v30, %v4895_v24  ;;  %v4336_v53 = vmul.f32 -0.5, %v8342_v5  ;;  %v4391_v50 = vpack.c.bf16 %v4898_v8, %v4897_v51 }
 0x5ff   : > { %v4367_v27 = vsel %vm4111_vm2, %v8172_v57, %v4351_v15  ;;  %v4305_v33 = vsel %vm8378_vm15, %v8365_v25, %v4299_v18  ;;  %v4308_v31 = vmul.f32 0.6931472, %v5680_v22  ;;  %v4318_v54 = vmul.f32 -0.5, %v8373_v28 }
 0x600   : > { %5307 = vmatprep.mubr.bf16.mxu1 %v4390_v26  ;;  %v4365_v0 = vsel %vm4109_vm1, %v8153_v10, %v4349_v6  ;;  %v8661_v29 = vand.u32 2147483647, %v8252_v48  ;;  %v4328_v57 = vadd.f32 1.0, %v4327_v55  ;;  %v4101_v9 = vmax.f32 %v8213_v16, 0.0 }
 0x601   : > { %5308 = vmatmul.mubr.bf16.vlgmr.msra.gmra.mxu1 %v4391_v50  ;;  %v4366_v25 = vsel %vm4110_vm8, %v8162_v62, %v4350_v59  ;;  %v4311_v48 = vmul.f32 %v8288_v12, %v4310_v49  ;;  %v4364_v38 = vsel %vm4108_vm11, %v8142_v2, %v8361_v63  ;;  %v4904_v39 = vadd.f32 -0.6931472, %v4367_v27 }
 0x602   : > { %vm8447_vm3 = vcmp.lt.f32.partialorder %v8661_v29, 0.0004427343  ;;  %5311 = vmatprep.mubr.bf16.mxu1 %v4392_v43  ;;  %v8664_v14 = vmax.f32 %v8177_v60, 0.0  ;;  %vm8467_vm4 = vcmp.lt.f32.partialorder %v4312_v23, 0.0004427343  ;;  %v4337_v36 = vadd.f32 1.0, %v4336_v53 }
 0x603   : > { %v5682_v35 = vpop.eup %5681  ;;  %v4296_v10 = vsel %vm8447_vm3, %v8319_v40, %v4290_v1  ;;  %v4902_v40 = vadd.f32 -0.6931472, %v4365_v0  ;;  %v4314_v12 = vsel %vm8467_vm4, %v4311_v48, %v4308_v31  ;;  %v4339_v58 = vand.u32 2147483647, %v8342_v5 }
 0x604   : > { %v5684_v46 = vpop.eup %5683  ;;  %v4353_v61 = vadd.f32 %v4305_v33, %v8664_v14  ;;  %v4319_v21 = vadd.f32 1.0, %v4318_v54  ;;  %v4903_v45 = vadd.f32 -0.6931472, %v4366_v25  ;;  %v4335_v20 = vmul.f32 0.6931472, %v5682_v35 }
 0x605   : > { %v4321_v2 = vand.u32 2147483647, %v8373_v28  ;;  %v4901_v63 = vadd.f32 -0.6931472, %v4364_v38  ;;  %vm4112_vm5 = vcmp.ne.f32.partialorder %v8169_v3, %v8169_v3  ;;  %v8667_v7 = vmax.f32 %v8169_v3, 0.0 }
 0x606   : > { %v4326_v19 = vmul.f32 0.6931472, %v5684_v46  ;;  %v4330_v37 = vand.u32 2147483647, %v8311_v11  ;;  %v4394_v32 = vpack.c.bf16 %v4904_v39, %v4903_v45  ;;  %v8668_v13 = vmax.f32 %v8183_v52, 0.0 }
 0x607   : > { %v4352_v17 = vadd.f32 %v4296_v10, %v8667_v7  ;;  %v5686_v56 = vpop.eup %5685  ;;  %v4338_v15 = vmul.f32 %v8342_v5, %v4337_v36  ;;  %v4393_v4 = vpack.c.bf16 %v4902_v40, %v4901_v63  ;;  %vm4113_vm6 = vcmp.ne.f32.partialorder %v8177_v60, %v8177_v60  ;;  %v4911_v54 = vld [vmem:[%s8543_s13] ss:$0 sm:$0xff] }
 0x608   : > { %v4354_v18 = vadd.f32 %v4314_v12, %v8668_v13  ;;  %vm8485_vm7 = vcmp.lt.f32.partialorder %v4339_v58, 0.0004427343  ;;  %v4317_v6 = vmul.f32 0.6931472, %v5686_v56  ;;  %v4320_v24 = vmul.f32 %v8373_v28, %v4319_v21 }
 0x609   : > { %v4369_v30 = vsel %vm4113_vm6, %v8177_v60, %v4353_v61  ;;  %v4329_v34 = vmul.f32 %v8311_v11, %v4328_v57  ;;  %v4341_v22 = vsel %vm8485_vm7, %v4338_v15, %v4335_v20  ;;  %v4099_v5 = vmax.f32 %v8236_v44, 0.0  ;;  %5312 = vmatmul.mubr.bf16.gmra.mxu1 %v4393_v4 }
 0x60a   : > { %vm4322_vm9 = vcmp.lt.f32.partialorder %v4321_v2, 0.0004427343  ;;  %vm4331_vm10 = vcmp.lt.f32.partialorder %v4330_v37, 0.0004427343  ;;  %5315 = vmatprep.mubr.bf16.mxu1 %v4394_v32  ;;  %v4368_v41 = vsel %vm4112_vm5, %v8169_v3, %v4352_v17  ;;  %vm4114_vm12 = vcmp.ne.f32.partialorder %v8183_v52, %v8183_v52 }
 0x60b   : > { %v4323_v1 = vsel %vm4322_vm9, %v4320_v24, %v4317_v6  ;;  %v4332_v60 = vsel %vm4331_vm10, %v4329_v34, %v4326_v19  ;;  %v4906_v28 = vadd.f32 -0.6931472, %v4369_v30  ;;  %v4370_v59 = vsel %vm4114_vm12, %v8183_v52, %v4354_v18 }
 0x60c   : > { %v4355_v11 = vadd.f32 %v4323_v1, %v4099_v5  ;;  %v4100_v55 = vmax.f32 %v8192_v47, 0.0  ;;  %v4357_v51 = vadd.f32 %v4341_v22, %v4101_v9  ;;  %vm4115_vm13 = vcmp.ne.f32.partialorder %v8236_v44, %v8236_v44 }
 0x60d   : > { %v4905_v49 = vadd.f32 -0.6931472, %v4368_v41  ;;  %v4907_v23 = vadd.f32 -0.6931472, %v4370_v59  ;;  %vm4117_vm15 = vcmp.ne.f32.partialorder %v8213_v16, %v8213_v16  ;;  %vm4116_vm0 = vcmp.ne.f32.partialorder %v8192_v47, %v8192_v47 }
 0x60e   : > { %v4371_v26 = vsel %vm4115_vm13, %v8236_v44, %v4355_v11  ;;  %v4356_v43 = vadd.f32 %v4332_v60, %v4100_v55  ;;  %v4373_v27 = vsel %vm4117_vm15, %v8213_v16, %v4357_v51 }
 0x60f   : > { %v4908_v3 = vadd.f32 -0.6931472, %v4371_v26  ;;  %v4395_v53 = vpack.c.bf16 %v4906_v28, %v4905_v49  ;;  %v4910_v33 = vadd.f32 -0.6931472, %v4373_v27 }
 0x610   : > { %v4372_v52 = vsel %vm4116_vm0, %v8192_v47, %v4356_v43 }
 0x611   : > { %v4396_v50 = vpack.c.bf16 %v4908_v3, %v4907_v23  ;;  %5316 = vmatmul.mubr.bf16.gmra.mxu1 %v4395_v53  ;;  %v4909_v31 = vadd.f32 -0.6931472, %v4372_v52 }
 0x613   : > { %5319 = vmatprep.mubr.bf16.mxu1 %v4396_v50  ;;  %v4397_v44 = vpack.c.bf16 %v4910_v33, %v4909_v31 }
 0x619   : > { %5320 = vmatmul.mubr.bf16.gmra.mxu1 %v4397_v44 }
 0x6c1   : > { %v5309_v0 = vpop.f32.mrf.mxu1 }
 0x6c2   : > { %v4512_v29 = vadd.f32 %v5309_v0, %v4911_v54 }
 0x6c3   : > { %v4503_v42 = vpop.f32.mrf.mxu1 }
 0x6c4   : > { %4568 = vst [vmem:[#allocation4 + $0x10] sm:$0xff] %v4512_v29  ;;  %v4504_v16 = vadd.f32 %v4911_v54, %v4503_v42 }
 0x6c5   : > { %v5310_v57 = vpop.f32.mrf.mxu1 }
 0x6c6   : > { %4566 = vst [vmem:[#allocation4] sm:$0xff] %v4504_v16  ;;  %v4515_v9 = vadd.f32 %v5310_v57, %v4911_v54 }
 0x6c7   : > { %v4506_v25 = vpop.f32.mrf.mxu1 }
 0x6c8   : > { %4569 = vst [vmem:[#allocation4 + $0x18] sm:$0xff] %v4515_v9  ;;  %v4507_v35 = vadd.f32 %v4911_v54, %v4506_v25 }
 0x6c9   : > { %v5313_v47 = vpop.f32.mrf.mxu1 }
 0x6ca   : > { %4567 = vst [vmem:[#allocation4 + $0x8] sm:$0xff] %v4507_v35  ;;  %v4528_v10 = vadd.f32 %v5313_v47, %v4911_v54 }
 0x6cb   : > { %v4519_v48 = vpop.f32.mrf.mxu1 }
 0x6cc   : > { %4572 = vst [vmem:[#allocation4 + $0x30] sm:$0xff] %v4528_v10  ;;  %v4520_v38 = vadd.f32 %v4911_v54, %v4519_v48 }
 0x6cd   : > { %v5314_v39 = vpop.f32.mrf.mxu1 }
 0x6ce   : > { %4570 = vst [vmem:[#allocation4 + $0x20] sm:$0xff] %v4520_v38  ;;  %v4531_v46 = vadd.f32 %v5314_v39, %v4911_v54 }
 0x6cf   : > { %v4522_v14 = vpop.f32.mrf.mxu1 }
 0x6d0   : > { %4573 = vst [vmem:[#allocation4 + $0x38] sm:$0xff] %v4531_v46  ;;  %v4523_v61 = vadd.f32 %v4911_v54, %v4522_v14 }
 0x6d1   : > { %v5317_v62 = vpop.f32.mrf.mxu1 }
 0x6d2   : > { %4571 = vst [vmem:[#allocation4 + $0x28] sm:$0xff] %v4523_v61  ;;  %v4544_v36 = vadd.f32 %v5317_v62, %v4911_v54 }
 0x6d3   : > { %v4535_v40 = vpop.f32.mrf.mxu1 }
 0x6d4   : > { %4576 = vst [vmem:[#allocation4 + $0x50] sm:$0xff] %v4544_v36  ;;  %v4536_v12 = vadd.f32 %v4911_v54, %v4535_v40 }
 0x6d5   : > { %v5318_v58 = vpop.f32.mrf.mxu1 }
 0x6d6   : > { %4574 = vst [vmem:[#allocation4 + $0x40] sm:$0xff] %v4536_v12  ;;  %v4547_v21 = vadd.f32 %v5318_v58, %v4911_v54 }
 0x6d7   : > { %v4538_v45 = vpop.f32.mrf.mxu1 }
 0x6d8   : > { %4577 = vst [vmem:[#allocation4 + $0x58] sm:$0xff] %v4547_v21  ;;  %v4539_v20 = vadd.f32 %v4911_v54, %v4538_v45 }
 0x6d9   : > { %v5321_v2 = vpop.f32.mrf.mxu1 }
 0x6da   : > { %4575 = vst [vmem:[#allocation4 + $0x48] sm:$0xff] %v4539_v20  ;;  %v4560_v63 = vadd.f32 %v5321_v2, %v4911_v54 }
 0x6db   : > { %v4551_v7 = vpop.f32.mrf.mxu1 }
 0x6dc   : > { %4580 = vst [vmem:[#allocation4 + $0x70] sm:$0xff] %v4560_v63  ;;  %v4552_v17 = vadd.f32 %v4911_v54, %v4551_v7 }
 0x6dd   : > { %v5322_v19 = vpop.f32.mrf.mxu1 }
 0x6de   : > { %4578 = vst [vmem:[#allocation4 + $0x60] sm:$0xff] %v4552_v17  ;;  %v4563_v37 = vadd.f32 %v5322_v19, %v4911_v54 }
 0x6df   : > { %v4554_v32 = vpop.f32.mrf.mxu1 }
 0x6e0   : > { %4581 = vst [vmem:[#allocation4 + $0x78] sm:$0xff] %v4563_v37  ;;  %v4555_v56 = vadd.f32 %v4911_v54, %v4554_v32 }
 0x6e2   : > { %4579 = vst [vmem:[#allocation4 + $0x68] sm:$0xff] %v4555_v56 }
 0x6e3 PF: > { %p5407_p7 = scmp.eq.s32.totalorder %s5816_s30, 1  ;;  %s5732_s17 = smov [#allocation4]  }
 0x6e4   : > { %s4588_s15 = sshll.u32 %s5732_s17, 4  ;;  %s4589_s15 = int_to_ptr.vmem [resolvable:$true] %s4588_s15 }
 0x6e5   : > { %s5687_s18 = scalar_lea.vmem %s4589_s15, 2048  ;;  %p5694_p11 = scmp.lt.s32.totalorder %s4589_s15, %s4589_s15 }
 0x6e6   : > { %p5688_p8 = scmp.ne.s32.totalorder %s4589_s15, %s5687_s18  ;;  %p5695_p12 = scmp.lt.s32.totalorder %s5687_s18, %s5687_s18 }
 0x6e8   : > { %p5689_p9 = pnand %p5688_p8, %p5407_p7  ;;  %p5696_p13 = por %p5695_p12, %p5694_p11 }
 0x6ea   : > { %p5690_p10 = pneg %p5689_p9 }
 0x6ec   : > { %p5697_p0 = pnand %p5696_p13, %p5690_p10 }
 0x6ee   : > { %5700 = shalt.err (!%p5697_p0)
}
 0x6ef   : > { %s5733_s22 = smov 128   ;;  %s5734_s14 = smov 8  }
 0x6f0   : > { %s8671_s29 = sld [smem:[#allocation8_spill]] }
 0x6f6   : > { %5404 = dma.vmem_to_hbm [thread:$0]  (%p5407_p7), %s4589_s15, 2048, %s8671_s29, [#allocation5], %s5733_s22, %s5733_s22, %s5734_s14  }
 0x6f7   : > { %5716 = dma.done.wait (%p5407_p7), [#allocation5], 2048  }
 0x6f8   : > { %5718 = vsyncadd (%p5407_p7), [#allocation5], 4294965248 }
 0x6f9 PF: > { %s8672_s20 = sld [smem:[#allocation7_spill]] }
 0x6ff   : > { %s25_s29 = sadd.s32 1, %s8672_s20  }
 0x700   : > { %p22_p1 = scmp.ge.s32.totalorder %s25_s29, 4  }
 0x702   :  { %24 = sbr.rel (!%p22_p1) target bundleno = 3 (0x3), region = 120 }
 0x707   :  { %4604 = vsyncpa [#allocation5], 1 }
 0x708   :  { %4606 = vsyncpa [#allocation5 + $0x1], 1 }

</bundles_post_ra>
